<compile_context>
chip_gen: v7x
topology: tpu7x:2x2x1
jax: 0.10.0
libtpu: 0.0.40
codegen_flags: <defaults>
</compile_context>

<pallas_src>
import jax
import jax.numpy as jnp
from jax.experimental import pallas as pl
from jax.experimental.pallas import tpu as pltpu


def make_refine_kernel(has_skip: bool, has_proj: bool, fuse_taps: bool):
    """Builds the fused RefineBlock kernel for a given input configuration."""

    def kernel(*refs):
        idx = 0
        fn_ref = refs[idx]; idx += 1
        fp1_ref = pw_ref = pb_ref = None
        if has_skip:
            fp1_ref = refs[idx]; idx += 1
            if has_proj:
                pw_ref = refs[idx]; pb_ref = refs[idx + 1]; idx += 2
        wf_ref = refs[idx]       # (9*C, C)  conv weight packed (ky,kx,ci) -> rows
        cb_ref = refs[idx + 1]   # (1, C)
        out_ref = refs[idx + 2]  # (1, H, W, C)
        pad_ref = refs[idx + 3]  # VMEM scratch (H+2, W+2, C) f32

        _, H, W, C = out_ref.shape

        # ---- skip connection (+ optional fused 1x1 channel projection) ------
        fn = fn_ref[0].astype(jnp.float32).reshape(H * W, C)
        combined = fn
        if has_skip:
            fp1 = fp1_ref[0].astype(jnp.float32)
            Cd = fp1.shape[-1]
            fp1 = fp1.reshape(H * W, Cd)
            if has_proj:
                proj = jnp.dot(fp1, pw_ref[...],
                               preferred_element_type=jnp.float32) + pb_ref[0]
                combined = combined + proj
            else:
                combined = combined + fp1          # wrapper guarantees Cd == C

        # ---- zero ONLY the 1-pixel halo, then write the interior ------------
        # (interior is fully overwritten; avoids (H+2)(W+2)C redundant stores)
        zrow = jnp.zeros((1, W + 2, C), jnp.float32)
        pad_ref[0:1, :, :] = zrow
        pad_ref[H + 1:H + 2, :, :] = zrow
        zcol = jnp.zeros((H + 2, 1, C), jnp.float32)
        pad_ref[:, 0:1, :] = zcol
        pad_ref[:, W + 1:W + 2, :] = zcol
        pad_ref[1:H + 1, 1:W + 1, :] = combined.reshape(H, W, C)

        # ---- 3x3 conv (padding=1, stride=1) ----------------------------------
        taps = [pad_ref[ky:ky + H, kx:kx + W, :].reshape(H * W, C)
                for ky in range(3) for kx in range(3)]

        if fuse_taps:
            # Single im2col MXU matmul: (H*W, 9C) @ (9C, C).
            x = jnp.concatenate(taps, axis=-1)
            y = jnp.dot(x, wf_ref[...], preferred_element_type=jnp.float32)
        else:
            # Fallback: nine K=C matmuls against slices of the same packed weight.
            y = jnp.zeros((H * W, C), jnp.float32)
            for t, tap in enumerate(taps):
                y = y + jnp.dot(tap, wf_ref[t * C:(t + 1) * C, :],
                                preferred_element_type=jnp.float32)

        # ---- bias + ReLU + writeback -----------------------------------------
        y = jnp.maximum(y + cb_ref[0], 0.0)
        out_ref[0] = y.reshape(H, W, C).astype(out_ref.dtype)

    return kernel


def _refine_forward_impl(params, fn_nchw, fn_plus_1_nchw, fuse_taps):
    fn = jnp.transpose(fn_nchw, (0, 2, 3, 1))  # -> NHWC
    N, H, W, C = fn.shape

    has_skip = fn_plus_1_nchw is not None
    has_proj = False
    Cd = C

    inputs = [fn]
    in_specs = [pl.BlockSpec((1, H, W, C), lambda n: (n, 0, 0, 0))]

    if has_skip:
        fp1 = jnp.transpose(fn_plus_1_nchw, (0, 2, 3, 1))
        Cd = fp1.shape[-1]
        inputs.append(fp1)
        in_specs.append(pl.BlockSpec((1, H, W, Cd), lambda n: (n, 0, 0, 0)))
        has_proj = (params.get("proj_w") is not None) and (Cd != C)
        if has_proj:
            inputs += [params["proj_w"].astype(jnp.float32),
                       params["proj_b"].astype(jnp.float32).reshape(1, C)]
            in_specs += [pl.BlockSpec((Cd, C), lambda n: (0, 0)),
                         pl.BlockSpec((1, C), lambda n: (0, 0))]
        elif Cd != C:
            raise ValueError(
                f"skip connection without channel_proj requires matching "
                f"channels, got deeper_channels={Cd} vs in_channels={C}")

    # Conv weight packed once in the wrapper as (9*C, C): row = (ky*3+kx)*C + ci.
    wf = params["conv_w"].astype(jnp.float32).reshape(9 * C, C)
    cb = params["conv_b"].astype(jnp.float32).reshape(1, C)
    inputs += [wf, cb]
    in_specs += [pl.BlockSpec((9 * C, C), lambda n: (0, 0)),
                 pl.BlockSpec((1, C), lambda n: (0, 0))]

    # Explicit VMEM budget: double-buffered blocks + weights + f32 pad scratch,
    # with headroom, clamped so it stays safe on v7x's 64 MiB physical VMEM.
    bpe = 4
    per_step = (H * W * (C + (Cd if has_skip else 0)) + H * W * C) * bpe
    weights_b = (9 * C * C + 2 * C + (Cd * C if has_proj else 0)) * bpe
    scratch_b = (H + 2) * (W + 2) * C * bpe
    est = 2 * (per_step + weights_b) + scratch_b
    vmem_limit = int(min(max(4 * est, 32 * 1024 * 1024), 48 * 1024 * 1024))

    # TODO(synk): at production resolutions, tile the H axis (grid=(N, H//tH))
    # with a 1-row halo so the pad scratch + double-buffered blocks stay within
    # the v7x 64 MiB VMEM budget; whole-image blocks are fine at decoder sizes
    # used here.
    out_nhwc = pl.pallas_call(
        make_refine_kernel(has_skip, has_proj, fuse_taps),
        out_shape=jax.ShapeDtypeStruct((N, H, W, C), fn.dtype),
        grid=(N,),
        in_specs=in_specs,
        out_specs=pl.BlockSpec((1, H, W, C), lambda n: (n, 0, 0, 0)),
        scratch_shapes=[pltpu.VMEM((H + 2, W + 2, C), jnp.float32)],
        compiler_params=pltpu.CompilerParams(
            dimension_semantics=("parallel",),   # batch is independent -> 2-TC split on v7x
            vmem_limit_bytes=vmem_limit),
    )(*inputs)

    return jnp.transpose(out_nhwc, (0, 3, 1, 2))  # -> NCHW


def refine_block_forward(params, fn_nchw, fn_plus_1_nchw=None):
    """RefineBlock forward. Inputs/outputs are NCHW (PyTorch convention)."""
    try:
        out = _refine_forward_impl(params, fn_nchw, fn_plus_1_nchw, fuse_taps=True)
        return jax.block_until_ready(out)
    except Exception:
        # Older Mosaic toolchains may reject the unaligned minor-dim concat used
        # by the single-matmul im2col path; fall back to per-tap accumulation
        # (identical math, known-good lowering).
        out = _refine_forward_impl(params, fn_nchw, fn_plus_1_nchw, fuse_taps=False)
        return jax.block_until_ready(out)


# ----------------------------- reference (pure JAX) --------------------------
def ref_forward(params, fn_nchw, fn_plus_1_nchw=None):
    fn = jnp.transpose(fn_nchw, (0, 2, 3, 1))
    C = fn.shape[-1]
    x = fn
    if fn_plus_1_nchw is not None:
        fp1 = jnp.transpose(fn_plus_1_nchw, (0, 2, 3, 1))
        Cd = fp1.shape[-1]
        if params.get("proj_w") is not None and Cd != C:
            p = jax.lax.conv_general_dilated(
                fp1, params["proj_w"].reshape(1, 1, Cd, C), (1, 1), "VALID",
                dimension_numbers=("NHWC", "HWIO", "NHWC")) + params["proj_b"]
            x = fn + p
        else:
            x = fn + fp1
    y = jax.lax.conv_general_dilated(
        x, params["conv_w"], (1, 1), ((1, 1), (1, 1)),
        dimension_numbers=("NHWC", "HWIO", "NHWC")) + params["conv_b"]
    y = jax.nn.relu(y)
    return jnp.transpose(y, (0, 3, 1, 2))


if __name__ == "__main__":
    N, C, Cd, H, W = 2, 4, 8, 16, 16  # in_channels=4, deeper_channels=8

    key = jax.random.PRNGKey(0)
    k_cw, k_cb, k_pw, k_pb, k_x, k_d, k_s = jax.random.split(key, 7)

    # Deterministic synthetic parameters (shapes follow the nn.Module __init__).
    params = {
        # conv_relu[0]: Conv2d(C, C, 3, 1, 1) — stored HWIO (3,3,Cin,Cout)
        "conv_w": jax.random.normal(k_cw, (3, 3, C, C), jnp.float32) * 0.1,
        "conv_b": jax.random.normal(k_cb, (C,), jnp.float32) * 0.1,
        # channel_proj: Conv2d(Cd, C, 1, 1, 0) — stored as (Cd, C) matrix
        "proj_w": jax.random.normal(k_pw, (Cd, C), jnp.float32) * 0.1,
        "proj_b": jax.random.normal(k_pb, (C,), jnp.float32) * 0.1,
    }

    fn = jax.random.normal(k_x, (N, C, H, W), jnp.float32)               # NCHW
    fn_plus_1 = jax.random.normal(k_d, (N, Cd, H, W), jnp.float32)       # NCHW
    fn_plus_1_same = jax.random.normal(k_s, (N, C, H, W), jnp.float32)   # NCHW

    # Path with deeper feature + 1x1 channel projection.
    out_full = refine_block_forward(params, fn, fn_plus_1)
    ref_full = ref_forward(params, fn, fn_plus_1)
    assert out_full.shape == (N, C, H, W)
    assert jnp.allclose(out_full, ref_full, atol=1e-4, rtol=1e-4)

    # Path with deeper feature of matching channel count (no projection).
    out_same = refine_block_forward(params, fn, fn_plus_1_same)
    ref_same = ref_forward(params, fn, fn_plus_1_same)
    assert out_same.shape == (N, C, H, W)
    assert jnp.allclose(out_same, ref_same, atol=1e-4, rtol=1e-4)

    # Path without deeper feature.
    out_base = refine_block_forward(params, fn)
    ref_base = ref_forward(params, fn)
    assert out_base.shape == (N, C, H, W)
    assert jnp.allclose(out_base, ref_base, atol=1e-4, rtol=1e-4)

    print("KERNEL_OK")
</pallas_src>

<mosaic_0001>
module attributes {stable_mosaic.version = 11 : i64} {
  func.func @kernel(%arg0: i32, %arg1: memref<1x16x16x4xf32, #tpu.memory_space<vmem>>, %arg2: memref<1x16x16x8xf32, #tpu.memory_space<vmem>>, %arg3: memref<8x4xf32, #tpu.memory_space<vmem>>, %arg4: memref<1x4xf32, #tpu.memory_space<vmem>>, %arg5: memref<36x4xf32, #tpu.memory_space<vmem>>, %arg6: memref<1x4xf32, #tpu.memory_space<vmem>>, %arg7: memref<1x16x16x4xf32, #tpu.memory_space<vmem>>, %arg8: memref<18x18x4xf32, #tpu.memory_space<vmem>>) attributes {dimension_semantics = [#tpu.dimension_semantics<parallel>], iteration_bounds = array<i64: 2>, scalar_prefetch = 0 : i64, scratch_operands = 1 : i64, tpu.core_type = #tpu.core_type<tc>, window_params = [{transform_indices = @transform_0, window_bounds = array<i64: 1, 16, 16, 4>}, {transform_indices = @transform_1, window_bounds = array<i64: 1, 16, 16, 8>}, {pipeline_mode = #tpu.pipeline_mode<synchronous>, transform_indices = @transform_2, window_bounds = array<i64: 8, 4>}, {pipeline_mode = #tpu.pipeline_mode<synchronous>, transform_indices = @transform_3, window_bounds = array<i64: 1, 4>}, {pipeline_mode = #tpu.pipeline_mode<synchronous>, transform_indices = @transform_4, window_bounds = array<i64: 36, 4>}, {pipeline_mode = #tpu.pipeline_mode<synchronous>, transform_indices = @transform_5, window_bounds = array<i64: 1, 4>}, {transform_indices = @transform_6, window_bounds = array<i64: 1, 16, 16, 4>}]} {
    %c0 = arith.constant 0 : index
    %c0_0 = arith.constant 0 : index
    %c0_1 = arith.constant 0 : index
    %c0_2 = arith.constant 0 : index
    %0 = vector.load %arg1[%c0, %c0_0, %c0_1, %c0_2] : memref<1x16x16x4xf32, #tpu.memory_space<vmem>>, vector<1x16x16x4xf32>
    %1 = vector.shape_cast %0 : vector<1x16x16x4xf32> to vector<16x16x4xf32>
    %2 = vector.shape_cast %1 : vector<16x16x4xf32> to vector<256x4xf32>
    %c0_3 = arith.constant 0 : index
    %c0_4 = arith.constant 0 : index
    %c0_5 = arith.constant 0 : index
    %c0_6 = arith.constant 0 : index
    %3 = vector.load %arg2[%c0_3, %c0_4, %c0_5, %c0_6] : memref<1x16x16x8xf32, #tpu.memory_space<vmem>>, vector<1x16x16x8xf32>
    %4 = vector.shape_cast %3 : vector<1x16x16x8xf32> to vector<16x16x8xf32>
    %5 = vector.shape_cast %4 : vector<16x16x8xf32> to vector<256x8xf32>
    %c0_7 = arith.constant 0 : index
    %c0_8 = arith.constant 0 : index
    %6 = vector.load %arg3[%c0_7, %c0_8] : memref<8x4xf32, #tpu.memory_space<vmem>>, vector<8x4xf32>
    %cst = arith.constant dense<0.000000e+00> : vector<256x4xf32>
    %7 = tpu.matmul %5, %6, %cst {dimension_numbers = #tpu.dot_dimension_numbers<[1], [0], [0], [1], [0, 0, 1, 1], [], []>} : vector<256x8xf32>, vector<8x4xf32>, vector<256x4xf32> -> vector<256x4xf32>
    %c0_9 = arith.constant 0 : index
    %c0_10 = arith.constant 0 : index
    %8 = vector.load %arg4[%c0_9, %c0_10] : memref<1x4xf32, #tpu.memory_space<vmem>>, vector<1x4xf32>
    %9 = vector.shape_cast %8 : vector<1x4xf32> to vector<4xf32>
    %10 = vector.shape_cast %9 : vector<4xf32> to vector<1x4xf32>
    %11 = vector.broadcast %10 : vector<1x4xf32> to vector<256x4xf32>
    %12 = arith.addf %7, %11 : vector<256x4xf32>
    %13 = arith.addf %2, %12 : vector<256x4xf32>
    %cst_11 = arith.constant 0.000000e+00 : f32
    %14 = vector.broadcast %cst_11 : f32 to vector<1x18x4xf32>
    %c0_12 = arith.constant 0 : index
    %c0_13 = arith.constant 0 : index
    %c0_14 = arith.constant 0 : index
    %15 = vector.load %arg8[%c0_12, %c0_13, %c0_14] : memref<18x18x4xf32, #tpu.memory_space<vmem>>, vector<1x18x4xf32>
    tpu.vector_store %arg8[%c0_12, %c0_13, %c0_14], %14 {strides = array<i32>} : memref<18x18x4xf32, #tpu.memory_space<vmem>>, vector<1x18x4xf32>,
    %c17 = arith.constant 17 : index
    %c0_15 = arith.constant 0 : index
    %c0_16 = arith.constant 0 : index
    %16 = vector.load %arg8[%c17, %c0_15, %c0_16] : memref<18x18x4xf32, #tpu.memory_space<vmem>>, vector<1x18x4xf32>
    tpu.vector_store %arg8[%c17, %c0_15, %c0_16], %14 {strides = array<i32>} : memref<18x18x4xf32, #tpu.memory_space<vmem>>, vector<1x18x4xf32>,
    %cst_17 = arith.constant 0.000000e+00 : f32
    %17 = vector.broadcast %cst_17 : f32 to vector<18x1x4xf32>
    %c0_18 = arith.constant 0 : index
    %c0_19 = arith.constant 0 : index
    %c0_20 = arith.constant 0 : index
    %18 = vector.load %arg8[%c0_18, %c0_19, %c0_20] : memref<18x18x4xf32, #tpu.memory_space<vmem>>, vector<18x1x4xf32>
    tpu.vector_store %arg8[%c0_18, %c0_19, %c0_20], %17 {strides = array<i32>} : memref<18x18x4xf32, #tpu.memory_space<vmem>>, vector<18x1x4xf32>,
    %c0_21 = arith.constant 0 : index
    %c17_22 = arith.constant 17 : index
    %c0_23 = arith.constant 0 : index
    %19 = vector.load %arg8[%c0_21, %c17_22, %c0_23] : memref<18x18x4xf32, #tpu.memory_space<vmem>>, vector<18x1x4xf32>
    tpu.vector_store %arg8[%c0_21, %c17_22, %c0_23], %17 {strides = array<i32>} : memref<18x18x4xf32, #tpu.memory_space<vmem>>, vector<18x1x4xf32>,
    %20 = vector.shape_cast %13 : vector<256x4xf32> to vector<16x16x4xf32>
    %c1 = arith.constant 1 : index
    %c1_24 = arith.constant 1 : index
    %c0_25 = arith.constant 0 : index
    %21 = vector.load %arg8[%c1, %c1_24, %c0_25] : memref<18x18x4xf32, #tpu.memory_space<vmem>>, vector<16x16x4xf32>
    tpu.vector_store %arg8[%c1, %c1_24, %c0_25], %20 {strides = array<i32>} : memref<18x18x4xf32, #tpu.memory_space<vmem>>, vector<16x16x4xf32>,
    %c0_26 = arith.constant 0 : index
    %c0_27 = arith.constant 0 : index
    %c0_28 = arith.constant 0 : index
    %22 = vector.load %arg8[%c0_26, %c0_27, %c0_28] : memref<18x18x4xf32, #tpu.memory_space<vmem>>, vector<16x16x4xf32>
    %23 = vector.shape_cast %22 : vector<16x16x4xf32> to vector<256x4xf32>
    %c0_29 = arith.constant 0 : index
    %c1_30 = arith.constant 1 : index
    %c0_31 = arith.constant 0 : index
    %24 = vector.load %arg8[%c0_29, %c1_30, %c0_31] : memref<18x18x4xf32, #tpu.memory_space<vmem>>, vector<16x16x4xf32>
    %25 = vector.shape_cast %24 : vector<16x16x4xf32> to vector<256x4xf32>
    %c0_32 = arith.constant 0 : index
    %c2 = arith.constant 2 : index
    %c0_33 = arith.constant 0 : index
    %26 = vector.load %arg8[%c0_32, %c2, %c0_33] : memref<18x18x4xf32, #tpu.memory_space<vmem>>, vector<16x16x4xf32>
    %27 = vector.shape_cast %26 : vector<16x16x4xf32> to vector<256x4xf32>
    %c1_34 = arith.constant 1 : index
    %c0_35 = arith.constant 0 : index
    %c0_36 = arith.constant 0 : index
    %28 = vector.load %arg8[%c1_34, %c0_35, %c0_36] : memref<18x18x4xf32, #tpu.memory_space<vmem>>, vector<16x16x4xf32>
    %29 = vector.shape_cast %28 : vector<16x16x4xf32> to vector<256x4xf32>
    %c1_37 = arith.constant 1 : index
    %c1_38 = arith.constant 1 : index
    %c0_39 = arith.constant 0 : index
    %30 = vector.load %arg8[%c1_37, %c1_38, %c0_39] : memref<18x18x4xf32, #tpu.memory_space<vmem>>, vector<16x16x4xf32>
    %31 = vector.shape_cast %30 : vector<16x16x4xf32> to vector<256x4xf32>
    %c1_40 = arith.constant 1 : index
    %c2_41 = arith.constant 2 : index
    %c0_42 = arith.constant 0 : index
    %32 = vector.load %arg8[%c1_40, %c2_41, %c0_42] : memref<18x18x4xf32, #tpu.memory_space<vmem>>, vector<16x16x4xf32>
    %33 = vector.shape_cast %32 : vector<16x16x4xf32> to vector<256x4xf32>
    %c2_43 = arith.constant 2 : index
    %c0_44 = arith.constant 0 : index
    %c0_45 = arith.constant 0 : index
    %34 = vector.load %arg8[%c2_43, %c0_44, %c0_45] : memref<18x18x4xf32, #tpu.memory_space<vmem>>, vector<16x16x4xf32>
    %35 = vector.shape_cast %34 : vector<16x16x4xf32> to vector<256x4xf32>
    %c2_46 = arith.constant 2 : index
    %c1_47 = arith.constant 1 : index
    %c0_48 = arith.constant 0 : index
    %36 = vector.load %arg8[%c2_46, %c1_47, %c0_48] : memref<18x18x4xf32, #tpu.memory_space<vmem>>, vector<16x16x4xf32>
    %37 = vector.shape_cast %36 : vector<16x16x4xf32> to vector<256x4xf32>
    %c2_49 = arith.constant 2 : index
    %c2_50 = arith.constant 2 : index
    %c0_51 = arith.constant 0 : index
    %38 = vector.load %arg8[%c2_49, %c2_50, %c0_51] : memref<18x18x4xf32, #tpu.memory_space<vmem>>, vector<16x16x4xf32>
    %39 = vector.shape_cast %38 : vector<16x16x4xf32> to vector<256x4xf32>
    %40 = tpu.concatenate %23, %25, %27, %29, %31, %33, %35, %37, %39 in 1 : vector<256x4xf32>, vector<256x4xf32>, vector<256x4xf32>, vector<256x4xf32>, vector<256x4xf32>, vector<256x4xf32>, vector<256x4xf32>, vector<256x4xf32>, vector<256x4xf32> -> vector<256x36xf32>
    %c0_52 = arith.constant 0 : index
    %c0_53 = arith.constant 0 : index
    %41 = vector.load %arg5[%c0_52, %c0_53] : memref<36x4xf32, #tpu.memory_space<vmem>>, vector<36x4xf32>
    %cst_54 = arith.constant dense<0.000000e+00> : vector<256x4xf32>
    %42 = tpu.matmul %40, %41, %cst_54 {dimension_numbers = #tpu.dot_dimension_numbers<[1], [0], [0], [1], [0, 0, 1, 1], [], []>} : vector<256x36xf32>, vector<36x4xf32>, vector<256x4xf32> -> vector<256x4xf32>
    %c0_55 = arith.constant 0 : index
    %c0_56 = arith.constant 0 : index
    %43 = vector.load %arg6[%c0_55, %c0_56] : memref<1x4xf32, #tpu.memory_space<vmem>>, vector<1x4xf32>
    %44 = vector.shape_cast %43 : vector<1x4xf32> to vector<4xf32>
    %45 = vector.shape_cast %44 : vector<4xf32> to vector<1x4xf32>
    %46 = vector.broadcast %45 : vector<1x4xf32> to vector<256x4xf32>
    %47 = arith.addf %42, %46 : vector<256x4xf32>
    %cst_57 = arith.constant 0.000000e+00 : f32
    %48 = vector.broadcast %cst_57 : f32 to vector<256x4xf32>
    %49 = arith.maximumf %47, %48 : vector<256x4xf32>
    %50 = vector.shape_cast %49 : vector<256x4xf32> to vector<16x16x4xf32>
    %c0_58 = arith.constant 0 : index
    %c0_59 = arith.constant 0 : index
    %c0_60 = arith.constant 0 : index
    %c0_61 = arith.constant 0 : index
    %51 = vector.load %arg7[%c0_58, %c0_59, %c0_60, %c0_61] : memref<1x16x16x4xf32, #tpu.memory_space<vmem>>, vector<1x16x16x4xf32>
    %52 = vector.shape_cast %51 : vector<1x16x16x4xf32> to vector<16x16x4xf32>
    %53 = vector.shape_cast %50 : vector<16x16x4xf32> to vector<1x16x16x4xf32>
    tpu.vector_store %arg7[%c0_58, %c0_59, %c0_60, %c0_61], %53 {strides = array<i32>} : memref<1x16x16x4xf32, #tpu.memory_space<vmem>>, vector<1x16x16x4xf32>,
    return
  }
  func.func @transform_0(%arg0: i32) -> (i32, i32, i32, i32) {
    %c0_i32 = arith.constant 0 : i32
    %c0_i32_0 = arith.constant 0 : i32
    %c0_i32_1 = arith.constant 0 : i32
    %c0_i32_2 = arith.constant 0 : i32
    return %arg0, %c0_i32, %c0_i32_0, %c0_i32_1 : i32, i32, i32, i32
  }
  func.func @transform_1(%arg0: i32) -> (i32, i32, i32, i32) {
    %c0_i32 = arith.constant 0 : i32
    %c0_i32_0 = arith.constant 0 : i32
    %c0_i32_1 = arith.constant 0 : i32
    %c0_i32_2 = arith.constant 0 : i32
    return %arg0, %c0_i32, %c0_i32_0, %c0_i32_1 : i32, i32, i32, i32
  }
  func.func @transform_2(%arg0: i32) -> (i32, i32) {
    %c0_i32 = arith.constant 0 : i32
    %c0_i32_0 = arith.constant 0 : i32
    %c0_i32_1 = arith.constant 0 : i32
    return %c0_i32, %c0_i32_0 : i32, i32
  }
  func.func @transform_3(%arg0: i32) -> (i32, i32) {
    %c0_i32 = arith.constant 0 : i32
    %c0_i32_0 = arith.constant 0 : i32
    %c0_i32_1 = arith.constant 0 : i32
    return %c0_i32, %c0_i32_0 : i32, i32
  }
  func.func @transform_4(%arg0: i32) -> (i32, i32) {
    %c0_i32 = arith.constant 0 : i32
    %c0_i32_0 = arith.constant 0 : i32
    %c0_i32_1 = arith.constant 0 : i32
    return %c0_i32, %c0_i32_0 : i32, i32
  }
  func.func @transform_5(%arg0: i32) -> (i32, i32) {
    %c0_i32 = arith.constant 0 : i32
    %c0_i32_0 = arith.constant 0 : i32
    %c0_i32_1 = arith.constant 0 : i32
    return %c0_i32, %c0_i32_0 : i32, i32
  }
  func.func @transform_6(%arg0: i32) -> (i32, i32, i32, i32) {
    %c0_i32 = arith.constant 0 : i32
    %c0_i32_0 = arith.constant 0 : i32
    %c0_i32_1 = arith.constant 0 : i32
    %c0_i32_2 = arith.constant 0 : i32
    return %arg0, %c0_i32, %c0_i32_0, %c0_i32_1 : i32, i32, i32, i32
  }
}

module attributes {stable_mosaic.version = 11 : i64} {
  func.func @kernel(%arg0: i32, %arg1: memref<1x16x16x4xf32, #tpu.memory_space<vmem>>, %arg2: memref<1x16x16x8xf32, #tpu.memory_space<vmem>>, %arg3: memref<8x4xf32, #tpu.memory_space<vmem>>, %arg4: memref<1x4xf32, #tpu.memory_space<vmem>>, %arg5: memref<36x4xf32, #tpu.memory_space<vmem>>, %arg6: memref<1x4xf32, #tpu.memory_space<vmem>>, %arg7: memref<1x16x16x4xf32, #tpu.memory_space<vmem>>, %arg8: memref<18x18x4xf32, #tpu.memory_space<vmem>>) attributes {dimension_semantics = [#tpu.dimension_semantics<parallel>], iteration_bounds = array<i64: 2>, scalar_prefetch = 0 : i64, scratch_operands = 1 : i64, tpu.core_type = #tpu.core_type<tc>, window_params = [{transform_indices = @transform_0, window_bounds = array<i64: 1, 16, 16, 4>}, {transform_indices = @transform_1, window_bounds = array<i64: 1, 16, 16, 8>}, {pipeline_mode = #tpu.pipeline_mode<synchronous>, transform_indices = @transform_2, window_bounds = array<i64: 8, 4>}, {pipeline_mode = #tpu.pipeline_mode<synchronous>, transform_indices = @transform_3, window_bounds = array<i64: 1, 4>}, {pipeline_mode = #tpu.pipeline_mode<synchronous>, transform_indices = @transform_4, window_bounds = array<i64: 36, 4>}, {pipeline_mode = #tpu.pipeline_mode<synchronous>, transform_indices = @transform_5, window_bounds = array<i64: 1, 4>}, {transform_indices = @transform_6, window_bounds = array<i64: 1, 16, 16, 4>}]} {
    %c0 = arith.constant 0 : index
    %c0_0 = arith.constant 0 : index
    %c0_1 = arith.constant 0 : index
    %c0_2 = arith.constant 0 : index
    %0 = vector.load %arg1[%c0, %c0_0, %c0_1, %c0_2] : memref<1x16x16x4xf32, #tpu.memory_space<vmem>>, vector<1x16x16x4xf32>
    %1 = vector.shape_cast %0 : vector<1x16x16x4xf32> to vector<16x16x4xf32>
    %2 = vector.shape_cast %1 : vector<16x16x4xf32> to vector<256x4xf32>
    %c0_3 = arith.constant 0 : index
    %c0_4 = arith.constant 0 : index
    %c0_5 = arith.constant 0 : index
    %c0_6 = arith.constant 0 : index
    %3 = vector.load %arg2[%c0_3, %c0_4, %c0_5, %c0_6] : memref<1x16x16x8xf32, #tpu.memory_space<vmem>>, vector<1x16x16x8xf32>
    %4 = vector.shape_cast %3 : vector<1x16x16x8xf32> to vector<16x16x8xf32>
    %5 = vector.shape_cast %4 : vector<16x16x8xf32> to vector<256x8xf32>
    %c0_7 = arith.constant 0 : index
    %c0_8 = arith.constant 0 : index
    %6 = vector.load %arg3[%c0_7, %c0_8] : memref<8x4xf32, #tpu.memory_space<vmem>>, vector<8x4xf32>
    %cst = arith.constant dense<0.000000e+00> : vector<256x4xf32>
    %7 = tpu.matmul %5, %6, %cst {dimension_numbers = #tpu.dot_dimension_numbers<[1], [0], [0], [1], [0, 0, 1, 1], [], []>} : vector<256x8xf32>, vector<8x4xf32>, vector<256x4xf32> -> vector<256x4xf32>
    %c0_9 = arith.constant 0 : index
    %c0_10 = arith.constant 0 : index
    %8 = vector.load %arg4[%c0_9, %c0_10] : memref<1x4xf32, #tpu.memory_space<vmem>>, vector<1x4xf32>
    %9 = vector.shape_cast %8 : vector<1x4xf32> to vector<4xf32>
    %10 = vector.shape_cast %9 : vector<4xf32> to vector<1x4xf32>
    %11 = vector.broadcast %10 : vector<1x4xf32> to vector<256x4xf32>
    %12 = arith.addf %7, %11 : vector<256x4xf32>
    %13 = arith.addf %2, %12 : vector<256x4xf32>
    %cst_11 = arith.constant 0.000000e+00 : f32
    %14 = vector.broadcast %cst_11 : f32 to vector<1x18x4xf32>
    %c0_12 = arith.constant 0 : index
    %c0_13 = arith.constant 0 : index
    %c0_14 = arith.constant 0 : index
    %15 = vector.load %arg8[%c0_12, %c0_13, %c0_14] : memref<18x18x4xf32, #tpu.memory_space<vmem>>, vector<1x18x4xf32>
    tpu.vector_store %arg8[%c0_12, %c0_13, %c0_14], %14 {strides = array<i32>} : memref<18x18x4xf32, #tpu.memory_space<vmem>>, vector<1x18x4xf32>,
    %c17 = arith.constant 17 : index
    %c0_15 = arith.constant 0 : index
    %c0_16 = arith.constant 0 : index
    %16 = vector.load %arg8[%c17, %c0_15, %c0_16] : memref<18x18x4xf32, #tpu.memory_space<vmem>>, vector<1x18x4xf32>
    tpu.vector_store %arg8[%c17, %c0_15, %c0_16], %14 {strides = array<i32>} : memref<18x18x4xf32, #tpu.memory_space<vmem>>, vector<1x18x4xf32>,
    %cst_17 = arith.constant 0.000000e+00 : f32
    %17 = vector.broadcast %cst_17 : f32 to vector<18x1x4xf32>
    %c0_18 = arith.constant 0 : index
    %c0_19 = arith.constant 0 : index
    %c0_20 = arith.constant 0 : index
    %18 = vector.load %arg8[%c0_18, %c0_19, %c0_20] : memref<18x18x4xf32, #tpu.memory_space<vmem>>, vector<18x1x4xf32>
    tpu.vector_store %arg8[%c0_18, %c0_19, %c0_20], %17 {strides = array<i32>} : memref<18x18x4xf32, #tpu.memory_space<vmem>>, vector<18x1x4xf32>,
    %c0_21 = arith.constant 0 : index
    %c17_22 = arith.constant 17 : index
    %c0_23 = arith.constant 0 : index
    %19 = vector.load %arg8[%c0_21, %c17_22, %c0_23] : memref<18x18x4xf32, #tpu.memory_space<vmem>>, vector<18x1x4xf32>
    tpu.vector_store %arg8[%c0_21, %c17_22, %c0_23], %17 {strides = array<i32>} : memref<18x18x4xf32, #tpu.memory_space<vmem>>, vector<18x1x4xf32>,
    %20 = vector.shape_cast %13 : vector<256x4xf32> to vector<16x16x4xf32>
    %c1 = arith.constant 1 : index
    %c1_24 = arith.constant 1 : index
    %c0_25 = arith.constant 0 : index
    %21 = vector.load %arg8[%c1, %c1_24, %c0_25] : memref<18x18x4xf32, #tpu.memory_space<vmem>>, vector<16x16x4xf32>
    tpu.vector_store %arg8[%c1, %c1_24, %c0_25], %20 {strides = array<i32>} : memref<18x18x4xf32, #tpu.memory_space<vmem>>, vector<16x16x4xf32>,
    %c0_26 = arith.constant 0 : index
    %c0_27 = arith.constant 0 : index
    %c0_28 = arith.constant 0 : index
    %22 = vector.load %arg8[%c0_26, %c0_27, %c0_28] : memref<18x18x4xf32, #tpu.memory_space<vmem>>, vector<16x16x4xf32>
    %23 = vector.shape_cast %22 : vector<16x16x4xf32> to vector<256x4xf32>
    %c0_29 = arith.constant 0 : index
    %c1_30 = arith.constant 1 : index
    %c0_31 = arith.constant 0 : index
    %24 = vector.load %arg8[%c0_29, %c1_30, %c0_31] : memref<18x18x4xf32, #tpu.memory_space<vmem>>, vector<16x16x4xf32>
    %25 = vector.shape_cast %24 : vector<16x16x4xf32> to vector<256x4xf32>
    %c0_32 = arith.constant 0 : index
    %c2 = arith.constant 2 : index
    %c0_33 = arith.constant 0 : index
    %26 = vector.load %arg8[%c0_32, %c2, %c0_33] : memref<18x18x4xf32, #tpu.memory_space<vmem>>, vector<16x16x4xf32>
    %27 = vector.shape_cast %26 : vector<16x16x4xf32> to vector<256x4xf32>
    %c1_34 = arith.constant 1 : index
    %c0_35 = arith.constant 0 : index
    %c0_36 = arith.constant 0 : index
    %28 = vector.load %arg8[%c1_34, %c0_35, %c0_36] : memref<18x18x4xf32, #tpu.memory_space<vmem>>, vector<16x16x4xf32>
    %29 = vector.shape_cast %28 : vector<16x16x4xf32> to vector<256x4xf32>
    %c1_37 = arith.constant 1 : index
    %c1_38 = arith.constant 1 : index
    %c0_39 = arith.constant 0 : index
    %30 = vector.load %arg8[%c1_37, %c1_38, %c0_39] : memref<18x18x4xf32, #tpu.memory_space<vmem>>, vector<16x16x4xf32>
    %31 = vector.shape_cast %30 : vector<16x16x4xf32> to vector<256x4xf32>
    %c1_40 = arith.constant 1 : index
    %c2_41 = arith.constant 2 : index
    %c0_42 = arith.constant 0 : index
    %32 = vector.load %arg8[%c1_40, %c2_41, %c0_42] : memref<18x18x4xf32, #tpu.memory_space<vmem>>, vector<16x16x4xf32>
    %33 = vector.shape_cast %32 : vector<16x16x4xf32> to vector<256x4xf32>
    %c2_43 = arith.constant 2 : index
    %c0_44 = arith.constant 0 : index
    %c0_45 = arith.constant 0 : index
    %34 = vector.load %arg8[%c2_43, %c0_44, %c0_45] : memref<18x18x4xf32, #tpu.memory_space<vmem>>, vector<16x16x4xf32>
    %35 = vector.shape_cast %34 : vector<16x16x4xf32> to vector<256x4xf32>
    %c2_46 = arith.constant 2 : index
    %c1_47 = arith.constant 1 : index
    %c0_48 = arith.constant 0 : index
    %36 = vector.load %arg8[%c2_46, %c1_47, %c0_48] : memref<18x18x4xf32, #tpu.memory_space<vmem>>, vector<16x16x4xf32>
    %37 = vector.shape_cast %36 : vector<16x16x4xf32> to vector<256x4xf32>
    %c2_49 = arith.constant 2 : index
    %c2_50 = arith.constant 2 : index
    %c0_51 = arith.constant 0 : index
    %38 = vector.load %arg8[%c2_49, %c2_50, %c0_51] : memref<18x18x4xf32, #tpu.memory_space<vmem>>, vector<16x16x4xf32>
    %39 = vector.shape_cast %38 : vector<16x16x4xf32> to vector<256x4xf32>
    %cst_52 = arith.constant 0.000000e+00 : f32
    %40 = vector.broadcast %cst_52 : f32 to vector<256x4xf32>
    %c0_53 = arith.constant 0 : index
    %c0_54 = arith.constant 0 : index
    %41 = vector.load %arg5[%c0_53, %c0_54] : memref<36x4xf32, #tpu.memory_space<vmem>>, vector<4x4xf32>
    %cst_55 = arith.constant dense<0.000000e+00> : vector<256x4xf32>
    %42 = tpu.matmul %23, %41, %cst_55 {dimension_numbers = #tpu.dot_dimension_numbers<[1], [0], [0], [1], [0, 0, 1, 1], [], []>} : vector<256x4xf32>, vector<4x4xf32>, vector<256x4xf32> -> vector<256x4xf32>
    %43 = arith.addf %40, %42 : vector<256x4xf32>
    %c4 = arith.constant 4 : index
    %c0_56 = arith.constant 0 : index
    %44 = vector.load %arg5[%c4, %c0_56] : memref<36x4xf32, #tpu.memory_space<vmem>>, vector<4x4xf32>
    %cst_57 = arith.constant dense<0.000000e+00> : vector<256x4xf32>
    %45 = tpu.matmul %25, %44, %cst_57 {dimension_numbers = #tpu.dot_dimension_numbers<[1], [0], [0], [1], [0, 0, 1, 1], [], []>} : vector<256x4xf32>, vector<4x4xf32>, vector<256x4xf32> -> vector<256x4xf32>
    %46 = arith.addf %43, %45 : vector<256x4xf32>
    %c8 = arith.constant 8 : index
    %c0_58 = arith.constant 0 : index
    %47 = vector.load %arg5[%c8, %c0_58] : memref<36x4xf32, #tpu.memory_space<vmem>>, vector<4x4xf32>
    %cst_59 = arith.constant dense<0.000000e+00> : vector<256x4xf32>
    %48 = tpu.matmul %27, %47, %cst_59 {dimension_numbers = #tpu.dot_dimension_numbers<[1], [0], [0], [1], [0, 0, 1, 1], [], []>} : vector<256x4xf32>, vector<4x4xf32>, vector<256x4xf32> -> vector<256x4xf32>
    %49 = arith.addf %46, %48 : vector<256x4xf32>
    %c12 = arith.constant 12 : index
    %c0_60 = arith.constant 0 : index
    %50 = vector.load %arg5[%c12, %c0_60] : memref<36x4xf32, #tpu.memory_space<vmem>>, vector<4x4xf32>
    %cst_61 = arith.constant dense<0.000000e+00> : vector<256x4xf32>
    %51 = tpu.matmul %29, %50, %cst_61 {dimension_numbers = #tpu.dot_dimension_numbers<[1], [0], [0], [1], [0, 0, 1, 1], [], []>} : vector<256x4xf32>, vector<4x4xf32>, vector<256x4xf32> -> vector<256x4xf32>
    %52 = arith.addf %49, %51 : vector<256x4xf32>
    %c16 = arith.constant 16 : index
    %c0_62 = arith.constant 0 : index
    %53 = vector.load %arg5[%c16, %c0_62] : memref<36x4xf32, #tpu.memory_space<vmem>>, vector<4x4xf32>
    %cst_63 = arith.constant dense<0.000000e+00> : vector<256x4xf32>
    %54 = tpu.matmul %31, %53, %cst_63 {dimension_numbers = #tpu.dot_dimension_numbers<[1], [0], [0], [1], [0, 0, 1, 1], [], []>} : vector<256x4xf32>, vector<4x4xf32>, vector<256x4xf32> -> vector<256x4xf32>
    %55 = arith.addf %52, %54 : vector<256x4xf32>
    %c20 = arith.constant 20 : index
    %c0_64 = arith.constant 0 : index
    %56 = vector.load %arg5[%c20, %c0_64] : memref<36x4xf32, #tpu.memory_space<vmem>>, vector<4x4xf32>
    %cst_65 = arith.constant dense<0.000000e+00> : vector<256x4xf32>
    %57 = tpu.matmul %33, %56, %cst_65 {dimension_numbers = #tpu.dot_dimension_numbers<[1], [0], [0], [1], [0, 0, 1, 1], [], []>} : vector<256x4xf32>, vector<4x4xf32>, vector<256x4xf32> -> vector<256x4xf32>
    %58 = arith.addf %55, %57 : vector<256x4xf32>
    %c24 = arith.constant 24 : index
    %c0_66 = arith.constant 0 : index
    %59 = vector.load %arg5[%c24, %c0_66] : memref<36x4xf32, #tpu.memory_space<vmem>>, vector<4x4xf32>
    %cst_67 = arith.constant dense<0.000000e+00> : vector<256x4xf32>
    %60 = tpu.matmul %35, %59, %cst_67 {dimension_numbers = #tpu.dot_dimension_numbers<[1], [0], [0], [1], [0, 0, 1, 1], [], []>} : vector<256x4xf32>, vector<4x4xf32>, vector<256x4xf32> -> vector<256x4xf32>
    %61 = arith.addf %58, %60 : vector<256x4xf32>
    %c28 = arith.constant 28 : index
    %c0_68 = arith.constant 0 : index
    %62 = vector.load %arg5[%c28, %c0_68] : memref<36x4xf32, #tpu.memory_space<vmem>>, vector<4x4xf32>
    %cst_69 = arith.constant dense<0.000000e+00> : vector<256x4xf32>
    %63 = tpu.matmul %37, %62, %cst_69 {dimension_numbers = #tpu.dot_dimension_numbers<[1], [0], [0], [1], [0, 0, 1, 1], [], []>} : vector<256x4xf32>, vector<4x4xf32>, vector<256x4xf32> -> vector<256x4xf32>
    %64 = arith.addf %61, %63 : vector<256x4xf32>
    %c32 = arith.constant 32 : index
    %c0_70 = arith.constant 0 : index
    %65 = vector.load %arg5[%c32, %c0_70] : memref<36x4xf32, #tpu.memory_space<vmem>>, vector<4x4xf32>
    %cst_71 = arith.constant dense<0.000000e+00> : vector<256x4xf32>
    %66 = tpu.matmul %39, %65, %cst_71 {dimension_numbers = #tpu.dot_dimension_numbers<[1], [0], [0], [1], [0, 0, 1, 1], [], []>} : vector<256x4xf32>, vector<4x4xf32>, vector<256x4xf32> -> vector<256x4xf32>
    %67 = arith.addf %64, %66 : vector<256x4xf32>
    %c0_72 = arith.constant 0 : index
    %c0_73 = arith.constant 0 : index
    %68 = vector.load %arg6[%c0_72, %c0_73] : memref<1x4xf32, #tpu.memory_space<vmem>>, vector<1x4xf32>
    %69 = vector.shape_cast %68 : vector<1x4xf32> to vector<4xf32>
    %70 = vector.shape_cast %69 : vector<4xf32> to vector<1x4xf32>
    %71 = vector.broadcast %70 : vector<1x4xf32> to vector<256x4xf32>
    %72 = arith.addf %67, %71 : vector<256x4xf32>
    %cst_74 = arith.constant 0.000000e+00 : f32
    %73 = vector.broadcast %cst_74 : f32 to vector<256x4xf32>
    %74 = arith.maximumf %72, %73 : vector<256x4xf32>
    %75 = vector.shape_cast %74 : vector<256x4xf32> to vector<16x16x4xf32>
    %c0_75 = arith.constant 0 : index
    %c0_76 = arith.constant 0 : index
    %c0_77 = arith.constant 0 : index
    %c0_78 = arith.constant 0 : index
    %76 = vector.load %arg7[%c0_75, %c0_76, %c0_77, %c0_78] : memref<1x16x16x4xf32, #tpu.memory_space<vmem>>, vector<1x16x16x4xf32>
    %77 = vector.shape_cast %76 : vector<1x16x16x4xf32> to vector<16x16x4xf32>
    %78 = vector.shape_cast %75 : vector<16x16x4xf32> to vector<1x16x16x4xf32>
    tpu.vector_store %arg7[%c0_75, %c0_76, %c0_77, %c0_78], %78 {strides = array<i32>} : memref<1x16x16x4xf32, #tpu.memory_space<vmem>>, vector<1x16x16x4xf32>,
    return
  }
  func.func @transform_0(%arg0: i32) -> (i32, i32, i32, i32) {
    %c0_i32 = arith.constant 0 : i32
    %c0_i32_0 = arith.constant 0 : i32
    %c0_i32_1 = arith.constant 0 : i32
    %c0_i32_2 = arith.constant 0 : i32
    return %arg0, %c0_i32, %c0_i32_0, %c0_i32_1 : i32, i32, i32, i32
  }
  func.func @transform_1(%arg0: i32) -> (i32, i32, i32, i32) {
    %c0_i32 = arith.constant 0 : i32
    %c0_i32_0 = arith.constant 0 : i32
    %c0_i32_1 = arith.constant 0 : i32
    %c0_i32_2 = arith.constant 0 : i32
    return %arg0, %c0_i32, %c0_i32_0, %c0_i32_1 : i32, i32, i32, i32
  }
  func.func @transform_2(%arg0: i32) -> (i32, i32) {
    %c0_i32 = arith.constant 0 : i32
    %c0_i32_0 = arith.constant 0 : i32
    %c0_i32_1 = arith.constant 0 : i32
    return %c0_i32, %c0_i32_0 : i32, i32
  }
  func.func @transform_3(%arg0: i32) -> (i32, i32) {
    %c0_i32 = arith.constant 0 : i32
    %c0_i32_0 = arith.constant 0 : i32
    %c0_i32_1 = arith.constant 0 : i32
    return %c0_i32, %c0_i32_0 : i32, i32
  }
  func.func @transform_4(%arg0: i32) -> (i32, i32) {
    %c0_i32 = arith.constant 0 : i32
    %c0_i32_0 = arith.constant 0 : i32
    %c0_i32_1 = arith.constant 0 : i32
    return %c0_i32, %c0_i32_0 : i32, i32
  }
  func.func @transform_5(%arg0: i32) -> (i32, i32) {
    %c0_i32 = arith.constant 0 : i32
    %c0_i32_0 = arith.constant 0 : i32
    %c0_i32_1 = arith.constant 0 : i32
    return %c0_i32, %c0_i32_0 : i32, i32
  }
  func.func @transform_6(%arg0: i32) -> (i32, i32, i32, i32) {
    %c0_i32 = arith.constant 0 : i32
    %c0_i32_0 = arith.constant 0 : i32
    %c0_i32_1 = arith.constant 0 : i32
    %c0_i32_2 = arith.constant 0 : i32
    return %arg0, %c0_i32, %c0_i32_0, %c0_i32_1 : i32, i32, i32, i32
  }
}

</mosaic_0001>

<bundles_post_ra>
// kernel: tpu_custom_call.1
= control target key start
LH: loop header
LB: loop body
LE: loop exit
PB: predicated region body
PF: predicated region fallthrough
CT: control target
= control target key end

     0   :  { %s3167_s21 = smov 0   ;;  %s4689_s0 = inlined_call_operand.vmem [shape: f32[2,16,16,4], index: 0, kind: input, shape index: {}]   ;;  %s4690_s1 = inlined_call_operand.vmem [shape: f32[2,16,16,8], index: 1, kind: input, shape index: {}]   ;;  %s4691_s2 = inlined_call_operand.vmem [shape: f32[8,4], index: 2, kind: input, shape index: {}]   ;;  %s4692_s3 = inlined_call_operand.vmem [shape: f32[1,4], index: 3, kind: input, shape index: {}]   ;;  %s4693_s4 = inlined_call_operand.vmem [shape: f32[36,4], index: 4, kind: input, shape index: {}]   ;;  %s4694_s5 = inlined_call_operand.vmem [shape: f32[1,4], index: 5, kind: input, shape index: {}]   ;;  %s4695_s6 = inlined_call_operand.vmem [shape: f32[2,16,16,4], index: 6, kind: output, shape index: {}]  }
   0x1 LB: > { %s2821_s22 = sadd.s32 4294967295, %s3121_s21   ;;  %p2825_p0 = scmp.ge.s32.totalorder %s3121_s21, 1  ;;  %s3121_s21 = sphi %s3167_s21, %s16_s21  }
   0x2   : > { %p222_p1 = scmp.lt.s32.totalorder %s3121_s21, 3 }
   0x4   : > { %p223_p2 = pnand %p2825_p0, %p222_p1 }
   0x6   : > { %226 = sbr.rel (%p223_p2) target bundleno = 1082 (0x43a), region = 44 }
   0xd   : > { %v336_v0 = vld [vmem:[%s4691_s2] sm:$0xff]  ;;  %p257_p3 = scmp.lt.s32.totalorder %s2821_s22, 1  ;;  %vm344_vm0 = vcmask 64512   ;;  %vm698_vm1 = vcmask 31744   ;;  %v3123_v19 = vmov 0.0   ;;  %vm701_vm2 = vcmask 25600  }
   0xe   : > { %2974 = vmatprep.subr.mxu0 %v336_v0  ;;  %699 = vst.msk [vmem:[#allocation2] sm:$0xff] %vm698_vm1, %v3123_v19  ;;  %700 = vst.msk [vmem:[#allocation2 + $0x8] sm:$0xff] %vm698_vm1, %v3123_v19  ;;  %vm707_vm3 = vcmask 24576   ;;  %s3124_s29 = smov 4   ;;  %s3125_s30 = smov 8   ;;  %vm2461_vm4 = vcmask 1043456  }
   0xf   : > { %2975 = vmatpush3.msra.mxu0 %v336_v0  ;;  %s4784_s22 = smov (!%p257_p3, %s2821_s22), 1  ;;  %704 = vst.msk [vmem:[#allocation2 + $0x198] sm:$0xff] %vm698_vm1, %v3123_v19  ;;  %705 = vst.msk [vmem:[#allocation2 + $0x1a0] sm:$0xff] %vm698_vm1, %v3123_v19  ;;  %v3299_v36 = vld [vmem:[%s4692_s3] ss:$0 sm:$0xff]  ;;  %s3126_s12 = smov 12  }
  0x10   : > { %s3178_s25 = sshll.u32 %s4784_s22, 8  ;;  %702 = vst.msk [vmem:[#allocation2 + $0x10] sm:$0x3] %vm701_vm2, %v3123_v19  ;;  %706 = vst.msk [vmem:[#allocation2 + $0x1a8] sm:$0x3] %vm701_vm2, %v3123_v19  ;;  %s3127_s13 = smov 16  }
  0x11   : > { %s3184_s28 = scalar_lea.vmem %s4690_s1, %s3178_s25  ;;  %726 = vst.msk [vmem:[#allocation2 + $0x11] sm:$0x1] %vm707_vm3, %v3123_v19  ;;  %708 = vst.msk [vmem:[#allocation2] sm:$0x1] %vm707_vm3, %v3123_v19  ;;  %s3294_s9 = scalar_lea.vmem %s4689_s0, %s3178_s25  ;;  %vm2154_vm5 = vcmask 97280   ;;  %vm2187_vm6 = vcmask 130048  }
  0x12   : > { %v304_v1 = vld [vmem:[%s3184_s28] sm:$0xff]  ;;  %v305_v2 = vld [vmem:[%s3184_s28 + $0x8] sm:$0xff]  ;;  %v306_v3 = vld [vmem:[%s3184_s28 + $0x10] sm:$0xff]  ;;  %709 = vst.msk [vmem:[#allocation2 + $0x18] sm:$0x1] %vm707_vm3, %v3123_v19  ;;  %s3128_s14 = smov 20   ;;  %s4203_s17 = scalar_lea.vmem %s4695_s6, %s3178_s25 }
  0x13   : > { %2976 = vmatprep.mubr.msk.f32.mxu0 %vm344_vm0, %v304_v1  ;;  %v307_v4 = vld [vmem:[%s3184_s28 + $0x18] sm:$0xff]  ;;  %v308_v5 = vld [vmem:[%s3184_s28 + $0x20] sm:$0xff]  ;;  %v309_v6 = vld [vmem:[%s3184_s28 + $0x28] sm:$0xff]  ;;  %710 = vst.msk [vmem:[#allocation2 + $0x30] sm:$0x1] %vm707_vm3, %v3123_v19  ;;  %s3129_s15 = smov 28  }
  0x14   : > { %2977 = vmatmul.mubr.msk.f32.vlgmr.msra.gmra.mrb[0].mxu0 %vm344_vm0, %v305_v2  ;;  %v310_v7 = vld [vmem:[%s3184_s28 + $0x30] sm:$0xff]  ;;  %v311_v8 = vld [vmem:[%s3184_s28 + $0x38] sm:$0xff]  ;;  %v312_v9 = vld [vmem:[%s3184_s28 + $0x40] sm:$0xff]  ;;  %711 = vst.msk [vmem:[#allocation2 + $0x48] sm:$0x1] %vm707_vm3, %v3123_v19  ;;  %s3130_s16 = smov 32  }
  0x15   : > { %2979 = vmatprep.mubr.msk.f32.mxu0 %vm344_vm0, %v306_v3  ;;  %v313_v10 = vld [vmem:[%s3184_s28 + $0x48] sm:$0xff]  ;;  %v314_v11 = vld [vmem:[%s3184_s28 + $0x50] sm:$0xff]  ;;  %v315_v12 = vld [vmem:[%s3184_s28 + $0x58] sm:$0xff]  ;;  %712 = vst.msk [vmem:[#allocation2 + $0x60] sm:$0x1] %vm707_vm3, %v3123_v19  ;;  %s3131_s8 = smov 24  }
  0x16   : > { %v316_v13 = vld [vmem:[%s3184_s28 + $0x60] sm:$0xff]  ;;  %v317_v14 = vld [vmem:[%s3184_s28 + $0x68] sm:$0xff]  ;;  %v318_v15 = vld [vmem:[%s3184_s28 + $0x70] sm:$0xff]  ;;  %713 = vst.msk [vmem:[#allocation2 + $0x78] sm:$0x1] %vm707_vm3, %v3123_v19  ;;  %vm2253_vm7 = vcmask 195584  }
  0x17   : > { %v319_v16 = vld [vmem:[%s3184_s28 + $0x78] sm:$0xff]  ;;  %v320_v17 = vld [vmem:[%s3184_s28 + $0x80] sm:$0xff]  ;;  %v321_v18 = vld [vmem:[%s3184_s28 + $0x88] sm:$0xff]  ;;  %714 = vst.msk [vmem:[#allocation2 + $0x90] sm:$0x1] %vm707_vm3, %v3123_v19  ;;  %vm2220_vm8 = vcmask 162816  }
  0x18   : > { %2980 = vmatmul.mubr.msk.f32.gmra.mrb[2].mxu0 %vm344_vm0, %v307_v4  ;;  %v809_v20 = vld [vmem:[#allocation2 + $0x1] sm:$0xff]  ;;  %715 = vst.msk [vmem:[#allocation2 + $0xa8] sm:$0x1] %vm707_vm3, %v3123_v19  ;;  %716 = vst.msk [vmem:[#allocation2 + $0xc0] sm:$0x1] %vm707_vm3, %v3123_v19  ;;  %v810_v21 = vld [vmem:[#allocation2 + $0x9] sm:$0xff] }
  0x19   : > { %2982 = vmatprep.mubr.msk.f32.mxu0 %vm344_vm0, %v308_v5  ;;  %717 = vst.msk [vmem:[#allocation2 + $0xd8] sm:$0x1] %vm707_vm3, %v3123_v19  ;;  %718 = vst.msk [vmem:[#allocation2 + $0xf0] sm:$0x1] %vm707_vm3, %v3123_v19  ;;  %1098 = vrot.lane.b32.xlu0 %v809_v20, %s3124_s29  ;;  %v322_v22 = vld [vmem:[%s3184_s28 + $0x90] sm:$0xff]  ;;  %v323_v24 = vld [vmem:[%s3184_s28 + $0x98] sm:$0xff] }
  0x1a   : > { %719 = vst.msk [vmem:[#allocation2 + $0x108] sm:$0x1] %vm707_vm3, %v3123_v19  ;;  %720 = vst.msk [vmem:[#allocation2 + $0x120] sm:$0x1] %vm707_vm3, %v3123_v19  ;;  %v842_v23 = vld [vmem:[#allocation2 + $0xa] sm:$0xff]  ;;  %v841_v25 = vld [vmem:[#allocation2 + $0x2] sm:$0xff] }
  0x1b   : > { %721 = vst.msk [vmem:[#allocation2 + $0x138] sm:$0x1] %vm707_vm3, %v3123_v19  ;;  %722 = vst.msk [vmem:[#allocation2 + $0x150] sm:$0x1] %vm707_vm3, %v3123_v19  ;;  %1228 = vrot.lane.b32.xlu1 %v842_v23, %s3125_s30  ;;  %v324_v26 = vld [vmem:[%s3184_s28 + $0xa0] sm:$0xff]  ;;  %v325_v27 = vld [vmem:[%s3184_s28 + $0xa8] sm:$0xff] }
  0x1c   : > { %2983 = vmatmul.mubr.msk.f32.gmra.mrb[4].mxu0 %vm344_vm0, %v309_v6  ;;  %723 = vst.msk [vmem:[#allocation2 + $0x168] sm:$0x1] %vm707_vm3, %v3123_v19  ;;  %724 = vst.msk [vmem:[#allocation2 + $0x180] sm:$0x1] %vm707_vm3, %v3123_v19  ;;  %v326_v28 = vld [vmem:[%s3184_s28 + $0xb0] sm:$0xff]  ;;  %v327_v29 = vld [vmem:[%s3184_s28 + $0xb8] sm:$0xff] }
  0x1d   : > { %2985 = vmatprep.mubr.msk.f32.mxu0 %vm344_vm0, %v310_v7  ;;  %725 = vst.msk [vmem:[#allocation2 + $0x198] sm:$0x1] %vm707_vm3, %v3123_v19  ;;  %727 = vst.msk [vmem:[#allocation2 + $0x29] sm:$0x1] %vm707_vm3, %v3123_v19  ;;  %1100 = vrot.lane.b32.xlu0 %v810_v21, %s3124_s29  ;;  %v328_v30 = vld [vmem:[%s3184_s28 + $0xc0] sm:$0xff]  ;;  %v329_v31 = vld [vmem:[%s3184_s28 + $0xc8] sm:$0xff] }
  0x1e   : > { %728 = vst.msk [vmem:[#allocation2 + $0x41] sm:$0x1] %vm707_vm3, %v3123_v19  ;;  %729 = vst.msk [vmem:[#allocation2 + $0x59] sm:$0x1] %vm707_vm3, %v3123_v19  ;;  %v330_v32 = vld [vmem:[%s3184_s28 + $0xd0] sm:$0xff]  ;;  %v331_v33 = vld [vmem:[%s3184_s28 + $0xd8] sm:$0xff] }
  0x1f   : > { %730 = vst.msk [vmem:[#allocation2 + $0x71] sm:$0x1] %vm707_vm3, %v3123_v19  ;;  %731 = vst.msk [vmem:[#allocation2 + $0x89] sm:$0x1] %vm707_vm3, %v3123_v19  ;;  %v332_v34 = vld [vmem:[%s3184_s28 + $0xe0] sm:$0xff]  ;;  %v333_v35 = vld [vmem:[%s3184_s28 + $0xe8] sm:$0xff] }
  0x20   : > { %2986 = vmatmul.mubr.msk.f32.gmra.mrb[6].mxu0 %vm344_vm0, %v311_v8  ;;  %732 = vst.msk [vmem:[#allocation2 + $0xa1] sm:$0x1] %vm707_vm3, %v3123_v19  ;;  %733 = vst.msk [vmem:[#allocation2 + $0xb9] sm:$0x1] %vm707_vm3, %v3123_v19  ;;  %v273_v37 = vld [vmem:[%s3294_s9 + $0x8] sm:$0xff]  ;;  %v272_v40 = vld [vmem:[%s3294_s9] sm:$0xff] }
  0x21   : > { %2988 = vmatprep.mubr.msk.f32.mxu0 %vm344_vm0, %v312_v9  ;;  %734 = vst.msk [vmem:[#allocation2 + $0xd1] sm:$0x1] %vm707_vm3, %v3123_v19  ;;  %735 = vst.msk [vmem:[#allocation2 + $0xe9] sm:$0x1] %vm707_vm3, %v3123_v19  ;;  %1226 = vrot.lane.b32.xlu0 %v841_v25, %s3125_s30  ;;  %v275_v45 = vld [vmem:[%s3294_s9 + $0x18] sm:$0xff]  ;;  %v274_v48 = vld [vmem:[%s3294_s9 + $0x10] sm:$0xff] }
  0x22   : > { %736 = vst.msk [vmem:[#allocation2 + $0x101] sm:$0x1] %vm707_vm3, %v3123_v19  ;;  %737 = vst.msk [vmem:[#allocation2 + $0x119] sm:$0x1] %vm707_vm3, %v3123_v19  ;;  %v277_v53 = vld [vmem:[%s3294_s9 + $0x28] sm:$0xff]  ;;  %v276_v56 = vld [vmem:[%s3294_s9 + $0x20] sm:$0xff] }
  0x23   : > { %738 = vst.msk [vmem:[#allocation2 + $0x131] sm:$0x1] %vm707_vm3, %v3123_v19  ;;  %739 = vst.msk [vmem:[#allocation2 + $0x149] sm:$0x1] %vm707_vm3, %v3123_v19  ;;  %v279_v62 = vld [vmem:[%s3294_s9 + $0x38] sm:$0xff]  ;;  %v278_v2 = vld [vmem:[%s3294_s9 + $0x30] sm:$0xff] }
  0x24   : > { %2989 = vmatmul.mubr.msk.f32.gmra.mrb[8].mxu0 %vm344_vm0, %v313_v10  ;;  %740 = vst.msk [vmem:[#allocation2 + $0x161] sm:$0x1] %vm707_vm3, %v3123_v19  ;;  %741 = vst.msk [vmem:[#allocation2 + $0x179] sm:$0x1] %vm707_vm3, %v3123_v19  ;;  %v281_v8 = vld [vmem:[%s3294_s9 + $0x48] sm:$0xff]  ;;  %vm2286_vm9 = vcmask 228352  }
  0x25   : > { %2991 = vmatprep.mubr.msk.f32.mxu0 %vm344_vm0, %v314_v11  ;;  %742 = vst.msk [vmem:[#allocation2 + $0x191] sm:$0x1] %vm707_vm3, %v3123_v19  ;;  %743 = vst.msk [vmem:[#allocation2 + $0x1a9] sm:$0x1] %vm707_vm3, %v3123_v19  ;;  %v283_v19 = vld [vmem:[%s3294_s9 + $0x58] sm:$0xff]  ;;  %vm2319_vm10 = vcmask 261120  }
  0x26   : > { %vm2364_vm11 = vcmask 293888  }
  0x28   : > { %2992 = vmatmul.mubr.msk.f32.gmra.mrb[10].mxu0 %vm344_vm0, %v315_v12  ;;  %v280_v12 = vld [vmem:[%s3294_s9 + $0x40] sm:$0xff] }
  0x29   : > { %2994 = vmatprep.mubr.msk.f32.mxu0 %vm344_vm0, %v316_v13 }
  0x2c   : > { %2995 = vmatmul.mubr.msk.f32.gmra.mrb[12].mxu0 %vm344_vm0, %v317_v14 }
  0x2d   : > { %2997 = vmatprep.mubr.msk.f32.mxu0 %vm344_vm0, %v318_v15 }
  0x30   : > { %2998 = vmatmul.mubr.msk.f32.gmra.mrb[14].mxu0 %vm344_vm0, %v319_v16 }
  0x31   : > { %3000 = vmatprep.mubr.msk.f32.mxu0 %vm344_vm0, %v320_v17 }
  0x34   : > { %3001 = vmatmul.mubr.msk.f32.gmra.mrb[16].mxu0 %vm344_vm0, %v321_v18 }
  0x35   : > { %3003 = vmatprep.mubr.msk.f32.mxu0 %vm344_vm0, %v322_v22  ;;  %v282_v22 = vld [vmem:[%s3294_s9 + $0x50] sm:$0xff] }
  0x38   : > { %3004 = vmatmul.mubr.msk.f32.gmra.mrb[18].mxu0 %vm344_vm0, %v323_v24 }
  0x39   : > { %3006 = vmatprep.mubr.msk.f32.mxu0 %vm344_vm0, %v324_v26 }
  0x3c   : > { %3007 = vmatmul.mubr.msk.f32.gmra.mrb[20].mxu0 %vm344_vm0, %v325_v27 }
  0x3d   : > { %3009 = vmatprep.mubr.msk.f32.mxu0 %vm344_vm0, %v326_v28 }
  0x40   : > { %3010 = vmatmul.mubr.msk.f32.gmra.mrb[22].mxu0 %vm344_vm0, %v327_v29 }
  0x41   : > { %3012 = vmatprep.mubr.msk.f32.mxu0 %vm344_vm0, %v328_v30  ;;  %v285_v30 = vld [vmem:[%s3294_s9 + $0x68] sm:$0xff] }
  0x44   : > { %3013 = vmatmul.mubr.msk.f32.gmra.mrb[24].mxu0 %vm344_vm0, %v329_v31 }
  0x45   : > { %3015 = vmatprep.mubr.msk.f32.mxu0 %vm344_vm0, %v330_v32 }
  0x48   : > { %3016 = vmatmul.mubr.msk.f32.gmra.mrb[26].mxu0 %vm344_vm0, %v331_v33 }
  0x49   : > { %3018 = vmatprep.mubr.msk.f32.mxu0 %vm344_vm0, %v332_v34 }
  0x4c   : > { %3019 = vmatmul.mubr.msk.f32.gmra.mrb[28].mxu0 %vm344_vm0, %v333_v35 }
  0xe7   : > { %v2978_v38 = vpop.f32.mrb[0].mxu0 }
  0xe8   : > { %v513_v39 = vadd.f32 %v2978_v38, %v3299_v36  ;;  %v507_v41 = vpop.f32.mrb[1].mxu0 }
  0xe9   : > { %v508_v42 = vadd.f32 %v3299_v36, %v507_v41 }
  0xea   : > { %v667_v43 = vadd.f32 %v513_v39, %v273_v37  ;;  %v284_v37 = vld [vmem:[%s3294_s9 + $0x60] sm:$0xff] }
  0xeb   : > { %v666_v44 = vadd.f32 %v508_v42, %v272_v40  ;;  %v2981_v46 = vpop.f32.mrb[2].mxu0 }
  0xec   : > { %746 = vst.msk [vmem:[#allocation2 + $0x21] sm:$0xff] %vm698_vm1, %v667_v43  ;;  %v523_v47 = vadd.f32 %v2981_v46, %v3299_v36  ;;  %v517_v49 = vpop.f32.mrb[3].mxu0 }
  0xed   : > { %745 = vst.msk [vmem:[#allocation2 + $0x19] sm:$0xff] %vm698_vm1, %v666_v44  ;;  %v518_v50 = vadd.f32 %v3299_v36, %v517_v49  ;;  %v2352_v44 = vld [vmem:[%s4693_s4] sm:$0xff]  ;;  %v2355_v49 = vld [vmem:[%s4693_s4 + $0x18] sm:$0xff] }
  0xee   : > { %v669_v51 = vadd.f32 %v523_v47, %v275_v45  ;;  %v2353_v45 = vld [vmem:[%s4693_s4 + $0x8] sm:$0xff] }
  0xef   : > { %v668_v52 = vadd.f32 %v518_v50, %v274_v48  ;;  %v2984_v54 = vpop.f32.mrb[4].mxu0  ;;  %v3082_v46 = vpack.c.bf16 %v2353_v45, %v2352_v44  ;;  %v2354_v48 = vld [vmem:[%s4693_s4 + $0x10] sm:$0xff] }
  0xf0   : > { %748 = vst.msk [vmem:[#allocation2 + $0x39] sm:$0xff] %vm698_vm1, %v669_v51  ;;  %v533_v55 = vadd.f32 %v2984_v54, %v3299_v36  ;;  %v527_v57 = vpop.f32.mrb[5].mxu0  ;;  %v3086_v50 = vpack.c.bf16 %v2355_v49, %v2354_v48  ;;  %v2356_v54 = vld [vmem:[%s4693_s4 + $0x20] sm:$0xf]  ;;  %v294_v44 = vld [vmem:[%s3294_s9 + $0xb0] sm:$0xff]  ;;  %v3481_v49 = vpop.permute.xlu1 %1228 }
  0xf1   : > { %747 = vst.msk [vmem:[#allocation2 + $0x31] sm:$0xff] %vm698_vm1, %v668_v52  ;;  %v528_v58 = vadd.f32 %v3299_v36, %v527_v57  ;;  %3090 = vmatprep.subr.bf16.mxu1 %v3082_v46  ;;  %3083 = vmatprep.subr.bf16.mxu0 %v3082_v46  ;;  %v287_v52 = vld [vmem:[%s3294_s9 + $0x78] sm:$0xff]  ;;  %v286_v57 = vld [vmem:[%s3294_s9 + $0x70] sm:$0xff]  ;;  %4713 = vst [vmem:[#allocation5_spill] sm:$0xff] %v3481_v49 }
  0xf2   : > { %v671_v59 = vadd.f32 %v533_v55, %v277_v53  ;;  %3093 = vmatpush3.bf16.msra.mxu1 %v3082_v46  ;;  %3085 = vmatpush3.bf16.msra.mxu0 %v3082_v46 }
  0xf3   : > { %v812_v60 = vld [vmem:[#allocation2 + $0x21] sm:$0xff]  ;;  %v670_v61 = vadd.f32 %v528_v58, %v276_v56  ;;  %v2987_v63 = vpop.f32.mrb[6].mxu0  ;;  %3091 = vmatprep.subr.bf16.mxu1 %v3086_v50  ;;  %3087 = vmatprep.subr.bf16.mxu0 %v3086_v50 }
  0xf4   : > { %1104 = vrot.lane.b32.xlu1 %v812_v60, %s3124_s29  ;;  %v843_v0 = vld [vmem:[#allocation2 + $0x1a] sm:$0xff]  ;;  %750 = vst.msk [vmem:[#allocation2 + $0x51] sm:$0xff] %vm698_vm1, %v671_v59  ;;  %v543_v1 = vadd.f32 %v2987_v63, %v3299_v36  ;;  %v537_v3 = vpop.f32.mrb[7].mxu0  ;;  %v844_v6 = vld [vmem:[#allocation2 + $0x22] sm:$0xff] }
  0xf5   : > { %1230 = vrot.lane.b32.xlu0 %v843_v0, %s3125_s30  ;;  %749 = vst.msk [vmem:[#allocation2 + $0x49] sm:$0xff] %vm698_vm1, %v670_v61  ;;  %v538_v4 = vadd.f32 %v3299_v36, %v537_v3  ;;  %v3327_v10 = vld [vmem:[#allocation2 + $0x18] sm:$0xff]  ;;  %v3344_v27 = vld [vmem:[#allocation2 + $0x20] sm:$0xff] }
  0xf6   : > { %v673_v5 = vadd.f32 %v543_v1, %v279_v62  ;;  %v811_v17 = vld [vmem:[#allocation2 + $0x19] sm:$0xff]  ;;  %3094 = vmatpush3.bf16.msra.mxu1 %v3086_v50  ;;  %3089 = vmatpush3.bf16.msra.mxu0 %v3086_v50  ;;  %v289_v1 = vld [vmem:[%s3294_s9 + $0x88] sm:$0xff] }
  0xf7   : > { %v672_v7 = vadd.f32 %v538_v4, %v278_v2  ;;  %v2990_v9 = vpop.f32.mrb[8].mxu0  ;;  %v814_v29 = vld [vmem:[#allocation2 + $0x39] sm:$0xff]  ;;  %3092 = vmatprep.subr.msk.mxu1 %vm2461_vm4, %v2356_v54  ;;  %3032 = vmatprep.subr.msk.mxu0 %vm2461_vm4, %v2356_v54 }
  0xf8   : > { %1232 = vrot.lane.b32.xlu1 %v844_v6, %s3125_s30  ;;  %752 = vst.msk [vmem:[#allocation2 + $0x69] sm:$0xff] %vm698_vm1, %v673_v5  ;;  %v553_v11 = vadd.f32 %v2990_v9, %v3299_v36  ;;  %v547_v13 = vpop.f32.mrb[9].mxu0  ;;  %v813_v15 = vld [vmem:[#allocation2 + $0x31] sm:$0xff]  ;;  %v846_v35 = vld [vmem:[#allocation2 + $0x3a] sm:$0xff] }
  0xf9   : > { %1354 = vrot.lane.b32.xlu0 %v3327_v10, %s3126_s12  ;;  %751 = vst.msk [vmem:[#allocation2 + $0x61] sm:$0xff] %vm698_vm1, %v672_v7  ;;  %v548_v14 = vadd.f32 %v3299_v36, %v547_v13  ;;  %v845_v25 = vld [vmem:[#allocation2 + $0x32] sm:$0xff]  ;;  %v288_v4 = vld [vmem:[%s3294_s9 + $0x80] sm:$0xff] }
  0xfa   : > { %v675_v16 = vadd.f32 %v553_v11, %v281_v8  ;;  %v3353_v32 = vld [vmem:[#allocation2 + $0x30] sm:$0xff]  ;;  %v3368_v42 = vld [vmem:[#allocation2 + $0x38] sm:$0xff]  ;;  %3095 = vmatpush3.msk.msra.mxu1 %vm2461_vm4, %v2356_v54  ;;  %3033 = vmatpush3.msk.msra.mxu0 %vm2461_vm4, %v2356_v54 }
  0xfb   : > { %v674_v18 = vadd.f32 %v548_v14, %v280_v12  ;;  %v2993_v20 = vpop.f32.mrb[10].mxu0  ;;  %v1005_v40 = vld [vmem:[#allocation2 + $0x51] sm:$0xff] }
  0xfc   : > { %1102 = vrot.lane.b32.xlu1 %v811_v17, %s3124_s29  ;;  %754 = vst.msk [vmem:[#allocation2 + $0x81] sm:$0xff] %vm698_vm1, %v675_v16  ;;  %v563_v21 = vadd.f32 %v2993_v20, %v3299_v36  ;;  %v557_v23 = vpop.f32.mrb[11].mxu0  ;;  %v1037_v43 = vld [vmem:[#allocation2 + $0x52] sm:$0xff]  ;;  %v815_v47 = vld [vmem:[#allocation2 + $0x49] sm:$0xff] }
  0xfd   : > { %1106 = vrot.lane.b32.xlu0 %v813_v15, %s3124_s29  ;;  %753 = vst.msk [vmem:[#allocation2 + $0x79] sm:$0xff] %vm698_vm1, %v674_v18  ;;  %v558_v24 = vadd.f32 %v3299_v36, %v557_v23  ;;  %v847_v51 = vld [vmem:[#allocation2 + $0x4a] sm:$0xff]  ;;  %v291_v13 = vld [vmem:[%s3294_s9 + $0x98] sm:$0xff] }
  0xfe   : > { %v677_v26 = vadd.f32 %v563_v21, %v283_v19  ;;  %v3395_v55 = vld [vmem:[#allocation2 + $0x50] sm:$0xff]  ;;  %v3402_v59 = vld [vmem:[#allocation2 + $0x48] sm:$0xff] }
  0xff   : > { %v676_v28 = vadd.f32 %v558_v24, %v282_v22  ;;  %v2996_v31 = vpop.f32.mrb[12].mxu0  ;;  %v1007_v63 = vld [vmem:[#allocation2 + $0x69] sm:$0xff] }
 0x100   : > { %1356 = vrot.lane.b32.xlu1 %v3344_v27, %s3126_s12  ;;  %756 = vst.msk [vmem:[#allocation2 + $0x99] sm:$0xff] %vm698_vm1, %v677_v26  ;;  %v573_v33 = vadd.f32 %v2996_v31, %v3299_v36  ;;  %v567_v38 = vpop.f32.mrb[13].mxu0  ;;  %v1039_v0 = vld [vmem:[#allocation2 + $0x6a] sm:$0xff]  ;;  %v817_v8 = vld [vmem:[#allocation2 + $0x61] sm:$0xff] }
 0x101   : > { %1234 = vrot.lane.b32.xlu0 %v845_v25, %s3125_s30  ;;  %755 = vst.msk [vmem:[#allocation2 + $0x91] sm:$0xff] %vm698_vm1, %v676_v28  ;;  %v568_v39 = vadd.f32 %v3299_v36, %v567_v38  ;;  %v849_v11 = vld [vmem:[#allocation2 + $0x62] sm:$0xff]  ;;  %v290_v17 = vld [vmem:[%s3294_s9 + $0x90] sm:$0xff] }
 0x102   : > { %v679_v34 = vadd.f32 %v573_v33, %v285_v30  ;;  %v3434_v12 = vld [vmem:[#allocation2 + $0x68] sm:$0xff]  ;;  %v292_v28 = vld [vmem:[%s3294_s9 + $0xa0] sm:$0xff]  ;;  %v335_v30 = vld [vmem:[%s3184_s28 + $0xf8] sm:$0xff] }
 0x103   : > { %v678_v41 = vadd.f32 %v568_v39, %v284_v37  ;;  %v2999_v53 = vpop.f32.mrb[14].mxu0  ;;  %v1009_v22 = vld [vmem:[#allocation2 + $0x81] sm:$0xff] }
 0x104   : > { %1108 = vrot.lane.b32.xlu1 %v814_v29, %s3124_s29  ;;  %758 = vst.msk [vmem:[#allocation2 + $0xb1] sm:$0xff] %vm698_vm1, %v679_v34  ;;  %v583_v56 = vadd.f32 %v2999_v53, %v3299_v36  ;;  %v577_v58 = vpop.f32.mrb[15].mxu0  ;;  %v293_v23 = vld [vmem:[%s3294_s9 + $0xa8] sm:$0xff]  ;;  %v819_v39 = vld [vmem:[#allocation2 + $0x79] sm:$0xff] }
 0x105   : > { %1358 = vrot.lane.b32.xlu0 %v3353_v32, %s3126_s12  ;;  %757 = vst.msk [vmem:[#allocation2 + $0xa9] sm:$0xff] %vm698_vm1, %v678_v41  ;;  %v578_v60 = vadd.f32 %v3299_v36, %v577_v58  ;;  %v1041_v37 = vld [vmem:[#allocation2 + $0x82] sm:$0xff]  ;;  %v851_v48 = vld [vmem:[#allocation2 + $0x7a] sm:$0xff] }
 0x106   : > { %v681_v61 = vadd.f32 %v583_v56, %v287_v52  ;;  %v3488_v52 = vld [vmem:[#allocation2 + $0x80] sm:$0xff]  ;;  %v3492_v53 = vld [vmem:[#allocation2 + $0x78] sm:$0xff] }
 0x107   : > { %v680_v62 = vadd.f32 %v578_v60, %v286_v57  ;;  %v3002_v2 = vpop.f32.mrb[16].mxu0  ;;  %v297_v57 = vld [vmem:[%s3294_s9 + $0xc8] sm:$0xff] }
 0x108   : > { %1236 = vrot.lane.b32.xlu1 %v846_v35, %s3125_s30  ;;  %760 = vst.msk [vmem:[#allocation2 + $0xc9] sm:$0xff] %vm698_vm1, %v681_v61  ;;  %v593_v3 = vadd.f32 %v3002_v2, %v3299_v36  ;;  %v587_v5 = vpop.f32.mrb[17].mxu0  ;;  %v296_v61 = vld [vmem:[%s3294_s9 + $0xc0] sm:$0xff] }
 0x109   : > { %1486 = vrot.lane.b32.xlu0 %v813_v15, %s3127_s13  ;;  %759 = vst.msk [vmem:[#allocation2 + $0xc1] sm:$0xff] %vm698_vm1, %v680_v62  ;;  %v588_v6 = vadd.f32 %v3299_v36, %v587_v5  ;;  %v3439_v15 = vld [vmem:[#allocation2 + $0x60] sm:$0xff] }
 0x10a   : > { %v683_v7 = vadd.f32 %v593_v3, %v289_v1  ;;  %v1011_v5 = vld [vmem:[#allocation2 + $0x99] sm:$0xff] }
 0x10b   : > { %v682_v9 = vadd.f32 %v588_v6, %v288_v4  ;;  %v3005_v14 = vpop.f32.mrb[18].mxu0 }
 0x10c   : > { %1488 = vrot.lane.b32.xlu1 %v814_v29, %s3127_s13  ;;  %762 = vst.msk [vmem:[#allocation2 + $0xe1] sm:$0xff] %vm698_vm1, %v683_v7  ;;  %v603_v16 = vadd.f32 %v3005_v14, %v3299_v36  ;;  %v597_v18 = vpop.f32.mrb[19].mxu0  ;;  %v299_v7 = vld [vmem:[%s3294_s9 + $0xd8] sm:$0xff] }
 0x10d   : > { %1614 = vrot.lane.b32.xlu0 %v845_v25, %s3128_s14  ;;  %761 = vst.msk [vmem:[#allocation2 + $0xd9] sm:$0xff] %vm698_vm1, %v682_v9  ;;  %v598_v19 = vadd.f32 %v3299_v36, %v597_v18  ;;  %v334_v25 = vld [vmem:[%s3184_s28 + $0xf0] sm:$0xff] }
 0x10e   : > { %v685_v20 = vadd.f32 %v603_v16, %v291_v13  ;;  %3021 = vmatprep.mubr.msk.f32.mxu0 %vm344_vm0, %v334_v25 }
 0x10f   : > { %v684_v21 = vadd.f32 %v598_v19, %v290_v17  ;;  %v3008_v24 = vpop.f32.mrb[20].mxu0  ;;  %3022 = vmatmul.mubr.msk.f32.gmra.mrb[30].mxu0 %vm344_vm0, %v335_v30 }
 0x110   : > { %1616 = vrot.lane.b32.xlu1 %v846_v35, %s3128_s14  ;;  %764 = vst.msk [vmem:[#allocation2 + $0xf9] sm:$0xff] %vm698_vm1, %v685_v20  ;;  %v613_v26 = vadd.f32 %v3008_v24, %v3299_v36  ;;  %v607_v29 = vpop.f32.mrb[21].mxu0  ;;  %v3467_v35 = vpop.permute.xlu0 %1098 }
 0x111   : > { %1872 = vrot.lane.b32.xlu0 %v1005_v40, %s3129_s15  ;;  %763 = vst.msk [vmem:[#allocation2 + $0xf1] sm:$0xff] %vm698_vm1, %v684_v21  ;;  %v608_v31 = vadd.f32 %v3299_v36, %v607_v29  ;;  %4711 = vst [vmem:[#allocation3_spill] sm:$0xff] %v3467_v35  ;;  %v1043_v21 = vld [vmem:[#allocation2 + $0x9a] sm:$0xff] }
 0x112   : > { %v687_v33 = vadd.f32 %v613_v26, %v293_v23  ;;  %v301_v23 = vld [vmem:[%s3294_s9 + $0xe8] sm:$0xff]  ;;  %v300_v26 = vld [vmem:[%s3294_s9 + $0xe0] sm:$0xff] }
 0x113   : > { %v686_v34 = vadd.f32 %v608_v31, %v292_v28  ;;  %v3011_v41 = vpop.f32.mrb[22].mxu0 }
 0x114   : > { %1360 = vrot.lane.b32.xlu1 %v3368_v42, %s3126_s12  ;;  %766 = vst.msk [vmem:[#allocation2 + $0x111] sm:$0xff] %vm698_vm1, %v687_v33  ;;  %v3472_v38 = vpop.permute.xlu0 %1100  ;;  %v617_v45 = vpop.f32.mrb[23].mxu0 }
 0x115   : > { %1492 = vrot.lane.b32.xlu0 %v1005_v40, %s3127_s13  ;;  %765 = vst.msk [vmem:[#allocation2 + $0x109] sm:$0xff] %vm698_vm1, %v686_v34  ;;  %4712 = vst [vmem:[#allocation4_spill] sm:$0xff] %v3472_v38  ;;  %v618_v46 = vadd.f32 %v3299_v36, %v617_v45  ;;  %v821_v34 = vld [vmem:[#allocation2 + $0x91] sm:$0xff] }
 0x116   : > { %v3556_v45 = vld [vmem:[#allocation2 + $0x90] sm:$0xff] }
 0x117   : > { %v688_v50 = vadd.f32 %v618_v46, %v294_v44  ;;  %v3014_v58 = vpop.f32.mrb[24].mxu0  ;;  %v3552_v44 = vld [vmem:[#allocation2 + $0x98] sm:$0xff]  ;;  %4717 = vst [vmem:[#allocation9_spill] sm:$0xff] %v3556_v45 }
 0x118   : > { %1112 = vrot.lane.b32.xlu1 %v1005_v40, %s3124_s29  ;;  %v295_v40 = vld [vmem:[%s3294_s9 + $0xb8] sm:$0xff]  ;;  %v633_v60 = vadd.f32 %v3014_v58, %v3299_v36  ;;  %v627_v62 = vpop.f32.mrb[25].mxu0 }
 0x119   : > { %2000 = vrot.lane.b32.xlu0 %v1037_v43, %s3130_s16  ;;  %767 = vst.msk [vmem:[#allocation2 + $0x121] sm:$0xff] %vm698_vm1, %v688_v50  ;;  %v1013_v58 = vld [vmem:[#allocation2 + $0xb1] sm:$0xff] }
 0x11a   : > { %v691_v1 = vadd.f32 %v633_v60, %v297_v57 }
 0x11c   : > { %1240 = vrot.lane.b32.xlu1 %v1037_v43, %s3125_s30  ;;  %770 = vst.msk [vmem:[#allocation2 + $0x141] sm:$0xff] %vm698_vm1, %v691_v1 }
 0x11d   : > { %1110 = vrot.lane.b32.xlu0 %v815_v47, %s3124_s29 }
 0x120   : > { %1620 = vrot.lane.b32.xlu1 %v1037_v43, %s3128_s14  ;;  %v623_v43 = vadd.f32 %v3011_v41, %v3299_v36  ;;  %v853_v41 = vld [vmem:[#allocation2 + $0x92] sm:$0xff] }
 0x121   : > { %1238 = vrot.lane.b32.xlu0 %v847_v51, %s3125_s30 }
 0x124   : > { %1364 = vrot.lane.b32.xlu1 %v3395_v55, %s3126_s12 }
 0x125   : > { %1362 = vrot.lane.b32.xlu0 %v3402_v59, %s3126_s12 }
 0x128   : > { %1744 = vrot.lane.b32.xlu1 %v3395_v55, %s3131_s8 }
 0x129   : > { %1742 = vrot.lane.b32.xlu0 %v3402_v59, %s3131_s8 }
 0x12c   : > { %1490 = vrot.lane.b32.xlu1 %v815_v47, %s3127_s13 }
 0x12d   : > { %1870 = vrot.lane.b32.xlu0 %v815_v47, %s3129_s15  ;;  %v689_v47 = vadd.f32 %v623_v43, %v295_v40 }
 0x12f   : > { %768 = vst.msk [vmem:[#allocation2 + $0x129] sm:$0xff] %vm698_vm1, %v689_v47 }
 0x130   : > { %1998 = vrot.lane.b32.xlu1 %v847_v51, %s3130_s16 }
 0x131   : > { %1876 = vrot.lane.b32.xlu0 %v1007_v63, %s3129_s15 }
 0x134   : > { %1618 = vrot.lane.b32.xlu1 %v847_v51, %s3128_s14  ;;  %v3484_v51 = vpop.permute.xlu0 %1226 }
 0x135   : > { %1496 = vrot.lane.b32.xlu0 %v1007_v63, %s3127_s13  ;;  %4714 = vst [vmem:[#allocation6_spill] sm:$0xff] %v3484_v51 }
 0x138   : > { %1116 = vrot.lane.b32.xlu1 %v1007_v63, %s3124_s29  ;;  %v628_v63 = vadd.f32 %v3299_v36, %v627_v62 }
 0x139   : > { %2004 = vrot.lane.b32.xlu0 %v1039_v0, %s3130_s16 }
 0x13a   : > { %v690_v3 = vadd.f32 %v628_v63, %v296_v61 }
 0x13c   : > { %1244 = vrot.lane.b32.xlu1 %v1039_v0, %s3125_s30  ;;  %769 = vst.msk [vmem:[#allocation2 + $0x139] sm:$0xff] %vm698_vm1, %v690_v3 }
 0x13d   : > { %1114 = vrot.lane.b32.xlu0 %v817_v8, %s3124_s29 }
 0x140   : > { %1624 = vrot.lane.b32.xlu1 %v1039_v0, %s3128_s14 }
 0x141   : > { %1242 = vrot.lane.b32.xlu0 %v849_v11, %s3125_s30 }
 0x143   : > { %v3868_v51 = vld [vmem:[#allocation2 + $0x13a] sm:$0xff] }
 0x144   : > { %1368 = vrot.lane.b32.xlu1 %v3434_v12, %s3126_s12 }
 0x145   : > { %1366 = vrot.lane.b32.xlu0 %v3439_v15, %s3126_s12 }
 0x148   : > { %1748 = vrot.lane.b32.xlu1 %v3434_v12, %s3131_s8 }
 0x149   : > { %1746 = vrot.lane.b32.xlu0 %v3439_v15, %s3131_s8 }
 0x14c   : > { %1494 = vrot.lane.b32.xlu1 %v817_v8, %s3127_s13 }
 0x14d   : > { %1874 = vrot.lane.b32.xlu0 %v817_v8, %s3129_s15  ;;  %v3017_v8 = vpop.f32.mrb[26].mxu0 }
 0x14e   : > { %v643_v9 = vadd.f32 %v3017_v8, %v3299_v36  ;;  %v637_v13 = vpop.f32.mrb[27].mxu0 }
 0x14f   : > { %v638_v14 = vadd.f32 %v3299_v36, %v637_v13  ;;  %v3020_v24 = vpop.f32.mrb[28].mxu0 }
 0x150   : > { %2002 = vrot.lane.b32.xlu1 %v849_v11, %s3130_s16  ;;  %v693_v17 = vadd.f32 %v643_v9, %v299_v7  ;;  %v653_v25 = vadd.f32 %v3020_v24, %v3299_v36  ;;  %v647_v28 = vpop.f32.mrb[29].mxu0  ;;  %v855_v24 = vld [vmem:[#allocation2 + $0xaa] sm:$0xff] }
 0x151   : > { %1880 = vrot.lane.b32.xlu0 %v1009_v22, %s3129_s15  ;;  %v648_v30 = vadd.f32 %v3299_v36, %v647_v28 }
 0x152   : > { %772 = vst.msk [vmem:[#allocation2 + $0x159] sm:$0xff] %vm698_vm1, %v693_v17  ;;  %v695_v33 = vadd.f32 %v653_v25, %v301_v23 }
 0x154   : > { %1622 = vrot.lane.b32.xlu1 %v849_v11, %s3128_s14  ;;  %v298_v11 = vld [vmem:[%s3294_s9 + $0xd0] sm:$0xff]  ;;  %774 = vst.msk [vmem:[#allocation2 + $0x171] sm:$0xff] %vm698_vm1, %v695_v33  ;;  %v3619_v33 = vld [vmem:[#allocation2 + $0xa8] sm:$0xff] }
 0x155   : > { %1500 = vrot.lane.b32.xlu0 %v1009_v22, %s3127_s13  ;;  %v692_v19 = vadd.f32 %v638_v14, %v298_v11  ;;  %v823_v11 = vld [vmem:[#allocation2 + $0xa9] sm:$0xff]  ;;  %4719 = vst [vmem:[#allocation11_spill] sm:$0xff] %v3619_v33 }
 0x157   : > { %771 = vst.msk [vmem:[#allocation2 + $0x151] sm:$0xff] %vm698_vm1, %v692_v19 }
 0x158   : > { %1120 = vrot.lane.b32.xlu1 %v1009_v22, %s3124_s29 }
 0x159   : > { %2008 = vrot.lane.b32.xlu0 %v1041_v37, %s3130_s16 }
 0x15c   : > { %1248 = vrot.lane.b32.xlu1 %v1041_v37, %s3125_s30 }
 0x15d   : > { %1118 = vrot.lane.b32.xlu0 %v819_v39, %s3124_s29 }
 0x160   : > { %1628 = vrot.lane.b32.xlu1 %v1041_v37, %s3128_s14  ;;  %v694_v37 = vadd.f32 %v648_v30, %v300_v26  ;;  %v3613_v30 = vld [vmem:[#allocation2 + $0xb0] sm:$0xff] }
 0x161   : > { %1246 = vrot.lane.b32.xlu0 %v851_v48, %s3125_s30  ;;  %4718 = vst [vmem:[#allocation10_spill] sm:$0xff] %v3613_v30 }
 0x162   : > { %773 = vst.msk [vmem:[#allocation2 + $0x169] sm:$0xff] %vm698_vm1, %v694_v37 }
 0x164   : > { %1372 = vrot.lane.b32.xlu1 %v3488_v52, %s3126_s12 }
 0x165   : > { %1370 = vrot.lane.b32.xlu0 %v3492_v53, %s3126_s12 }
 0x166   : > { %v3496_v54 = vpop.permute.xlu1 %1104 }
 0x167   : > { %v3498_v56 = vpop.permute.xlu0 %1230  ;;  %v2093_v63 = vsel %vm698_vm1, %v3344_v27, %v3496_v54 }
 0x168   : > { %1752 = vrot.lane.b32.xlu1 %v3488_v52, %s3131_s8 }
 0x169   : > { %1750 = vrot.lane.b32.xlu0 %v3492_v53, %s3131_s8 }
 0x16a   : > { %v3508_v0 = vpop.permute.xlu1 %1232 }
 0x16b   : > { %v3510_v2 = vpop.permute.xlu0 %1354  ;;  %v2125_v1 = vsel %vm344_vm0, %v2093_v63, %v3508_v0 }
 0x16c   : > { %4715 = vst [vmem:[#allocation7_spill] sm:$0xff] %v3510_v2  ;;  %1498 = vrot.lane.b32.xlu1 %v819_v39, %s3127_s13 }
 0x16d   : > { %1878 = vrot.lane.b32.xlu0 %v819_v39, %s3129_s15 }
 0x16e   : > { %v3516_v4 = vpop.permute.xlu1 %1102 }
 0x16f   : > { %v3518_v6 = vpop.permute.xlu0 %1106  ;;  %v2092_v27 = vsel %vm698_vm1, %v3327_v10, %v3516_v4 }
 0x170   : > { %2006 = vrot.lane.b32.xlu1 %v851_v48, %s3130_s16  ;;  %v2124_v13 = vsel %vm344_vm0, %v2092_v27, %v3498_v56 }
 0x171   : > { %1884 = vrot.lane.b32.xlu0 %v1011_v5, %s3129_s15 }
 0x172   : > { %v3526_v16 = vpop.permute.xlu1 %1356 }
 0x173   : > { %4716 = vst [vmem:[#allocation8_spill] sm:$0xff] %v3526_v16  ;;  %v3528_v18 = vpop.permute.xlu0 %1234  ;;  %v3855_v16 = vld [vmem:[#allocation2 + $0x12a] sm:$0xff] }
 0x174   : > { %1626 = vrot.lane.b32.xlu1 %v851_v48, %s3128_s14 }
 0x175   : > { %1504 = vrot.lane.b32.xlu0 %v1011_v5, %s3127_s13 }
 0x176   : > { %v3534_v20 = vpop.permute.xlu1 %1108 }
 0x177   : > { %v3536_v22 = vpop.permute.xlu0 %1358 }
 0x178   : > { %1124 = vrot.lane.b32.xlu1 %v1011_v5, %s3124_s29  ;;  %v1045_v5 = vld [vmem:[#allocation2 + $0xb2] sm:$0xff]  ;;  %v2157_v17 = vsel %vm2154_vm5, %v2124_v13, %v3536_v22 }
 0x179   : > { %2012 = vrot.lane.b32.xlu0 %v1043_v21, %s3130_s16 }
 0x17a   : > { %v3543_v29 = vpop.permute.xlu1 %1236 }
 0x17b   : > { %v1487_v31 = vpop.permute.xlu0 %1486 }
 0x17c   : > { %1252 = vrot.lane.b32.xlu1 %v1043_v21, %s3125_s30  ;;  %v2190_v19 = vsel %vm2187_vm6, %v2157_v17, %v1487_v31 }
 0x17d   : > { %1122 = vrot.lane.b32.xlu0 %v821_v34, %s3124_s29 }
 0x17e   : > { %v1489_v39 = vpop.permute.xlu1 %1488 }
 0x17f   : > { %v1615_v40 = vpop.permute.xlu0 %1614 }
 0x180   : > { %1632 = vrot.lane.b32.xlu1 %v1043_v21, %s3128_s14  ;;  %v2223_v23 = vsel %vm2220_vm8, %v2190_v19, %v1615_v40  ;;  %v3690_v19 = vld [vmem:[#allocation2 + $0xc8] sm:$0xff] }
 0x181   : > { %1250 = vrot.lane.b32.xlu0 %v853_v41, %s3125_s30  ;;  %4721 = vst [vmem:[#allocation13_spill] sm:$0xff] %v3690_v19 }
 0x182   : > { %v1617_v36 = vpop.permute.xlu1 %1616 }
 0x183   : > { %v1873_v43 = vpop.permute.xlu0 %1872 }
 0x184   : > { %1376 = vrot.lane.b32.xlu1 %v3552_v44, %s3126_s12 }
 0x185   : > { %1374 = vrot.lane.b32.xlu0 %v3556_v45, %s3126_s12 }
 0x186   : > { %v1361_v46 = vpop.permute.xlu1 %1360 }
 0x187   : > { %v3560_v47 = vpop.permute.xlu0 %1492  ;;  %v2158_v7 = vsel %vm2154_vm5, %v2125_v1, %v1361_v46  ;;  %v2095_v1 = vsel %vm698_vm1, %v3368_v42, %v3534_v20 }
 0x188   : > { %1756 = vrot.lane.b32.xlu1 %v3552_v44, %s3131_s8  ;;  %v2191_v54 = vsel %vm2187_vm6, %v2158_v7, %v1489_v39  ;;  %v2127_v7 = vsel %vm344_vm0, %v2095_v1, %v3543_v29 }
 0x189   : > { %1754 = vrot.lane.b32.xlu0 %v3556_v45, %s3131_s8  ;;  %v2224_v14 = vsel %vm2220_vm8, %v2191_v54, %v1617_v36  ;;  %v3900_v45 = vld [vmem:[#allocation2 + $0x152] sm:$0xff] }
 0x18a   : > { %v3566_v48 = vpop.permute.xlu1 %1112 }
 0x18b   : > { %v2001_v50 = vpop.permute.xlu0 %2000 }
 0x18c   : > { %1502 = vrot.lane.b32.xlu1 %v821_v34, %s3127_s13 }
 0x18d   : > { %1882 = vrot.lane.b32.xlu0 %v821_v34, %s3129_s15 }
 0x18e   : > { %v3570_v57 = vpop.permute.xlu1 %1240 }
 0x18f   : > { %v3572_v60 = vpop.permute.xlu0 %1110 }
 0x190   : > { %2010 = vrot.lane.b32.xlu1 %v853_v41, %s3130_s16 }
 0x191   : > { %1888 = vrot.lane.b32.xlu0 %v1013_v58, %s3129_s15 }
 0x192   : > { %v3576_v61 = vpop.permute.xlu1 %1620 }
 0x193   : > { %v3578_v62 = vpop.permute.xlu0 %1238 }
 0x194   : > { %1630 = vrot.lane.b32.xlu1 %v853_v41, %s3128_s14 }
 0x195   : > { %1508 = vrot.lane.b32.xlu0 %v1013_v58, %s3127_s13 }
 0x196   : > { %v3587_v3 = vpop.permute.xlu1 %1364 }
 0x197   : > { %v3590_v8 = vpop.permute.xlu0 %1362  ;;  %v2160_v54 = vsel %vm2154_vm5, %v2127_v7, %v3587_v3  ;;  %v2094_v3 = vsel %vm698_vm1, %v3353_v32, %v3518_v6  ;;  %v3728_v7 = vld [vmem:[#allocation2 + $0xf1] sm:$0xff] }
 0x198   : > { %1128 = vrot.lane.b32.xlu1 %v1013_v58, %s3124_s29  ;;  %v3643_v58 = vld [vmem:[#allocation2 + $0xc2] sm:$0xff]  ;;  %v2193_v42 = vsel %vm2187_vm6, %v2160_v54, %v3560_v47  ;;  %v2126_v13 = vsel %vm344_vm0, %v2094_v3, %v3528_v18 }
 0x199   : > { %2016 = vrot.lane.b32.xlu0 %v1045_v5, %s3130_s16  ;;  %v2159_v47 = vsel %vm2154_vm5, %v2126_v13, %v3590_v8  ;;  %v3732_v54 = vld [vmem:[#allocation2 + $0xe2] sm:$0xff]  ;;  %v2097_v13 = vsel %vm698_vm1, %v3395_v55, %v3566_v48 }
 0x19a   : > { %v1745_v0 = vpop.permute.xlu1 %1744  ;;  %v3744_v3 = vld [vmem:[#allocation2 + $0xe0] sm:$0xff] }
 0x19b   : > { %v1743_v9 = vpop.permute.xlu0 %1742  ;;  %v2257_v10 = vsel %vm2253_vm7, %v2224_v14, %v1745_v0  ;;  %v2226_v14 = vsel %vm2220_vm8, %v2193_v42, %v3576_v61 }
 0x19c   : > { %1256 = vrot.lane.b32.xlu1 %v1045_v5, %s3125_s30  ;;  %v2290_v56 = vsel %vm2286_vm9, %v2257_v10, %v1873_v43  ;;  %v2256_v25 = vsel %vm2253_vm7, %v2223_v23, %v1743_v9  ;;  %v825_v43 = vld [vmem:[#allocation2 + $0xc1] sm:$0xff] }
 0x19d   : > { %1126 = vrot.lane.b32.xlu0 %v823_v11, %s3124_s29  ;;  %v2323_v34 = vsel %vm2319_vm10, %v2290_v56, %v2001_v50  ;;  %v3665_v9 = vld [vmem:[#allocation2 + $0xc0] sm:$0xff] }
 0x19e   : > { %v1491_v4 = vpop.permute.xlu1 %1490  ;;  %4720 = vst [vmem:[#allocation12_spill] sm:$0xff] %v3665_v9 }
 0x19f   : > { %v1871_v21 = vpop.permute.xlu0 %1870  ;;  %v2192_v32 = vsel %vm2187_vm6, %v2159_v47, %v1491_v4  ;;  %v2129_v47 = vsel %vm344_vm0, %v2097_v13, %v3570_v57  ;;  %v3771_v57 = vld [vmem:[#allocation2 + $0x109] sm:$0xff] }
 0x1a0   : > { %1636 = vrot.lane.b32.xlu1 %v1045_v5, %s3128_s14  ;;  %v2289_v22 = vsel %vm2286_vm9, %v2256_v25, %v1871_v21  ;;  %v3653_v5 = vld [vmem:[#allocation2 + $0xc9] sm:$0xff] }
 0x1a1   : > { %1254 = vrot.lane.b32.xlu0 %v855_v24, %s3125_s30 }
 0x1a2   : > { %v1999_v26 = vpop.permute.xlu1 %1998 }
 0x1a3   : > { %v1877_v28 = vpop.permute.xlu0 %1876  ;;  %v2322_v31 = vsel %vm2319_vm10, %v2289_v22, %v1999_v26  ;;  %v3709_v26 = vld [vmem:[#allocation2 + $0xda] sm:$0xff] }
 0x1a4   : > { %1380 = vrot.lane.b32.xlu1 %v3613_v30, %s3126_s12  ;;  %3037 = vmatprep.mubr.msk.f32.mxu1 %vm2364_vm11, %v2322_v31  ;;  %v3716_v31 = vld [vmem:[#allocation2 + $0xe1] sm:$0xff] }
 0x1a5   : > { %1378 = vrot.lane.b32.xlu0 %v3619_v33, %s3126_s12  ;;  %3038 = vmatmul.mubr.msk.f32.vlgmr.msra.gmra.mrb[0].mxu1 %vm2364_vm11, %v2323_v34 }
 0x1a6   : > { %v1619_v37 = vpop.permute.xlu1 %1618 }
 0x1a7   : > { %v3625_v39 = vpop.permute.xlu0 %1496  ;;  %v2225_v18 = vsel %vm2220_vm8, %v2192_v32, %v1619_v37 }
 0x1a8   : > { %1760 = vrot.lane.b32.xlu1 %v3613_v30, %s3131_s8 }
 0x1a9   : > { %1758 = vrot.lane.b32.xlu0 %v3619_v33, %s3131_s8 }
 0x1aa   : > { %v3631_v40 = vpop.permute.xlu1 %1116 }
 0x1ab   : > { %v2005_v41 = vpop.permute.xlu0 %2004  ;;  %v2099_v49 = vsel %vm698_vm1, %v3434_v12, %v3631_v40  ;;  %v3880_v12 = vld [vmem:[#allocation2 + $0x141] sm:$0xff] }
 0x1ac   : > { %1506 = vrot.lane.b32.xlu1 %v823_v11, %s3127_s13 }
 0x1ad   : > { %1886 = vrot.lane.b32.xlu0 %v823_v11, %s3129_s15  ;;  %v3671_v11 = vld [vmem:[#allocation2 + $0xca] sm:$0xff] }
 0x1ae   : > { %v3635_v36 = vpop.permute.xlu1 %1244 }
 0x1af   : > { %v3637_v46 = vpop.permute.xlu0 %1114  ;;  %v2131_v2 = vsel %vm344_vm0, %v2099_v49, %v3635_v36  ;;  %v3884_v36 = vld [vmem:[#allocation2 + $0x151] sm:$0xff] }
 0x1b0   : > { %2014 = vrot.lane.b32.xlu1 %v855_v24, %s3130_s16 }
 0x1b1   : > { %1130 = vrot.lane.b32.xlu0 %v825_v43, %s3124_s29 }
 0x1b2   : > { %v3641_v50 = vpop.permute.xlu1 %1624 }
 0x1b3   : > { %v3645_v63 = vpop.permute.xlu0 %1242 }
 0x1b4   : > { %1634 = vrot.lane.b32.xlu1 %v855_v24, %s3128_s14  ;;  %v3699_v24 = vld [vmem:[#allocation2 + $0xd9] sm:$0xff] }
 0x1b5   : > { %1258 = vrot.lane.b32.xlu0 %v3643_v58, %s3125_s30 }
 0x1b6   : > { %v3657_v27 = vpop.permute.xlu1 %1368 }
 0x1b7   : > { %v3661_v0 = vpop.permute.xlu0 %1366  ;;  %v2162_v32 = vsel %vm2154_vm5, %v2129_v47, %v3657_v27  ;;  %v2096_v27 = vsel %vm698_vm1, %v3402_v59, %v3572_v60  ;;  %v3791_v59 = vld [vmem:[#allocation2 + $0x10a] sm:$0xff] }
 0x1b8   : > { %1132 = vrot.lane.b32.xlu1 %v3653_v5, %s3124_s29  ;;  %v2195_v55 = vsel %vm2187_vm6, %v2162_v32, %v3625_v39  ;;  %v3804_v32 = vld [vmem:[#allocation2 + $0x111] sm:$0xff] }
 0x1b9   : > { %1382 = vrot.lane.b32.xlu0 %v3665_v9, %s3126_s12 }
 0x1ba   : > { %v1749_v20 = vpop.permute.xlu1 %1748 }
 0x1bb   : > { %v1747_v29 = vpop.permute.xlu0 %1746  ;;  %v2259_v17 = vsel %vm2253_vm7, %v2226_v14, %v1749_v20  ;;  %v3740_v20 = vld [vmem:[#allocation2 + $0xf2] sm:$0xff] }
 0x1bc   : > { %1260 = vrot.lane.b32.xlu1 %v3671_v11, %s3125_s30  ;;  %v2292_v61 = vsel %vm2286_vm9, %v2259_v17, %v1877_v28  ;;  %v2258_v21 = vsel %vm2253_vm7, %v2225_v18, %v1747_v29  ;;  %v3753_v14 = vld [vmem:[#allocation2 + $0xf9] sm:$0xff]  ;;  %v3765_v18 = vld [vmem:[#allocation2 + $0xf0] sm:$0xff] }
 0x1bd   : > { %1762 = vrot.lane.b32.xlu0 %v3665_v9, %s3131_s8  ;;  %v2325_v25 = vsel %vm2319_vm10, %v2292_v61, %v2005_v41  ;;  %v3722_v41 = vld [vmem:[#allocation2 + $0xd8] sm:$0xff]  ;;  %v3874_v9 = vld [vmem:[#allocation2 + $0x128] sm:$0xff] }
 0x1be   : > { %v3687_v10 = vpop.permute.xlu1 %1494  ;;  %4725 = vst [vmem:[#allocation17_spill] sm:$0xff] %v3874_v9 }
 0x1bf   : > { %v1875_v6 = vpop.permute.xlu0 %1874 }
 0x1c0   : > { %1384 = vrot.lane.b32.xlu1 %v3690_v19, %s3126_s12  ;;  %v2291_v8 = vsel %vm2286_vm9, %v2258_v21, %v1875_v6  ;;  %v3773_v21 = vld [vmem:[#allocation2 + $0xfa] sm:$0xff] }
 0x1c1   : > { %1890 = vrot.lane.b32.xlu0 %v825_v43, %s3129_s15 }
 0x1c2   : > { %v2003_v23 = vpop.permute.xlu1 %2002 }
 0x1c3   : > { %v2324_v4 = vsel %vm2319_vm10, %v2291_v8, %v2003_v23  ;;  %v1881_v56 = vpop.permute.xlu0 %1880  ;;  %v2128_v8 = vsel %vm344_vm0, %v2096_v27, %v3578_v62  ;;  %v2228_v23 = vsel %vm2220_vm8, %v2195_v55, %v3641_v50  ;;  %v3795_v62 = vld [vmem:[#allocation2 + $0xf8] sm:$0xff] }
 0x1c4   : > { %1764 = vrot.lane.b32.xlu1 %v3690_v19, %s3131_s8  ;;  %3040 = vmatprep.mubr.msk.f32.mxu1 %vm2364_vm11, %v2324_v4  ;;  %v2161_v39 = vsel %vm2154_vm5, %v2128_v8, %v3661_v0  ;;  %v3817_v8 = vld [vmem:[#allocation2 + $0x121] sm:$0xff] }
 0x1c5   : > { %1134 = vrot.lane.b32.xlu0 %v3699_v24, %s3124_s29  ;;  %3041 = vmatmul.mubr.msk.f32.gmra.mrb[2].mxu1 %vm2364_vm11, %v2325_v25  ;;  %v2194_v60 = vsel %vm2187_vm6, %v2161_v39, %v3687_v10  ;;  %v3821_v39 = vld [vmem:[#allocation2 + $0x112] sm:$0xff] }
 0x1c6   : > { %v1623_v22 = vpop.permute.xlu1 %1622 }
 0x1c7   : > { %v3711_v28 = vpop.permute.xlu0 %1500  ;;  %v2227_v50 = vsel %vm2220_vm8, %v2194_v60, %v1623_v22  ;;  %v3811_v22 = vld [vmem:[#allocation2 + $0x108] sm:$0xff] }
 0x1c8   : > { %1510 = vrot.lane.b32.xlu1 %v825_v43, %s3127_s13 }
 0x1c9   : > { %1262 = vrot.lane.b32.xlu0 %v3709_v26, %s3125_s30 }
 0x1ca   : > { %v3718_v34 = vpop.permute.xlu1 %1120 }
 0x1cb   : > { %v2009_v37 = vpop.permute.xlu0 %2008 }
 0x1cc   : > { %1136 = vrot.lane.b32.xlu1 %v3716_v31, %s3124_s29 }
 0x1cd   : > { %1386 = vrot.lane.b32.xlu0 %v3722_v41, %s3126_s12 }
 0x1ce   : > { %v3726_v1 = vpop.permute.xlu1 %1248 }
 0x1cf   : > { %v3730_v43 = vpop.permute.xlu0 %1118 }
 0x1d0   : > { %1264 = vrot.lane.b32.xlu1 %v3732_v54, %s3125_s30 }
 0x1d1   : > { %1138 = vrot.lane.b32.xlu0 %v3728_v7, %s3124_s29 }
 0x1d2   : > { %v3738_v42 = vpop.permute.xlu1 %1628 }
 0x1d3   : > { %v3742_v29 = vpop.permute.xlu0 %1246 }
 0x1d4   : > { %1388 = vrot.lane.b32.xlu1 %v3744_v3, %s3126_s12 }
 0x1d5   : > { %1266 = vrot.lane.b32.xlu0 %v3740_v20, %s3125_s30 }
 0x1d6   : > { %v3757_v17 = vpop.permute.xlu1 %1372 }
 0x1d7   : > { %v3761_v6 = vpop.permute.xlu0 %1370  ;;  %v2164_v35 = vsel %vm2154_vm5, %v2131_v2, %v3757_v17  ;;  %v2098_v2 = vsel %vm698_vm1, %v3439_v15, %v3637_v46 }
 0x1d8   : > { %1140 = vrot.lane.b32.xlu1 %v3753_v14, %s3124_s29  ;;  %v2197_v49 = vsel %vm2187_vm6, %v2164_v35, %v3711_v28  ;;  %v2130_v17 = vsel %vm344_vm0, %v2098_v2, %v3645_v63 }
 0x1d9   : > { %1390 = vrot.lane.b32.xlu0 %v3765_v18, %s3126_s12  ;;  %v2230_v33 = vsel %vm2220_vm8, %v2197_v49, %v3738_v42  ;;  %v2163_v35 = vsel %vm2154_vm5, %v2130_v17, %v3761_v6  ;;  %v3926_v17 = vld [vmem:[#allocation2 + $0x16a] sm:$0xff] }
 0x1da   : > { %v1753_v48 = vpop.permute.xlu1 %1752  ;;  %4726 = vst [vmem:[#allocation18_spill] sm:$0xff] %v3926_v17 }
 0x1db   : > { %v1751_v61 = vpop.permute.xlu0 %1750  ;;  %v2261_v4 = vsel %vm2253_vm7, %v2228_v23, %v1753_v48 }
 0x1dc   : > { %1268 = vrot.lane.b32.xlu1 %v3773_v21, %s3125_s30  ;;  %v2294_v47 = vsel %vm2286_vm9, %v2261_v4, %v1881_v56  ;;  %v2260_v0 = vsel %vm2253_vm7, %v2227_v50, %v1751_v61  ;;  %v3837_v50 = vld [vmem:[#allocation2 + $0x129] sm:$0xff] }
 0x1dd   : > { %1142 = vrot.lane.b32.xlu0 %v3771_v57, %s3124_s29  ;;  %v2327_v56 = vsel %vm2319_vm10, %v2294_v47, %v2009_v37  ;;  %v3829_v37 = vld [vmem:[#allocation2 + $0x122] sm:$0xff] }
 0x1de   : > { %v3789_v25 = vpop.permute.xlu1 %1498 }
 0x1df   : > { %v1879_v13 = vpop.permute.xlu0 %1878  ;;  %v2196_v15 = vsel %vm2187_vm6, %v2163_v35, %v3789_v25 }
 0x1e0   : > { %1392 = vrot.lane.b32.xlu1 %v3795_v62, %s3126_s12  ;;  %v2293_v55 = vsel %vm2286_vm9, %v2260_v0, %v1879_v13  ;;  %v3831_v13 = vld [vmem:[#allocation2 + $0x110] sm:$0xff] }
 0x1e1   : > { %1270 = vrot.lane.b32.xlu0 %v3791_v59, %s3125_s30 }
 0x1e2   : > { %v2007_v10 = vpop.permute.xlu1 %2006 }
 0x1e3   : > { %v2326_v48 = vsel %vm2319_vm10, %v2293_v55, %v2007_v10  ;;  %v1885_v27 = vpop.permute.xlu0 %1884  ;;  %v3845_v55 = vld [vmem:[#allocation2 + $0x120] sm:$0xff] }
 0x1e4   : > { %1144 = vrot.lane.b32.xlu1 %v3804_v32, %s3124_s29  ;;  %3043 = vmatprep.mubr.msk.f32.mxu1 %vm2364_vm11, %v2326_v48  ;;  %4723 = vst [vmem:[#allocation15_spill] sm:$0xff] %v3845_v55  ;;  %v3851_v48 = vld [vmem:[#allocation2 + $0x139] sm:$0xff] }
 0x1e5   : > { %1394 = vrot.lane.b32.xlu0 %v3811_v22, %s3126_s12  ;;  %3044 = vmatmul.mubr.msk.f32.gmra.mrb[4].mxu1 %vm2364_vm11, %v2327_v56 }
 0x1e6   : > { %v1627_v61 = vpop.permute.xlu1 %1626 }
 0x1e7   : > { %v3819_v23 = vpop.permute.xlu0 %1504  ;;  %v2229_v63 = vsel %vm2220_vm8, %v2196_v15, %v1627_v61  ;;  %v3936_v15 = vld [vmem:[#allocation2 + $0x171] sm:$0xff] }
 0x1e8   : > { %1272 = vrot.lane.b32.xlu1 %v3821_v39, %s3125_s30  ;;  %4727 = vst [vmem:[#allocation19_spill] sm:$0xff] %v3936_v15 }
 0x1e9   : > { %1146 = vrot.lane.b32.xlu0 %v3817_v8, %s3124_s29 }
 0x1ea   : > { %v3827_v4 = vpop.permute.xlu1 %1124 }
 0x1eb   : > { %v2013_v60 = vpop.permute.xlu0 %2012 }
 0x1ec   : > { %1396 = vrot.lane.b32.xlu1 %v3831_v13, %s3126_s12 }
 0x1ed   : > { %1274 = vrot.lane.b32.xlu0 %v3829_v37, %s3125_s30 }
 0x1ee   : > { %v3839_v47 = vpop.permute.xlu1 %1252 }
 0x1ef   : > { %v3841_v0 = vpop.permute.xlu0 %1122 }
 0x1f0   : > { %4722 = vst [vmem:[#allocation14_spill] sm:$0xff] %v3841_v0  ;;  %1148 = vrot.lane.b32.xlu1 %v3837_v50, %s3124_s29  ;;  %v3904_v0 = vld [vmem:[#allocation2 + $0x142] sm:$0xff] }
 0x1f1   : > { %1398 = vrot.lane.b32.xlu0 %v3845_v55, %s3126_s12 }
 0x1f2   : > { %v3849_v10 = vpop.permute.xlu1 %1632 }
 0x1f3   : > { %v3853_v56 = vpop.permute.xlu0 %1250 }
 0x1f4   : > { %4724 = vst [vmem:[#allocation16_spill] sm:$0xff] %v3853_v56  ;;  %1276 = vrot.lane.b32.xlu1 %v3855_v16, %s3125_s30 }
 0x1f5   : > { %1150 = vrot.lane.b32.xlu0 %v3851_v48, %s3124_s29 }
 0x1f6   : > { %v3866_v38 = vpop.permute.xlu1 %1376 }
 0x1f7   : > { %v3872_v19 = vpop.permute.xlu0 %1374 }
 0x1f8   : > { %1400 = vrot.lane.b32.xlu1 %v3874_v9, %s3126_s12 }
 0x1f9   : > { %1278 = vrot.lane.b32.xlu0 %v3868_v51, %s3125_s30 }
 0x1fa   : > { %v1757_v40 = vpop.permute.xlu1 %1756 }
 0x1fb   : > { %v1755_v30 = vpop.permute.xlu0 %1754  ;;  %v2263_v28 = vsel %vm2253_vm7, %v2230_v33, %v1757_v40  ;;  %v3913_v33 = vld [vmem:[#allocation2 + $0x159] sm:$0xff]  ;;  %v3916_v40 = vld [vmem:[#allocation2 + $0x169] sm:$0xff] }
 0x1fc   : > { %1152 = vrot.lane.b32.xlu1 %v3880_v12, %s3124_s29  ;;  %v2296_v42 = vsel %vm2286_vm9, %v2263_v28, %v1885_v27  ;;  %v2262_v6 = vsel %vm2253_vm7, %v2229_v63, %v1755_v30  ;;  %v3930_v28 = vld [vmem:[#allocation2 + $0x15a] sm:$0xff] }
 0x1fd   : > { %1154 = vrot.lane.b32.xlu0 %v3884_v36, %s3124_s29  ;;  %v2329_v30 = vsel %vm2319_vm10, %v2296_v42, %v2013_v60 }
 0x1fe   : > { %v1503_v56 = vpop.permute.xlu1 %1502 }
 0x1ff   : > { %v1883_v46 = vpop.permute.xlu0 %1882 }
 0x200   : > { %1280 = vrot.lane.b32.xlu1 %v3904_v0, %s3125_s30  ;;  %v2295_v49 = vsel %vm2286_vm9, %v2262_v6, %v1883_v46  ;;  %v3948_v6 = vld [vmem:[#allocation2 + $0x172] sm:$0xff] }
 0x201   : > { %1282 = vrot.lane.b32.xlu0 %v3900_v45, %s3125_s30  ;;  %4728 = vst [vmem:[#allocation20_spill] sm:$0xff] %v3948_v6 }
 0x202   : > { %v2011_v25 = vpop.permute.xlu1 %2010 }
 0x203   : > { %v2328_v2 = vsel %vm2319_vm10, %v2295_v49, %v2011_v25  ;;  %v1889_v61 = vpop.permute.xlu0 %1888 }
 0x204   : > { %1156 = vrot.lane.b32.xlu1 %v3913_v33, %s3124_s29  ;;  %3046 = vmatprep.mubr.msk.f32.mxu1 %vm2364_vm11, %v2328_v2  ;;  %v2101_v2 = vsel %vm698_vm1, %v3488_v52, %v3718_v34 }
 0x205   : > { %1158 = vrot.lane.b32.xlu0 %v3916_v40, %s3124_s29  ;;  %3047 = vmatmul.mubr.msk.f32.gmra.mrb[6].mxu1 %vm2364_vm11, %v2329_v30  ;;  %v2133_v30 = vsel %vm344_vm0, %v2101_v2, %v3726_v1  ;;  %v2100_v1 = vsel %vm698_vm1, %v3492_v53, %v3730_v43 }
 0x206   : > { %v1631_v27 = vpop.permute.xlu1 %1630 }
 0x207   : > { %v3928_v35 = vpop.permute.xlu0 %1508 }
 0x208   : > { %1284 = vrot.lane.b32.xlu1 %v3930_v28, %s3125_s30 }
 0x209   : > { %1286 = vrot.lane.b32.xlu0 %v3926_v17, %s3125_s30 }
 0x20a   : > { %v3938_v60 = vpop.permute.xlu1 %1128 }
 0x20b   : > { %v2017_v46 = vpop.permute.xlu0 %2016 }
 0x20c   : > { %1160 = vrot.lane.b32.xlu1 %v3936_v15, %s3124_s29 }
 0x20d   : > { %1892 = vrot.lane.b32.xlu0 %v3653_v5, %s3129_s15 }
 0x20e   : > { %v3944_v63 = vpop.permute.xlu1 %1256 }
 0x20f   : > { %v3946_v42 = vpop.permute.xlu0 %1126 }
 0x210   : > { %1288 = vrot.lane.b32.xlu1 %v3948_v6, %s3125_s30 }
 0x211   : > { %1512 = vrot.lane.b32.xlu0 %v3653_v5, %s3127_s13  ;;  %v2166_v5 = vsel %vm2154_vm5, %v2133_v30, %v3866_v38  ;;  %v2132_v38 = vsel %vm344_vm0, %v2100_v1, %v3742_v29 }
 0x212   : > { %v3954_v49 = vpop.permute.xlu1 %1636  ;;  %v2199_v52 = vsel %vm2187_vm6, %v2166_v5, %v3819_v23  ;;  %v2165_v23 = vsel %vm2154_vm5, %v2132_v38, %v3872_v19  ;;  %v302_v38 = vld [vmem:[%s3294_s9 + $0xf0] sm:$0xff] }
 0x213   : > { %v3956_v25 = vpop.permute.xlu0 %1254  ;;  %v2198_v53 = vsel %vm2187_vm6, %v2165_v23, %v1503_v56 }
 0x214   : > { %2018 = vrot.lane.b32.xlu1 %v3643_v58, %s3130_s16  ;;  %v2231_v43 = vsel %vm2220_vm8, %v2198_v53, %v1631_v27  ;;  %v303_v27 = vld [vmem:[%s3294_s9 + $0xf8] sm:$0xff] }
 0x215   : > { %2020 = vrot.lane.b32.xlu0 %v3671_v11, %s3130_s16 }
 0x216   : > { %v3967_v6 = vpop.permute.xlu1 %1380 }
 0x217   : > { %v3971_v17 = vpop.permute.xlu0 %1378 }
 0x218   : > { %1638 = vrot.lane.b32.xlu1 %v3643_v58, %s3128_s14  ;;  %v2232_v58 = vsel %vm2220_vm8, %v2199_v52, %v3849_v10 }
 0x219   : > { %1766 = vrot.lane.b32.xlu0 %v3722_v41, %s3131_s8 }
 0x21a   : > { %v1761_v34 = vpop.permute.xlu1 %1760 }
 0x21b   : > { %v1759_v15 = vpop.permute.xlu0 %1758  ;;  %v2265_v2 = vsel %vm2253_vm7, %v2232_v58, %v1761_v34  ;;  %v3023_v34 = vpop.f32.mrb[30].mxu0 }
 0x21c   : > { %1640 = vrot.lane.b32.xlu1 %v3671_v11, %s3128_s14  ;;  %v2298_v29 = vsel %vm2286_vm9, %v2265_v2, %v1889_v61  ;;  %v2264_v10 = vsel %vm2253_vm7, %v2231_v43, %v1759_v15  ;;  %v3113_v15 = vld [vmem:[%s4692_s3] ss:$0 sm:$0xff]  ;;  %v657_v58 = vpop.f32.mrb[31].mxu0 }
 0x21d   : > { %1894 = vrot.lane.b32.xlu0 %v3699_v24, %s3129_s15  ;;  %v2331_v61 = vsel %vm2319_vm10, %v2298_v29, %v2017_v46  ;;  %v663_v1 = vadd.f32 %v3113_v15, %v3023_v34 }
 0x21e   : > { %v3993_v30 = vpop.permute.xlu1 %1506 }
 0x21f   : > { %v1887_v11 = vpop.permute.xlu0 %1886  ;;  %v697_v46 = vadd.f32 %v663_v1, %v303_v27 }
 0x220   : > { %1768 = vrot.lane.b32.xlu1 %v3744_v3, %s3131_s8  ;;  %v2297_v19 = vsel %vm2286_vm9, %v2264_v10, %v1887_v11 }
 0x221   : > { %1896 = vrot.lane.b32.xlu0 %v3716_v31, %s3129_s15  ;;  %776 = vst.msk [vmem:[#allocation2 + $0x189] sm:$0xff] %vm698_vm1, %v697_v46 }
 0x222   : > { %v2015_v5 = vpop.permute.xlu1 %2014 }
 0x223   : > { %v2330_v52 = vsel %vm2319_vm10, %v2297_v19, %v2015_v5  ;;  %v4005_v56 = vpop.permute.xlu0 %1130 }
 0x224   : > { %1514 = vrot.lane.b32.xlu1 %v3699_v24, %s3127_s13  ;;  %3049 = vmatprep.mubr.msk.f32.mxu1 %vm2364_vm11, %v2330_v52  ;;  %v658_v24 = vadd.f32 %v3113_v15, %v657_v58 }
 0x225   : > { %1516 = vrot.lane.b32.xlu0 %v3716_v31, %s3127_s13  ;;  %3050 = vmatmul.mubr.msk.f32.gmra.mrb[8].mxu1 %vm2364_vm11, %v2331_v61 }
 0x226   : > { %v4019_v23 = vpop.permute.xlu1 %1634  ;;  %v696_v53 = vadd.f32 %v658_v24, %v302_v38 }
 0x227   : > { %v4021_v2 = vpop.permute.xlu0 %1258 }
 0x228   : > { %2022 = vrot.lane.b32.xlu1 %v3709_v26, %s3130_s16  ;;  %775 = vst.msk [vmem:[#allocation2 + $0x181] sm:$0xff] %vm698_vm1, %v696_v53 }
 0x229   : > { %2024 = vrot.lane.b32.xlu0 %v3732_v54, %s3130_s16 }
 0x22a   : > { %v4028_v31 = vpop.permute.xlu1 %1132 }
 0x22b   : > { %v4031_v11 = vpop.permute.xlu0 %1382 }
 0x22c   : > { %1642 = vrot.lane.b32.xlu1 %v3709_v26, %s3128_s14 }
 0x22d   : > { %1770 = vrot.lane.b32.xlu0 %v3765_v18, %s3131_s8 }
 0x22e   : > { %v4037_v43 = vpop.permute.xlu1 %1260 }
 0x22f   : > { %v4039_v29 = vpop.permute.xlu0 %1762 }
 0x230   : > { %1644 = vrot.lane.b32.xlu1 %v3732_v54, %s3128_s14 }
 0x231   : > { %1898 = vrot.lane.b32.xlu0 %v3728_v7, %s3129_s15 }
 0x232   : > { %v4045_v10 = vpop.permute.xlu1 %1384 }
 0x233   : > { %v4047_v19 = vpop.permute.xlu0 %1890 }
 0x234   : > { %1772 = vrot.lane.b32.xlu1 %v3795_v62, %s3131_s8 }
 0x235   : > { %1900 = vrot.lane.b32.xlu0 %v3753_v14, %s3129_s15 }
 0x236   : > { %v4053_v26 = vpop.permute.xlu1 %1764 }
 0x237   : > { %v4055_v5 = vpop.permute.xlu0 %1134 }
 0x238   : > { %1518 = vrot.lane.b32.xlu1 %v3728_v7, %s3127_s13 }
 0x239   : > { %1520 = vrot.lane.b32.xlu0 %v3753_v14, %s3127_s13 }
 0x23a   : > { %v4061_v54 = vpop.permute.xlu1 %1510 }
 0x23b   : > { %v4063_v52 = vpop.permute.xlu0 %1262 }
 0x23c   : > { %2026 = vrot.lane.b32.xlu1 %v3740_v20, %s3130_s16 }
 0x23d   : > { %2028 = vrot.lane.b32.xlu0 %v3773_v21, %s3130_s16 }
 0x23e   : > { %v4069_v61 = vpop.permute.xlu1 %1136 }
 0x23f   : > { %v4071_v27 = vpop.permute.xlu0 %1386 }
 0x240   : > { %1646 = vrot.lane.b32.xlu1 %v3740_v20, %s3128_s14 }
 0x241   : > { %1774 = vrot.lane.b32.xlu0 %v3811_v22, %s3131_s8 }
 0x242   : > { %v4077_v7 = vpop.permute.xlu1 %1264 }
 0x243   : > { %v4079_v14 = vpop.permute.xlu0 %1138 }
 0x244   : > { %1648 = vrot.lane.b32.xlu1 %v3773_v21, %s3128_s14 }
 0x245   : > { %1902 = vrot.lane.b32.xlu0 %v3771_v57, %s3129_s15 }
 0x246   : > { %v4085_v34 = vpop.permute.xlu1 %1388 }
 0x247   : > { %v4087_v15 = vpop.permute.xlu0 %1266 }
 0x248   : > { %1776 = vrot.lane.b32.xlu1 %v3831_v13, %s3131_s8 }
 0x249   : > { %1904 = vrot.lane.b32.xlu0 %v3804_v32, %s3129_s15 }
 0x24a   : > { %v4093_v20 = vpop.permute.xlu1 %1140 }
 0x24b   : > { %v4095_v1 = vpop.permute.xlu0 %1390 }
 0x24c   : > { %1522 = vrot.lane.b32.xlu1 %v3771_v57, %s3127_s13 }
 0x24d   : > { %1524 = vrot.lane.b32.xlu0 %v3804_v32, %s3127_s13 }
 0x24e   : > { %v4101_v21 = vpop.permute.xlu1 %1268 }
 0x24f   : > { %v4103_v38 = vpop.permute.xlu0 %1142 }
 0x250   : > { %2030 = vrot.lane.b32.xlu1 %v3791_v59, %s3130_s16 }
 0x251   : > { %2032 = vrot.lane.b32.xlu0 %v3821_v39, %s3130_s16 }
 0x252   : > { %v4109_v58 = vpop.permute.xlu1 %1392 }
 0x253   : > { %v4111_v24 = vpop.permute.xlu0 %1270 }
 0x254   : > { %1650 = vrot.lane.b32.xlu1 %v3791_v59, %s3128_s14 }
 0x255   : > { %1778 = vrot.lane.b32.xlu0 %v3845_v55, %s3131_s8 }
 0x256   : > { %v4117_v57 = vpop.permute.xlu1 %1144 }
 0x257   : > { %v4119_v32 = vpop.permute.xlu0 %1394 }
 0x258   : > { %1652 = vrot.lane.b32.xlu1 %v3821_v39, %s3128_s14 }
 0x259   : > { %1906 = vrot.lane.b32.xlu0 %v3817_v8, %s3129_s15 }
 0x25a   : > { %v4125_v46 = vpop.permute.xlu1 %1272 }
 0x25b   : > { %4729 = vst [vmem:[#allocation21_spill] sm:$0xff] %v4125_v46  ;;  %v4127_v53 = vpop.permute.xlu0 %1146 }
 0x25c   : > { %4730 = vst [vmem:[#allocation22_spill] sm:$0xff] %v4127_v53  ;;  %1780 = vrot.lane.b32.xlu1 %v3874_v9, %s3131_s8 }
 0x25d   : > { %1908 = vrot.lane.b32.xlu0 %v3837_v50, %s3129_s15 }
 0x25e   : > { %v4133_v59 = vpop.permute.xlu1 %1396 }
 0x25f   : > { %v4135_v55 = vpop.permute.xlu0 %1274 }
 0x260   : > { %4731 = vst [vmem:[#allocation23_spill] sm:$0xff] %v4135_v55  ;;  %1526 = vrot.lane.b32.xlu1 %v3817_v8, %s3127_s13  ;;  %v4153_v55 = vld [vmem:[#allocation2 + $0x138] sm:$0xff] }
 0x261   : > { %1528 = vrot.lane.b32.xlu0 %v3837_v50, %s3127_s13  ;;  %4735 = vst [vmem:[#allocation27_spill] sm:$0xff] %v4153_v55 }
 0x262   : > { %v4141_v39 = vpop.permute.xlu1 %1148 }
 0x263   : > { %4732 = vst [vmem:[#allocation24_spill] sm:$0xff] %v4141_v39  ;;  %v4143_v46 = vpop.permute.xlu0 %1398  ;;  %v4165_v39 = vld [vmem:[#allocation2 + $0x140] sm:$0xff] }
 0x264   : > { %2034 = vrot.lane.b32.xlu1 %v3829_v37, %s3130_s16  ;;  %4738 = vst [vmem:[#allocation30_spill] sm:$0xff] %v4165_v39 }
 0x265   : > { %2036 = vrot.lane.b32.xlu0 %v3855_v16, %s3130_s16 }
 0x266   : > { %v4149_v9 = vpop.permute.xlu1 %1276 }
 0x267   : > { %4733 = vst [vmem:[#allocation25_spill] sm:$0xff] %v4149_v9  ;;  %v4151_v53 = vpop.permute.xlu0 %1150 }
 0x268   : > { %4734 = vst [vmem:[#allocation26_spill] sm:$0xff] %v4151_v53  ;;  %1654 = vrot.lane.b32.xlu1 %v3829_v37, %s3128_s14 }
 0x269   : > { %1782 = vrot.lane.b32.xlu0 %v4153_v55, %s3131_s8 }
 0x26a   : > { %v4159_v8 = vpop.permute.xlu1 %1400 }
 0x26b   : > { %4736 = vst [vmem:[#allocation28_spill] sm:$0xff] %v4159_v8  ;;  %v4161_v50 = vpop.permute.xlu0 %1278 }
 0x26c   : > { %4737 = vst [vmem:[#allocation29_spill] sm:$0xff] %v4161_v50  ;;  %1656 = vrot.lane.b32.xlu1 %v3855_v16, %s3128_s14 }
 0x26d   : > { %1784 = vrot.lane.b32.xlu0 %v4165_v39, %s3131_s8 }
 0x26e   : > { %v4169_v53 = vpop.permute.xlu1 %1152 }
 0x26f   : > { %4739 = vst [vmem:[#allocation31_spill] sm:$0xff] %v4169_v53  ;;  %v4171_v9 = vpop.permute.xlu0 %1154 }
 0x270   : > { %4740 = vst [vmem:[#allocation32_spill] sm:$0xff] %v4171_v9  ;;  %1402 = vrot.lane.b32.xlu1 %v4153_v55, %s3126_s12  ;;  %v4190_v9 = vld [vmem:[%s4694_s5] ss:$0 sm:$0xff] }
 0x271   : > { %1404 = vrot.lane.b32.xlu0 %v4165_v39, %s3126_s12 }
 0x272   : > { %v4177_v37 = vpop.permute.xlu1 %1280 }
 0x273   : > { %4741 = vst [vmem:[#allocation33_spill] sm:$0xff] %v4177_v37  ;;  %v4179_v50 = vpop.permute.xlu0 %1282 }
 0x274   : > { %4742 = vst [vmem:[#allocation34_spill] sm:$0xff] %v4179_v50  ;;  %1910 = vrot.lane.b32.xlu1 %v3851_v48, %s3129_s15 }
 0x275   : > { %1912 = vrot.lane.b32.xlu0 %v3880_v12, %s3129_s15 }
 0x276   : > { %v4185_v16 = vpop.permute.xlu1 %1156 }
 0x277   : > { %4743 = vst [vmem:[#allocation35_spill] sm:$0xff] %v4185_v16  ;;  %v4192_v53 = vpop.permute.xlu0 %1158 }
 0x278   : > { %4744 = vst [vmem:[#allocation36_spill] sm:$0xff] %v4192_v53  ;;  %1530 = vrot.lane.b32.xlu1 %v3851_v48, %s3127_s13  ;;  %v3039_v37 = vpop.f32.mrb[0].mxu1 }
 0x279   : > { %v2547_v50 = vadd.f32 %v3039_v37, %v4190_v9  ;;  %1532 = vrot.lane.b32.xlu0 %v3880_v12, %s3127_s13  ;;  %v2541_v39 = vpop.f32.mrb[1].mxu1  ;;  %v2103_v12 = vsel %vm698_vm1, %v3552_v44, %v3827_v4  ;;  %v4230_v4 = vld [vmem:[#allocation2 + $0x150] sm:$0xff] }
 0x27a   : > { %v2542_v16 = vadd.f32 %v4190_v9, %v2541_v39  ;;  %v4206_v53 = vpop.permute.xlu1 %1284  ;;  %v2135_v39 = vsel %vm344_vm0, %v2103_v12, %v3839_v47 }
 0x27b   : > { %4745 = vst [vmem:[#allocation37_spill] sm:$0xff] %v4206_v53  ;;  %v2693_v55 = vmax.f32 %v2547_v50, 0.0  ;;  %v4208_v48 = vpop.permute.xlu0 %1286  ;;  %v2168_v37 = vsel %vm2154_vm5, %v2135_v39, %v3967_v6  ;;  %v4748_v53 = vld [vmem:[#allocation9_spill] sm:$0xff]  ;;  %v4248_v39 = vld [vmem:[#allocation2 + $0x158] sm:$0xff] }
 0x27c   : > { %4746 = vst [vmem:[#allocation38_spill] sm:$0xff] %v4208_v48  ;;  %v2692_v8 = vmax.f32 %v2542_v16, 0.0  ;;  %2038 = vrot.lane.b32.xlu1 %v3868_v51, %s3130_s16  ;;  %v4747_v48 = vld [vmem:[#allocation14_spill] sm:$0xff] }
 0x27d   : > { %2725 = vst.msk [vmem:[%s4203_s17 + $0x18] sm:$0xff] %vm698_vm1, %v2693_v55  ;;  %2040 = vrot.lane.b32.xlu0 %v3904_v0, %s3130_s16  ;;  %v2102_v44 = vsel %vm698_vm1, %v4748_v53, %v4747_v48  ;;  %v4749_v55 = vld [vmem:[#allocation16_spill] sm:$0xff] }
 0x27e   : > { %2724 = vst.msk [vmem:[%s4203_s17 + $0x10] sm:$0xff] %vm698_vm1, %v2692_v8  ;;  %v4223_v50 = vpop.permute.xlu1 %1160  ;;  %v2134_v47 = vsel %vm344_vm0, %v2102_v44, %v4749_v55  ;;  %v2201_v8 = vsel %vm2187_vm6, %v2168_v37, %v3928_v35 }
 0x27f   : > { %v1893_v16 = vpop.permute.xlu0 %1892  ;;  %v2167_v6 = vsel %vm2154_vm5, %v2134_v47, %v3971_v17  ;;  %v2234_v17 = vsel %vm2220_vm8, %v2201_v8, %v3954_v49  ;;  %v4750_v47 = vld [vmem:[#allocation11_spill] sm:$0xff] }
 0x280   : > { %1658 = vrot.lane.b32.xlu1 %v3868_v51, %s3128_s14  ;;  %v2200_v53 = vsel %vm2187_vm6, %v2167_v6, %v3993_v30  ;;  %v2104_v8 = vsel %vm698_vm1, %v4750_v47, %v3946_v42 }
 0x281   : > { %1786 = vrot.lane.b32.xlu0 %v4230_v4, %s3131_s8  ;;  %v2233_v51 = vsel %vm2220_vm8, %v2200_v53, %v4019_v23  ;;  %v2267_v23 = vsel %vm2253_vm7, %v2234_v17, %v4053_v26  ;;  %v4751_v53 = vld [vmem:[#allocation10_spill] sm:$0xff] }
 0x282   : > { %v4242_v12 = vpop.permute.xlu1 %1288  ;;  %v2266_v35 = vsel %vm2253_vm7, %v2233_v51, %v4039_v29  ;;  %v2300_v44 = vsel %vm2286_vm9, %v2267_v23, %v1893_v16  ;;  %v2105_v51 = vsel %vm698_vm1, %v4751_v53, %v3938_v60 }
 0x283   : > { %v1513_v48 = vpop.permute.xlu0 %1512  ;;  %v2299_v30 = vsel %vm2286_vm9, %v2266_v35, %v4047_v19  ;;  %v2136_v35 = vsel %vm344_vm0, %v2104_v8, %v3956_v25 }
 0x284   : > { %1660 = vrot.lane.b32.xlu1 %v3904_v0, %s3128_s14 }
 0x285   : > { %1788 = vrot.lane.b32.xlu0 %v4248_v39, %s3131_s8 }
 0x286   : > { %v2019_v37 = vpop.permute.xlu1 %2018 }
 0x287   : > { %v2332_v0 = vsel %vm2319_vm10, %v2299_v30, %v2019_v37  ;;  %v2021_v55 = vpop.permute.xlu0 %2020  ;;  %v2137_v30 = vsel %vm344_vm0, %v2105_v51, %v3944_v63  ;;  %v4302_v37 = vld [vmem:[#allocation2 + $0x168] sm:$0xff] }
 0x288   : > { %v2333_v29 = vsel %vm2319_vm10, %v2300_v44, %v2021_v55  ;;  %1406 = vrot.lane.b32.xlu1 %v4230_v4, %s3126_s12  ;;  %3052 = vmatprep.mubr.msk.f32.mxu1 %vm2364_vm11, %v2332_v0 }
 0x289   : > { %1408 = vrot.lane.b32.xlu0 %v4248_v39, %s3126_s12  ;;  %3053 = vmatmul.mubr.msk.f32.gmra.mrb[10].mxu1 %vm2364_vm11, %v2333_v29 }
 0x28a   : > { %v1639_v49 = vpop.permute.xlu1 %1638 }
 0x28b   : > { %v1767_v19 = vpop.permute.xlu0 %1766 }
 0x28c   : > { %1914 = vrot.lane.b32.xlu1 %v3884_v36, %s3129_s15 }
 0x28d   : > { %1916 = vrot.lane.b32.xlu0 %v3913_v33, %s3129_s15 }
 0x28e   : > { %v1641_v26 = vpop.permute.xlu1 %1640 }
 0x28f   : > { %v1895_v16 = vpop.permute.xlu0 %1894 }
 0x290   : > { %1534 = vrot.lane.b32.xlu1 %v3884_v36, %s3127_s13  ;;  %v2169_v36 = vsel %vm2154_vm5, %v2136_v35, %v4031_v11 }
 0x291   : > { %1536 = vrot.lane.b32.xlu0 %v3913_v33, %s3127_s13  ;;  %v2170_v33 = vsel %vm2154_vm5, %v2137_v30, %v4045_v10  ;;  %v2202_v42 = vsel %vm2187_vm6, %v2169_v36, %v4061_v54  ;;  %v4753_v30 = vld [vmem:[#allocation12_spill] sm:$0xff] }
 0x292   : > { %v1769_v6 = vpop.permute.xlu1 %1768  ;;  %v2203_v60 = vsel %vm2187_vm6, %v2170_v33, %v1513_v48  ;;  %v2235_v25 = vsel %vm2220_vm8, %v2202_v42, %v1639_v49  ;;  %v2106_v36 = vsel %vm698_vm1, %v4753_v30, %v4005_v56  ;;  %v2108_v30 = vsel %vm698_vm1, %v3722_v41, %v4055_v5 }
 0x293   : > { %v1897_v17 = vpop.permute.xlu0 %1896  ;;  %v2236_v23 = vsel %vm2220_vm8, %v2203_v60, %v1641_v26  ;;  %v2268_v54 = vsel %vm2253_vm7, %v2235_v25, %v1767_v19  ;;  %v4315_v19 = vld [vmem:[#allocation2 + $0x170] sm:$0xff]  ;;  %v2138_v42 = vsel %vm344_vm0, %v2106_v36, %v4021_v2  ;;  %v4754_v60 = vld [vmem:[#allocation13_spill] sm:$0xff] }
 0x294   : > { %2042 = vrot.lane.b32.xlu1 %v3900_v45, %s3130_s16  ;;  %v2269_v44 = vsel %vm2253_vm7, %v2236_v23, %v1769_v6  ;;  %v2301_v55 = vsel %vm2286_vm9, %v2268_v54, %v1895_v16  ;;  %v2107_v25 = vsel %vm698_vm1, %v4754_v60, %v4028_v31  ;;  %v2109_v60 = vsel %vm698_vm1, %v3744_v3, %v4069_v61 }
 0x295   : > { %2044 = vrot.lane.b32.xlu0 %v3930_v28, %s3130_s16  ;;  %v2302_v26 = vsel %vm2286_vm9, %v2269_v44, %v1897_v17  ;;  %v4752_v17 = vld [vmem:[#allocation19_spill] sm:$0xff]  ;;  %v2139_v44 = vsel %vm344_vm0, %v2107_v25, %v4037_v43 }
 0x296   : > { %v1515_v63 = vpop.permute.xlu1 %1514  ;;  %v2172_v56 = vsel %vm2154_vm5, %v2139_v44, %v4085_v34  ;;  %v1030_v44 = vld [vmem:[#allocation2 + $0x181] sm:$0xff] }
 0x297   : > { %v1517_v11 = vpop.permute.xlu0 %1516 }
 0x298   : > { %1662 = vrot.lane.b32.xlu1 %v3900_v45, %s3128_s14  ;;  %v3042_v10 = vpop.f32.mrb[2].mxu1  ;;  %v2205_v2 = vsel %vm2187_vm6, %v2172_v56, %v1517_v11  ;;  %v998_v11 = vld [vmem:[#allocation2 + $0x180] sm:$0xff] }
 0x299   : > { %v2557_v0 = vadd.f32 %v3042_v10, %v4190_v9  ;;  %1790 = vrot.lane.b32.xlu0 %v4302_v37, %s3131_s8  ;;  %v2551_v48 = vpop.f32.mrb[3].mxu1  ;;  %v2171_v10 = vsel %vm2154_vm5, %v2138_v42, %v4071_v27  ;;  %v2140_v42 = vsel %vm344_vm0, %v2108_v30, %v4063_v52 }
 0x29a   : > { %v2552_v29 = vadd.f32 %v4190_v9, %v2551_v48  ;;  %v2023_v49 = vpop.permute.xlu1 %2022  ;;  %v2204_v54 = vsel %vm2187_vm6, %v2171_v10, %v1515_v63  ;;  %v4756_v63 = vld [vmem:[#allocation20_spill] sm:$0xff]  ;;  %v2141_v10 = vsel %vm344_vm0, %v2109_v60, %v4077_v7  ;;  %v2173_v41 = vsel %vm2154_vm5, %v2140_v42, %v4095_v1 }
 0x29b   : > { %v2695_v47 = vmax.f32 %v2557_v0, 0.0  ;;  %v2334_v45 = vsel %vm2319_vm10, %v2301_v55, %v2023_v49  ;;  %v2025_v8 = vpop.permute.xlu0 %2024  ;;  %v2174_v56 = vsel %vm2154_vm5, %v2141_v10, %v4109_v58  ;;  %v1062_v58 = vld [vmem:[#allocation2 + $0x182] sm:$0xff]  ;;  %v971_v42 = vld [vmem:[#allocation2 + $0x38] sm:$0xff] }
 0x29c   : > { %v2694_v6 = vmax.f32 %v2552_v29, 0.0  ;;  %v2335_v53 = vsel %vm2319_vm10, %v2302_v26, %v2025_v8  ;;  %1664 = vrot.lane.b32.xlu1 %v3930_v28, %s3128_s14  ;;  %3055 = vmatprep.mubr.msk.f32.mxu1 %vm2364_vm11, %v2334_v45 }
 0x29d   : > { %2727 = vst.msk [vmem:[%s4203_s17 + $0x28] sm:$0xff] %vm698_vm1, %v2695_v47  ;;  %1792 = vrot.lane.b32.xlu0 %v4315_v19, %s3131_s8  ;;  %3056 = vmatmul.mubr.msk.f32.gmra.mrb[12].mxu1 %vm2364_vm11, %v2335_v53 }
 0x29e   : > { %2726 = vst.msk [vmem:[%s4203_s17 + $0x20] sm:$0xff] %vm698_vm1, %v2694_v6  ;;  %v1643_v16 = vpop.permute.xlu1 %1642  ;;  %v999_v6 = vld [vmem:[#allocation2 + $0x188] sm:$0xff] }
 0x29f   : > { %v1771_v51 = vpop.permute.xlu0 %1770  ;;  %v2237_v31 = vsel %vm2220_vm8, %v2204_v54, %v1643_v16 }
 0x2a0   : > { %1410 = vrot.lane.b32.xlu1 %v4302_v37, %s3126_s12  ;;  %v2270_v34 = vsel %vm2253_vm7, %v2237_v31, %v1771_v51 }
 0x2a1   : > { %1412 = vrot.lane.b32.xlu0 %v4315_v19, %s3126_s12 }
 0x2a2   : > { %v1645_v28 = vpop.permute.xlu1 %1644 }
 0x2a3   : > { %v1899_v35 = vpop.permute.xlu0 %1898  ;;  %v2238_v43 = vsel %vm2220_vm8, %v2205_v2, %v1645_v28  ;;  %v905_v2 = vld [vmem:[#allocation2 + $0x19] sm:$0xff] }
 0x2a4   : > { %1918 = vrot.lane.b32.xlu1 %v3916_v40, %s3129_s15  ;;  %v2303_v55 = vsel %vm2286_vm9, %v2270_v34, %v1899_v35 }
 0x2a5   : > { %1920 = vrot.lane.b32.xlu0 %v4752_v17, %s3129_s15 }
 0x2a6   : > { %v1773_v33 = vpop.permute.xlu1 %1772 }
 0x2a7   : > { %v1901_v23 = vpop.permute.xlu0 %1900  ;;  %v2271_v27 = vsel %vm2253_vm7, %v2238_v43, %v1773_v33 }
 0x2a8   : > { %1538 = vrot.lane.b32.xlu1 %v3916_v40, %s3127_s13  ;;  %v4755_v40 = vld [vmem:[#allocation18_spill] sm:$0xff]  ;;  %v2304_v49 = vsel %vm2286_vm9, %v2271_v27, %v1901_v23 }
 0x2a9   : > { %1540 = vrot.lane.b32.xlu0 %v4752_v17, %s3127_s13 }
 0x2aa   : > { %v1519_v0 = vpop.permute.xlu1 %1518 }
 0x2ab   : > { %v1521_v48 = vpop.permute.xlu0 %1520  ;;  %v2206_v52 = vsel %vm2187_vm6, %v2173_v41, %v1519_v0 }
 0x2ac   : > { %2046 = vrot.lane.b32.xlu1 %v4755_v40, %s3130_s16  ;;  %v2207_v3 = vsel %vm2187_vm6, %v2174_v56, %v1521_v48 }
 0x2ad   : > { %2048 = vrot.lane.b32.xlu0 %v4756_v63, %s3130_s16 }
 0x2ae   : > { %v2027_v29 = vpop.permute.xlu1 %2026 }
 0x2af   : > { %v2336_v26 = vsel %vm2319_vm10, %v2303_v55, %v2027_v29  ;;  %v2029_v47 = vpop.permute.xlu0 %2028 }
 0x2b0   : > { %v2337_v45 = vsel %vm2319_vm10, %v2304_v49, %v2029_v47  ;;  %1666 = vrot.lane.b32.xlu1 %v4755_v40, %s3128_s14  ;;  %3058 = vmatprep.mubr.msk.f32.mxu1 %vm2364_vm11, %v2336_v26  ;;  %v906_v49 = vld [vmem:[#allocation2 + $0x21] sm:$0xff] }
 0x2b1   : > { %1794 = vrot.lane.b32.xlu0 %v998_v11, %s3131_s8  ;;  %3059 = vmatmul.mubr.msk.f32.gmra.mrb[14].mxu1 %vm2364_vm11, %v2337_v45  ;;  %v937_v45 = vld [vmem:[#allocation2 + $0x1a] sm:$0xff] }
 0x2b2   : > { %v1647_v8 = vpop.permute.xlu1 %1646 }
 0x2b3   : > { %v1775_v53 = vpop.permute.xlu0 %1774  ;;  %v2239_v61 = vsel %vm2220_vm8, %v2206_v52, %v1647_v8  ;;  %v938_v8 = vld [vmem:[#allocation2 + $0x22] sm:$0xff]  ;;  %v1002_v52 = vld [vmem:[#allocation2 + $0x31] sm:$0xff] }
 0x2b4   : > { %1668 = vrot.lane.b32.xlu1 %v4756_v63, %s3128_s14  ;;  %v2272_v0 = vsel %vm2253_vm7, %v2239_v61, %v1775_v53  ;;  %v1031_v63 = vld [vmem:[#allocation2 + $0x189] sm:$0xff] }
 0x2b5   : > { %1796 = vrot.lane.b32.xlu0 %v999_v6, %s3131_s8 }
 0x2b6   : > { %v1649_v16 = vpop.permute.xlu1 %1648 }
 0x2b7   : > { %v1903_v51 = vpop.permute.xlu0 %1902  ;;  %v2240_v1 = vsel %vm2220_vm8, %v2207_v3, %v1649_v16 }
 0x2b8   : > { %1414 = vrot.lane.b32.xlu1 %v998_v11, %s3126_s12  ;;  %v3045_v28 = vpop.f32.mrb[4].mxu1  ;;  %v2305_v43 = vsel %vm2286_vm9, %v2272_v0, %v1903_v51  ;;  %v2111_v51 = vsel %vm698_vm1, %v3795_v62, %v4093_v20  ;;  %v1003_v0 = vld [vmem:[#allocation2 + $0x39] sm:$0xff] }
 0x2b9   : > { %v2567_v35 = vadd.f32 %v3045_v28, %v4190_v9  ;;  %1416 = vrot.lane.b32.xlu0 %v999_v6, %s3126_s12  ;;  %v2561_v17 = vpop.f32.mrb[5].mxu1  ;;  %v2110_v6 = vsel %vm698_vm1, %v3765_v18, %v4079_v14 }
 0x2ba   : > { %v2562_v36 = vadd.f32 %v4190_v9, %v2561_v17  ;;  %v1777_v33 = vpop.permute.xlu1 %1776  ;;  %v2142_v16 = vsel %vm344_vm0, %v2110_v6, %v4087_v15  ;;  %v2143_v17 = vsel %vm344_vm0, %v2111_v51, %v4101_v21  ;;  %v4757_v6 = vld [vmem:[#allocation21_spill] sm:$0xff]  ;;  %v4758_v51 = vld [vmem:[#allocation28_spill] sm:$0xff] }
 0x2bb   : > { %v2697_v25 = vmax.f32 %v2567_v35, 0.0  ;;  %v1905_v23 = vpop.permute.xlu0 %1904  ;;  %v2273_v31 = vsel %vm2253_vm7, %v2240_v1, %v1777_v33  ;;  %v1063_v35 = vld [vmem:[#allocation2 + $0x18a] sm:$0xff]  ;;  %v2175_v30 = vsel %vm2154_vm5, %v2142_v16, %v4119_v32  ;;  %v2176_v18 = vsel %vm2154_vm5, %v2143_v17, %v4133_v59  ;;  %v1000_v59 = vld [vmem:[#allocation2 + $0x198] sm:$0xff] }
 0x2bc   : > { %v2696_v5 = vmax.f32 %v2562_v36, 0.0  ;;  %1922 = vrot.lane.b32.xlu1 %v1030_v44, %s3129_s15  ;;  %v2306_v27 = vsel %vm2286_vm9, %v2273_v31, %v1905_v23  ;;  %v970_v36 = vld [vmem:[#allocation2 + $0x30] sm:$0xff] }
 0x2bd   : > { %2729 = vst.msk [vmem:[%s4203_s17 + $0x38] sm:$0xff] %vm698_vm1, %v2697_v25  ;;  %1542 = vrot.lane.b32.xlu0 %v1030_v44, %s3127_s13 }
 0x2be   : > { %2728 = vst.msk [vmem:[%s4203_s17 + $0x30] sm:$0xff] %vm698_vm1, %v2696_v5  ;;  %v1523_v7 = vpop.permute.xlu1 %1522 }
 0x2bf   : > { %v1525_v54 = vpop.permute.xlu0 %1524  ;;  %v2208_v14 = vsel %vm2187_vm6, %v2175_v30, %v1523_v7  ;;  %v1001_v7 = vld [vmem:[#allocation2 + $0x1a0] sm:$0xff] }
 0x2c0   : > { %1482 = vrot.lane.b32.xlu1 %v905_v2, %s3127_s13  ;;  %v2209_v62 = vsel %vm2187_vm6, %v2176_v18, %v1525_v54 }
 0x2c1   : > { %2050 = vrot.lane.b32.xlu0 %v1062_v58, %s3130_s16 }
 0x2c2   : > { %v2031_v48 = vpop.permute.xlu1 %2030 }
 0x2c3   : > { %v2338_v40 = vsel %vm2319_vm10, %v2305_v43, %v2031_v48  ;;  %v2033_v34 = vpop.permute.xlu0 %2032  ;;  %v1032_v43 = vld [vmem:[#allocation2 + $0x199] sm:$0xff] }
 0x2c4   : > { %v2339_v55 = vsel %vm2319_vm10, %v2306_v27, %v2033_v34  ;;  %1924 = vrot.lane.b32.xlu1 %v1031_v63, %s3129_s15  ;;  %3061 = vmatprep.mubr.msk.f32.mxu1 %vm2364_vm11, %v2338_v40  ;;  %v1034_v40 = vld [vmem:[#allocation2 + $0x32] sm:$0xff]  ;;  %v1033_v34 = vld [vmem:[#allocation2 + $0x1a1] sm:$0xff] }
 0x2c5   : > { %1544 = vrot.lane.b32.xlu0 %v1031_v63, %s3127_s13  ;;  %3062 = vmatmul.mubr.msk.f32.gmra.mrb[16].mxu1 %vm2364_vm11, %v2339_v55 }
 0x2c6   : > { %v1651_v29 = vpop.permute.xlu1 %1650 }
 0x2c7   : > { %v1779_v11 = vpop.permute.xlu0 %1778  ;;  %v2241_v15 = vsel %vm2220_vm8, %v2208_v14, %v1651_v29  ;;  %v1035_v29 = vld [vmem:[#allocation2 + $0x3a] sm:$0xff] }
 0x2c8   : > { %1484 = vrot.lane.b32.xlu1 %v906_v49, %s3127_s13  ;;  %v2274_v60 = vsel %vm2253_vm7, %v2241_v15, %v1779_v11  ;;  %v1064_v11 = vld [vmem:[#allocation2 + $0x19a] sm:$0xff]  ;;  %v2112_v49 = vsel %vm698_vm1, %v3811_v22, %v4103_v38 }
 0x2c9   : > { %1670 = vrot.lane.b32.xlu0 %v1062_v58, %s3128_s14 }
 0x2ca   : > { %v1653_v26 = vpop.permute.xlu1 %1652 }
 0x2cb   : > { %v1907_v47 = vpop.permute.xlu0 %1906  ;;  %v2242_v21 = vsel %vm2220_vm8, %v2209_v62, %v1653_v26 }
 0x2cc   : > { %1610 = vrot.lane.b32.xlu1 %v937_v45, %s3128_s14  ;;  %v2307_v25 = vsel %vm2286_vm9, %v2274_v60, %v1907_v47  ;;  %v2144_v47 = vsel %vm344_vm0, %v2112_v49, %v4111_v24  ;;  %v2113_v45 = vsel %vm698_vm1, %v3831_v13, %v4117_v57 }
 0x2cd   : > { %1612 = vrot.lane.b32.xlu0 %v938_v8, %s3128_s14  ;;  %v2177_v16 = vsel %vm2154_vm5, %v2144_v47, %v4143_v46 }
 0x2ce   : > { %v1781_v53 = vpop.permute.xlu1 %1780 }
 0x2cf   : > { %v1909_v28 = vpop.permute.xlu0 %1908  ;;  %v2275_v32 = vsel %vm2253_vm7, %v2242_v21, %v1781_v53  ;;  %v2145_v53 = vsel %vm344_vm0, %v2113_v45, %v4757_v6 }
 0x2d0   : > { %2052 = vrot.lane.b32.xlu1 %v1063_v35, %s3130_s16  ;;  %v2308_v44 = vsel %vm2286_vm9, %v2275_v32, %v1909_v28  ;;  %v2178_v22 = vsel %vm2154_vm5, %v2145_v53, %v4758_v51  ;;  %v1065_v28 = vld [vmem:[#allocation2 + $0x1a2] sm:$0xff] }
 0x2d1   : > { %1738 = vrot.lane.b32.xlu0 %v970_v36, %s3131_s8 }
 0x2d2   : > { %v1527_v20 = vpop.permute.xlu1 %1526 }
 0x2d3   : > { %v1529_v33 = vpop.permute.xlu0 %1528  ;;  %v2210_v38 = vsel %vm2187_vm6, %v2177_v16, %v1527_v20 }
 0x2d4   : > { %1672 = vrot.lane.b32.xlu1 %v1063_v35, %s3128_s14  ;;  %v2211_v24 = vsel %vm2187_vm6, %v2178_v22, %v1529_v33 }
 0x2d5   : > { %1740 = vrot.lane.b32.xlu0 %v971_v42, %s3131_s8 }
 0x2d6   : > { %v2035_v23 = vpop.permute.xlu1 %2034 }
 0x2d7   : > { %v2340_v10 = vsel %vm2319_vm10, %v2307_v25, %v2035_v23  ;;  %v2037_v41 = vpop.permute.xlu0 %2036 }
 0x2d8   : > { %v2341_v5 = vsel %vm2319_vm10, %v2308_v44, %v2037_v41  ;;  %1798 = vrot.lane.b32.xlu1 %v1000_v59, %s3131_s8  ;;  %v3048_v56 = vpop.f32.mrb[6].mxu1  ;;  %3064 = vmatprep.mubr.msk.f32.mxu1 %vm2364_vm11, %v2340_v10 }
 0x2d9   : > { %v2577_v3 = vadd.f32 %v3048_v56, %v4190_v9  ;;  %1866 = vrot.lane.b32.xlu0 %v1002_v52, %s3129_s15  ;;  %v2571_v61 = vpop.f32.mrb[7].mxu1  ;;  %3065 = vmatmul.mubr.msk.f32.gmra.mrb[18].mxu1 %vm2364_vm11, %v2341_v5  ;;  %v4759_v56 = vld [vmem:[#allocation22_spill] sm:$0xff]  ;;  %v4760_v52 = vld [vmem:[#allocation15_spill] sm:$0xff] }
 0x2da   : > { %v2572_v1 = vadd.f32 %v4190_v9, %v2571_v61  ;;  %v1655_v54 = vpop.permute.xlu1 %1654 }
 0x2db   : > { %v2699_v2 = vmax.f32 %v2577_v3, 0.0  ;;  %v1783_v31 = vpop.permute.xlu0 %1782  ;;  %v2243_v35 = vsel %vm2220_vm8, %v2210_v38, %v1655_v54  ;;  %v2114_v3 = vsel %vm698_vm1, %v4760_v52, %v4759_v56  ;;  %v4762_v54 = vld [vmem:[#allocation24_spill] sm:$0xff] }
 0x2dc   : > { %v2698_v58 = vmax.f32 %v2572_v1, 0.0  ;;  %1800 = vrot.lane.b32.xlu1 %v1001_v7, %s3131_s8  ;;  %v2276_v46 = vsel %vm2253_vm7, %v2243_v35, %v1783_v31  ;;  %v4761_v7 = vld [vmem:[#allocation23_spill] sm:$0xff] }
 0x2dd   : > { %2731 = vst.msk [vmem:[%s4203_s17 + $0x48] sm:$0xff] %vm698_vm1, %v2699_v2  ;;  %1868 = vrot.lane.b32.xlu0 %v1003_v0, %s3129_s15  ;;  %v2146_v1 = vsel %vm344_vm0, %v2114_v3, %v4761_v7  ;;  %v4763_v2 = vld [vmem:[#allocation17_spill] sm:$0xff] }
 0x2de   : > { %2730 = vst.msk [vmem:[%s4203_s17 + $0x40] sm:$0xff] %vm698_vm1, %v2698_v58  ;;  %v1657_v48 = vpop.permute.xlu1 %1656  ;;  %v2115_v31 = vsel %vm698_vm1, %v4763_v2, %v4762_v54  ;;  %v4764_v0 = vld [vmem:[#allocation25_spill] sm:$0xff] }
 0x2df   : > { %v1785_v27 = vpop.permute.xlu0 %1784  ;;  %v2244_v57 = vsel %vm2220_vm8, %v2211_v24, %v1657_v48 }
 0x2e0   : > { %1926 = vrot.lane.b32.xlu1 %v1032_v43, %s3129_s15  ;;  %v2277_v30 = vsel %vm2253_vm7, %v2244_v57, %v1785_v27  ;;  %v2147_v43 = vsel %vm344_vm0, %v2115_v31, %v4764_v0  ;;  %v4766_v57 = vld [vmem:[#allocation27_spill] sm:$0xff]  ;;  %v4771_v0 = vld [vmem:[#allocation32_spill] sm:$0xff] }
 0x2e1   : > { %1994 = vrot.lane.b32.xlu0 %v1034_v40, %s3130_s16 }
 0x2e2   : > { %v1403_v63 = vpop.permute.xlu1 %1402 }
 0x2e3   : > { %v1405_v55 = vpop.permute.xlu0 %1404  ;;  %v2179_v48 = vsel %vm2154_vm5, %v2146_v1, %v1403_v63 }
 0x2e4   : > { %1928 = vrot.lane.b32.xlu1 %v1033_v34, %s3129_s15  ;;  %v2180_v27 = vsel %vm2154_vm5, %v2147_v43, %v1405_v55  ;;  %v2118_v43 = vsel %vm698_vm1, %v4230_v4, %v4771_v0 }
 0x2e5   : > { %1996 = vrot.lane.b32.xlu0 %v1035_v29, %s3130_s16 }
 0x2e6   : > { %v1911_v26 = vpop.permute.xlu1 %1910 }
 0x2e7   : > { %v1913_v8 = vpop.permute.xlu0 %1912  ;;  %v2309_v36 = vsel %vm2286_vm9, %v2276_v46, %v1911_v26 }
 0x2e8   : > { %2054 = vrot.lane.b32.xlu1 %v1064_v11, %s3130_s16  ;;  %v2310_v14 = vsel %vm2286_vm9, %v2277_v30, %v1913_v8  ;;  %v4767_v30 = vld [vmem:[#allocation29_spill] sm:$0xff] }
 0x2ea   : > { %v1531_v13 = vpop.permute.xlu1 %1530 }
 0x2eb   : > { %v1533_v17 = vpop.permute.xlu0 %1532  ;;  %v2212_v40 = vsel %vm2187_vm6, %v2179_v48, %v1531_v13  ;;  %v4765_v13 = vld [vmem:[#allocation26_spill] sm:$0xff] }
 0x2ec   : > { %2056 = vrot.lane.b32.xlu1 %v1065_v28, %s3130_s16  ;;  %v2213_v34 = vsel %vm2187_vm6, %v2180_v27, %v1533_v17  ;;  %v2116_v17 = vsel %vm698_vm1, %v4766_v57, %v4765_v13  ;;  %v4772_v27 = vld [vmem:[#allocation34_spill] sm:$0xff] }
 0x2ee   : > { %v2039_v18 = vpop.permute.xlu1 %2038 }
 0x2ef   : > { %v2342_v62 = vsel %vm2319_vm10, %v2309_v36, %v2039_v18  ;;  %v2041_v15 = vpop.permute.xlu0 %2040  ;;  %v2148_v36 = vsel %vm344_vm0, %v2116_v17, %v4767_v30  ;;  %v4768_v18 = vld [vmem:[#allocation31_spill] sm:$0xff] }
 0x2f0   : > { %v2343_v20 = vsel %vm2319_vm10, %v2310_v14, %v2041_v15  ;;  %3067 = vmatprep.mubr.msk.f32.mxu1 %vm2364_vm11, %v2342_v62  ;;  %v4769_v14 = vld [vmem:[#allocation30_spill] sm:$0xff] }
 0x2f1   : > { %3068 = vmatmul.mubr.msk.f32.gmra.mrb[20].mxu1 %vm2364_vm11, %v2343_v20  ;;  %v2117_v62 = vsel %vm698_vm1, %v4769_v14, %v4768_v18  ;;  %v4770_v20 = vld [vmem:[#allocation33_spill] sm:$0xff] }
 0x2f2   : > { %v1659_v21 = vpop.permute.xlu1 %1658 }
 0x2f3   : > { %v1787_v33 = vpop.permute.xlu0 %1786  ;;  %v2245_v29 = vsel %vm2220_vm8, %v2212_v40, %v1659_v21  ;;  %v2149_v21 = vsel %vm344_vm0, %v2117_v62, %v4770_v20  ;;  %v2150_v40 = vsel %vm344_vm0, %v2118_v43, %v4772_v27  ;;  %v777_v20 = vld [vmem:[#allocation2] sm:$0xff]  ;;  %v4781_v43 = vld [vmem:[#allocation36_spill] sm:$0xff] }
 0x2f4   : > { %v2278_v47 = vsel %vm2253_vm7, %v2245_v29, %v1787_v33  ;;  %v2120_v27 = vsel %vm698_vm1, %v4302_v37, %v4781_v43 }
 0x2f6   : > { %v1661_v32 = vpop.permute.xlu1 %1660 }
 0x2f7   : > { %v1789_v42 = vpop.permute.xlu0 %1788  ;;  %v2246_v49 = vsel %vm2220_vm8, %v2213_v34, %v1661_v32 }
 0x2f8   : > { %v3051_v60 = vpop.f32.mrb[8].mxu1  ;;  %v2279_v45 = vsel %vm2253_vm7, %v2246_v49, %v1789_v42 }
 0x2f9   : > { %v2587_v59 = vadd.f32 %v3051_v60, %v4190_v9  ;;  %v2581_v25 = vpop.f32.mrb[9].mxu1 }
 0x2fa   : > { %v2582_v23 = vadd.f32 %v4190_v9, %v2581_v25  ;;  %v1407_v44 = vpop.permute.xlu1 %1406 }
 0x2fb   : > { %v2701_v10 = vmax.f32 %v2587_v59, 0.0  ;;  %v1409_v41 = vpop.permute.xlu0 %1408  ;;  %v2181_v33 = vsel %vm2154_vm5, %v2148_v36, %v1407_v44 }
 0x2fc   : > { %v2700_v5 = vmax.f32 %v2582_v23, 0.0  ;;  %v2182_v32 = vsel %vm2154_vm5, %v2149_v21, %v1409_v41  ;;  %v4775_v21 = vld [vmem:[#allocation3_spill] sm:$0xff] }
 0x2fd   : > { %2733 = vst.msk [vmem:[%s4203_s17 + $0x58] sm:$0xff] %vm698_vm1, %v2701_v10 }
 0x2fe   : > { %2732 = vst.msk [vmem:[%s4203_s17 + $0x50] sm:$0xff] %vm698_vm1, %v2700_v5  ;;  %v1915_v61 = vpop.permute.xlu1 %1914 }
 0x2ff   : > { %v1917_v58 = vpop.permute.xlu0 %1916  ;;  %v2311_v8 = vsel %vm2286_vm9, %v2278_v47, %v1915_v61 }
 0x300   : > { %v2312_v63 = vsel %vm2286_vm9, %v2279_v45, %v1917_v58 }
 0x302   : > { %v1535_v11 = vpop.permute.xlu1 %1534 }
 0x303   : > { %v1537_v26 = vpop.permute.xlu0 %1536  ;;  %v2214_v42 = vsel %vm2187_vm6, %v2181_v33, %v1535_v11  ;;  %v2090_v33 = vsel %vm698_vm1, %v777_v20, %v4775_v21 }
 0x304   : > { %v2215_v60 = vsel %vm2187_vm6, %v2182_v32, %v1537_v26 }
 0x306   : > { %v2043_v6 = vpop.permute.xlu1 %2042 }
 0x307   : > { %v2344_v55 = vsel %vm2319_vm10, %v2311_v8, %v2043_v6  ;;  %v2045_v53 = vpop.permute.xlu0 %2044 }
 0x308   : > { %v2345_v16 = vsel %vm2319_vm10, %v2312_v63, %v2045_v53  ;;  %3070 = vmatprep.mubr.msk.f32.mxu1 %vm2364_vm11, %v2344_v55  ;;  %v4773_v53 = vld [vmem:[#allocation35_spill] sm:$0xff] }
 0x309   : > { %3071 = vmatmul.mubr.msk.f32.gmra.mrb[22].mxu1 %vm2364_vm11, %v2345_v16  ;;  %v2119_v16 = vsel %vm698_vm1, %v4248_v39, %v4773_v53 }
 0x30a   : > { %v1663_v51 = vpop.permute.xlu1 %1662 }
 0x30b   : > { %v1791_v22 = vpop.permute.xlu0 %1790  ;;  %v2247_v59 = vsel %vm2220_vm8, %v2214_v42, %v1663_v51  ;;  %v778_v42 = vld [vmem:[#allocation2 + $0x8] sm:$0xff] }
 0x30c   : > { %v2280_v5 = vsel %vm2253_vm7, %v2247_v59, %v1791_v22  ;;  %v4774_v22 = vld [vmem:[#allocation37_spill] sm:$0xff] }
 0x30e   : > { %v1665_v38 = vpop.permute.xlu1 %1664 }
 0x30f   : > { %v1793_v28 = vpop.permute.xlu0 %1792  ;;  %v2248_v23 = vsel %vm2220_vm8, %v2215_v60, %v1665_v38  ;;  %v2151_v38 = vsel %vm344_vm0, %v2119_v16, %v4774_v22  ;;  %v4776_v60 = vld [vmem:[#allocation6_spill] sm:$0xff] }
 0x310   : > { %v2281_v56 = vsel %vm2253_vm7, %v2248_v23, %v1793_v28  ;;  %v2122_v59 = vsel %vm344_vm0, %v2090_v33, %v4776_v60  ;;  %v4777_v23 = vld [vmem:[#allocation4_spill] sm:$0xff] }
 0x312   : > { %v1411_v24 = vpop.permute.xlu1 %1410 }
 0x313   : > { %v1413_v35 = vpop.permute.xlu0 %1412  ;;  %v2183_v34 = vsel %vm2154_vm5, %v2150_v40, %v1411_v24 }
 0x314   : > { %v2184_v24 = vsel %vm2154_vm5, %v2151_v38, %v1413_v35 }
 0x316   : > { %v1919_v46 = vpop.permute.xlu1 %1918 }
 0x317   : > { %v1921_v15 = vpop.permute.xlu0 %1920  ;;  %v2313_v52 = vsel %vm2286_vm9, %v2280_v5, %v1919_v46  ;;  %v4778_v5 = vld [vmem:[#allocation7_spill] sm:$0xff] }
 0x318   : > { %v2314_v44 = vsel %vm2286_vm9, %v2281_v56, %v1921_v15  ;;  %v2155_v56 = vsel %vm2154_vm5, %v2122_v59, %v4778_v5 }
 0x31a   : > { %v1539_v25 = vpop.permute.xlu1 %1538 }
 0x31b   : > { %v1541_v10 = vpop.permute.xlu0 %1540  ;;  %v2216_v29 = vsel %vm2187_vm6, %v2183_v34, %v1539_v25 }
 0x31c   : > { %v2217_v13 = vsel %vm2187_vm6, %v2184_v24, %v1541_v10  ;;  %v2091_v10 = vsel %vm698_vm1, %v778_v42, %v4777_v23 }
 0x31e   : > { %v2047_v3 = vpop.permute.xlu1 %2046 }
 0x31f   : > { %v2346_v41 = vsel %vm2319_vm10, %v2313_v52, %v2047_v3  ;;  %v2049_v61 = vpop.permute.xlu0 %2048 }
 0x320   : > { %v2347_v7 = vsel %vm2319_vm10, %v2314_v44, %v2049_v61  ;;  %3073 = vmatprep.mubr.msk.f32.mxu1 %vm2364_vm11, %v2346_v41  ;;  %v4779_v41 = vld [vmem:[#allocation5_spill] sm:$0xff] }
 0x321   : > { %3074 = vmatmul.mubr.msk.f32.gmra.mrb[24].mxu1 %vm2364_vm11, %v2347_v7  ;;  %v2123_v61 = vsel %vm344_vm0, %v2091_v10, %v4779_v41 }
 0x322   : > { %v1667_v1 = vpop.permute.xlu1 %1666 }
 0x323   : > { %v1795_v54 = vpop.permute.xlu0 %1794  ;;  %v2249_v49 = vsel %vm2220_vm8, %v2216_v29, %v1667_v1  ;;  %v4782_v29 = vld [vmem:[#allocation38_spill] sm:$0xff] }
 0x324   : > { %v2282_v47 = vsel %vm2253_vm7, %v2249_v49, %v1795_v54  ;;  %v4780_v54 = vld [vmem:[#allocation8_spill] sm:$0xff] }
 0x326   : > { %v1669_v2 = vpop.permute.xlu1 %1668 }
 0x327   : > { %v1797_v31 = vpop.permute.xlu0 %1796  ;;  %v2250_v57 = vsel %vm2220_vm8, %v2217_v13, %v1669_v2  ;;  %v2156_v2 = vsel %vm2154_vm5, %v2123_v61, %v4780_v54 }
 0x328   : > { %v2283_v30 = vsel %vm2253_vm7, %v2250_v57, %v1797_v31 }
 0x32a   : > { %v1415_v58 = vpop.permute.xlu1 %1414 }
 0x32b   : > { %v4549_v48 = vpop.permute.xlu0 %1416 }
 0x32e   : > { %v1923_v11 = vpop.permute.xlu1 %1922 }
 0x32f   : > { %v1543_v26 = vpop.permute.xlu0 %1542  ;;  %v2315_v8 = vsel %vm2286_vm9, %v2282_v47, %v1923_v11  ;;  %v2152_v11 = vsel %vm344_vm0, %v2120_v27, %v4782_v29 }
 0x330   : > { %v2185_v47 = vsel %vm2154_vm5, %v2152_v11, %v1415_v58 }
 0x332   : > { %v1483_v45 = vpop.permute.xlu1 %1482 }
 0x333   : > { %v2051_v6 = vpop.permute.xlu0 %2050  ;;  %v2188_v3 = vsel %vm2187_vm6, %v2155_v56, %v1483_v45 }
 0x334   : > { %v2348_v4 = vsel %vm2319_vm10, %v2315_v8, %v2051_v6  ;;  %v2218_v6 = vsel %vm2187_vm6, %v2185_v47, %v1543_v26 }
 0x335   : > { %3076 = vmatprep.mubr.msk.f32.mxu1 %vm2364_vm11, %v2348_v4 }
 0x336   : > { %v1925_v63 = vpop.permute.xlu1 %1924 }
 0x337   : > { %v1545_v55 = vpop.permute.xlu0 %1544  ;;  %v2316_v36 = vsel %vm2286_vm9, %v2283_v30, %v1925_v63  ;;  %v2121_v63 = vsel %vm698_vm1, %v4315_v19, %v4223_v50 }
 0x33a   : > { %v1485_v51 = vpop.permute.xlu1 %1484 }
 0x33b   : > { %v1671_v28 = vpop.permute.xlu0 %1670  ;;  %v2189_v40 = vsel %vm2187_vm6, %v2156_v2, %v1485_v51  ;;  %v2153_v51 = vsel %vm344_vm0, %v2121_v63, %v4242_v12 }
 0x33c   : > { %v2251_v53 = vsel %vm2220_vm8, %v2218_v6, %v1671_v28  ;;  %v2186_v26 = vsel %vm2154_vm5, %v2153_v51, %v4549_v48 }
 0x33d   : > { %v2219_v50 = vsel %vm2187_vm6, %v2186_v26, %v1545_v55 }
 0x33e   : > { %v1611_v17 = vpop.permute.xlu1 %1610 }
 0x33f   : > { %v1613_v46 = vpop.permute.xlu0 %1612  ;;  %v2221_v44 = vsel %vm2220_vm8, %v2188_v3, %v1611_v17 }
 0x340   : > { %v2222_v49 = vsel %vm2220_vm8, %v2189_v40, %v1613_v46 }
 0x342   : > { %v2053_v18 = vpop.permute.xlu1 %2052 }
 0x343   : > { %v2349_v39 = vsel %vm2319_vm10, %v2316_v36, %v2053_v18  ;;  %v1739_v14 = vpop.permute.xlu0 %1738 }
 0x344   : > { %3077 = vmatmul.mubr.msk.f32.gmra.mrb[26].mxu1 %vm2364_vm11, %v2349_v39  ;;  %v2254_v7 = vsel %vm2253_vm7, %v2221_v44, %v1739_v14 }
 0x346   : > { %v1673_v62 = vpop.permute.xlu1 %1672 }
 0x347   : > { %v1741_v15 = vpop.permute.xlu0 %1740  ;;  %v2252_v28 = vsel %vm2220_vm8, %v2219_v50, %v1673_v62 }
 0x348   : > { %v2255_v45 = vsel %vm2253_vm7, %v2222_v49, %v1741_v15 }
 0x34a   : > { %v1799_v35 = vpop.permute.xlu1 %1798 }
 0x34b   : > { %v1867_v32 = vpop.permute.xlu0 %1866  ;;  %v2284_v58 = vsel %vm2253_vm7, %v2251_v53, %v1799_v35 }
 0x34c   : > { %v2287_v31 = vsel %vm2286_vm9, %v2254_v7, %v1867_v32 }
 0x34e   : > { %v1801_v25 = vpop.permute.xlu1 %1800 }
 0x34f   : > { %v1869_v52 = vpop.permute.xlu0 %1868  ;;  %v2285_v12 = vsel %vm2253_vm7, %v2252_v28, %v1801_v25 }
 0x350   : > { %v2288_v37 = vsel %vm2286_vm9, %v2255_v45, %v1869_v52 }
 0x352   : > { %v1927_v1 = vpop.permute.xlu1 %1926 }
 0x353   : > { %v1995_v0 = vpop.permute.xlu0 %1994  ;;  %v2317_v22 = vsel %vm2286_vm9, %v2284_v58, %v1927_v1 }
 0x354   : > { %v2320_v34 = vsel %vm2319_vm10, %v2287_v31, %v1995_v0 }
 0x355   : > { %3034 = vmatprep.mubr.msk.f32.mxu0 %vm2364_vm11, %v2320_v34 }
 0x356   : > { %v1929_v8 = vpop.permute.xlu1 %1928 }
 0x357   : > { %v1997_v4 = vpop.permute.xlu0 %1996  ;;  %v2318_v48 = vsel %vm2286_vm9, %v2285_v12, %v1929_v8 }
 0x358   : > { %v2321_v16 = vsel %vm2319_vm10, %v2288_v37, %v1997_v4 }
 0x359   : > { %3035 = vmatmul.mubr.msk.f32.vlgmr.msra.gmra.mrb[32].mxu0 %vm2364_vm11, %v2321_v16 }
 0x35a   : > { %v2055_v38 = vpop.permute.xlu1 %2054 }
 0x35b   : > { %v2350_v19 = vsel %vm2319_vm10, %v2317_v22, %v2055_v38  ;;  %v3114_v38 = vld [vmem:[%s4694_s5] ss:$0 sm:$0xff] }
 0x35c   : > { %v3054_v24 = vpop.f32.mrb[10].mxu1  ;;  %3079 = vmatprep.mubr.msk.f32.mxu1 %vm2364_vm11, %v2350_v19 }
 0x35d   : > { %v2597_v13 = vadd.f32 %v3054_v24, %v4190_v9  ;;  %v2591_v57 = vpop.f32.mrb[11].mxu1 }
 0x35e   : > { %v2592_v17 = vadd.f32 %v4190_v9, %v2591_v57  ;;  %v2057_v55 = vpop.permute.xlu1 %2056 }
 0x35f   : > { %v2703_v46 = vmax.f32 %v2597_v13, 0.0  ;;  %v2351_v30 = vsel %vm2319_vm10, %v2318_v48, %v2057_v55 }
 0x360   : > { %v2702_v36 = vmax.f32 %v2592_v17, 0.0  ;;  %3080 = vmatmul.mubr.msk.f32.gmra.mrb[28].mxu1 %vm2364_vm11, %v2351_v30 }
 0x361   : > { %2735 = vst.msk [vmem:[%s4203_s17 + $0x68] sm:$0xff] %vm698_vm1, %v2703_v46 }
 0x362   : > { %2734 = vst.msk [vmem:[%s4203_s17 + $0x60] sm:$0xff] %vm698_vm1, %v2702_v36 }
 0x370   : > { %v3057_v18 = vpop.f32.mrb[12].mxu1 }
 0x371   : > { %v2607_v39 = vadd.f32 %v3057_v18, %v4190_v9  ;;  %v2601_v14 = vpop.f32.mrb[13].mxu1 }
 0x372   : > { %v2602_v62 = vadd.f32 %v4190_v9, %v2601_v14 }
 0x373   : > { %v2705_v15 = vmax.f32 %v2607_v39, 0.0 }
 0x374   : > { %v2704_v20 = vmax.f32 %v2602_v62, 0.0 }
 0x375   : > { %2737 = vst.msk [vmem:[%s4203_s17 + $0x78] sm:$0xff] %vm698_vm1, %v2705_v15 }
 0x376   : > { %2736 = vst.msk [vmem:[%s4203_s17 + $0x70] sm:$0xff] %vm698_vm1, %v2704_v20 }
 0x384   : > { %v3060_v35 = vpop.f32.mrb[14].mxu1 }
 0x385   : > { %v2617_v21 = vadd.f32 %v3060_v35, %v4190_v9  ;;  %v2611_v33 = vpop.f32.mrb[15].mxu1 }
 0x386   : > { %v2612_v32 = vadd.f32 %v4190_v9, %v2611_v33 }
 0x387   : > { %v2707_v42 = vmax.f32 %v2617_v21, 0.0 }
 0x388   : > { %v2706_v60 = vmax.f32 %v2612_v32, 0.0 }
 0x389   : > { %2739 = vst.msk [vmem:[%s4203_s17 + $0x88] sm:$0xff] %vm698_vm1, %v2707_v42 }
 0x38a   : > { %2738 = vst.msk [vmem:[%s4203_s17 + $0x80] sm:$0xff] %vm698_vm1, %v2706_v60 }
 0x398   : > { %v3063_v59 = vpop.f32.mrb[16].mxu1 }
 0x399   : > { %v2627_v25 = vadd.f32 %v3063_v59, %v4190_v9  ;;  %v2621_v23 = vpop.f32.mrb[17].mxu1 }
 0x39a   : > { %v2622_v10 = vadd.f32 %v4190_v9, %v2621_v23 }
 0x39b   : > { %v2709_v5 = vmax.f32 %v2627_v25, 0.0 }
 0x39c   : > { %v2708_v56 = vmax.f32 %v2622_v10, 0.0 }
 0x39d   : > { %2741 = vst.msk [vmem:[%s4203_s17 + $0x98] sm:$0xff] %vm698_vm1, %v2709_v5 }
 0x39e   : > { %2740 = vst.msk [vmem:[%s4203_s17 + $0x90] sm:$0xff] %vm698_vm1, %v2708_v56 }
 0x3ac   : > { %v3066_v52 = vpop.f32.mrb[18].mxu1 }
 0x3ad   : > { %v2637_v3 = vadd.f32 %v3066_v52, %v4190_v9  ;;  %v2631_v44 = vpop.f32.mrb[19].mxu1 }
 0x3ae   : > { %v2632_v41 = vadd.f32 %v4190_v9, %v2631_v44 }
 0x3af   : > { %v2711_v61 = vmax.f32 %v2637_v3, 0.0 }
 0x3b0   : > { %v2710_v7 = vmax.f32 %v2632_v41, 0.0 }
 0x3b1   : > { %2743 = vst.msk [vmem:[%s4203_s17 + $0xa8] sm:$0xff] %vm698_vm1, %v2711_v61 }
 0x3b2   : > { %2742 = vst.msk [vmem:[%s4203_s17 + $0xa0] sm:$0xff] %vm698_vm1, %v2710_v7 }
 0x3c4   : > { %v3069_v1 = vpop.f32.mrb[20].mxu1 }
 0x3c5   : > { %v2647_v54 = vadd.f32 %v3069_v1, %v4190_v9  ;;  %v2641_v2 = vpop.f32.mrb[21].mxu1 }
 0x3c6   : > { %v2642_v31 = vadd.f32 %v4190_v9, %v2641_v2 }
 0x3c7   : > { %v2713_v0 = vmax.f32 %v2647_v54, 0.0 }
 0x3c8   : > { %v2712_v43 = vmax.f32 %v2642_v31, 0.0 }
 0x3c9   : > { %2745 = vst.msk [vmem:[%s4203_s17 + $0xb8] sm:$0xff] %vm698_vm1, %v2713_v0 }
 0x3ca   : > { %2744 = vst.msk [vmem:[%s4203_s17 + $0xb0] sm:$0xff] %vm698_vm1, %v2712_v43 }
 0x3dc   : > { %v3072_v27 = vpop.f32.mrb[22].mxu1 }
 0x3dd   : > { %v2657_v40 = vadd.f32 %v3072_v27, %v4190_v9  ;;  %v2651_v34 = vpop.f32.mrb[23].mxu1 }
 0x3de   : > { %v2652_v29 = vadd.f32 %v4190_v9, %v2651_v34 }
 0x3df   : > { %v2715_v11 = vmax.f32 %v2657_v40, 0.0 }
 0x3e0   : > { %v2714_v49 = vmax.f32 %v2652_v29, 0.0 }
 0x3e1   : > { %2747 = vst.msk [vmem:[%s4203_s17 + $0xc8] sm:$0xff] %vm698_vm1, %v2715_v11 }
 0x3e2   : > { %2746 = vst.msk [vmem:[%s4203_s17 + $0xc0] sm:$0xff] %vm698_vm1, %v2714_v49 }
 0x3f4   : > { %v3075_v47 = vpop.f32.mrb[24].mxu1 }
 0x3f5   : > { %v2667_v45 = vadd.f32 %v3075_v47, %v4190_v9  ;;  %v2661_v8 = vpop.f32.mrb[25].mxu1 }
 0x3f6   : > { %v2662_v6 = vadd.f32 %v4190_v9, %v2661_v8 }
 0x3f7   : > { %v2717_v37 = vmax.f32 %v2667_v45, 0.0 }
 0x3f8   : > { %v2716_v4 = vmax.f32 %v2662_v6, 0.0 }
 0x3f9   : > { %2749 = vst.msk [vmem:[%s4203_s17 + $0xd8] sm:$0xff] %vm698_vm1, %v2717_v37 }
 0x3fa   : > { %2748 = vst.msk [vmem:[%s4203_s17 + $0xd0] sm:$0xff] %vm698_vm1, %v2716_v4 }
 0x417   : > { %v3078_v63 = vpop.f32.mrb[26].mxu1 }
 0x418   : > { %v2677_v53 = vadd.f32 %v3078_v63, %v4190_v9  ;;  %v2671_v16 = vpop.f32.mrb[27].mxu1 }
 0x419   : > { %v2672_v51 = vadd.f32 %v4190_v9, %v2671_v16 }
 0x41a   : > { %v2719_v58 = vmax.f32 %v2677_v53, 0.0 }
 0x41b   : > { %v2718_v26 = vmax.f32 %v2672_v51, 0.0 }
 0x41c   : > { %2751 = vst.msk [vmem:[%s4203_s17 + $0xe8] sm:$0xff] %vm698_vm1, %v2719_v58 }
 0x41d   : > { %2750 = vst.msk [vmem:[%s4203_s17 + $0xe0] sm:$0xff] %vm698_vm1, %v2718_v26 }
 0x42c   : > { %v3036_v22 = vpop.f32.mrb[32].mxu0 }
 0x42d   : > { %v2537_v50 = vadd.f32 %v3114_v38, %v3036_v22  ;;  %v2531_v19 = vpop.f32.mrb[33].mxu0 }
 0x42e   : > { %v2532_v28 = vadd.f32 %v3114_v38, %v2531_v19 }
 0x42f   : > { %v2691_v24 = vmax.f32 %v2537_v50, 0.0 }
 0x430   : > { %v2690_v12 = vmax.f32 %v2532_v28, 0.0 }
 0x431   : > { %2723 = vst.msk [vmem:[%s4203_s17 + $0x8] sm:$0xff] %vm698_vm1, %v2691_v24 }
 0x432   : > { %2722 = vst.msk [vmem:[%s4203_s17] sm:$0xff] %vm698_vm1, %v2690_v12 }
 0x433   : > { %v3081_v9 = vpop.f32.mrb[28].mxu1 }
 0x434   : > { %v2687_v13 = vadd.f32 %v3114_v38, %v3081_v9  ;;  %v2681_v57 = vpop.f32.mrb[29].mxu1 }
 0x435   : > { %v2682_v48 = vadd.f32 %v3114_v38, %v2681_v57 }
 0x436   : > { %v2721_v17 = vmax.f32 %v2687_v13, 0.0 }
 0x437   : > { %v2720_v55 = vmax.f32 %v2682_v48, 0.0 }
 0x438   : > { %2753 = vst.msk [vmem:[%s4203_s17 + $0xf8] sm:$0xff] %vm698_vm1, %v2721_v17 }
 0x439   : > { %2752 = vst.msk [vmem:[%s4203_s17 + $0xf0] sm:$0xff] %vm698_vm1, %v2720_v55 }
 0x43a PF: > { %s16_s21 = sadd.s32 1, %s3121_s21  }
 0x43b   : > { %p13_p4 = scmp.ge.s32.totalorder %s16_s21, 4  }
 0x43d   :  { %15 = sbr.rel (!%p13_p4) target bundleno = 1 (0x1), region = 80 }

// kernel: tpu_custom_call.1
= control target key start
LH: loop header
LB: loop body
LE: loop exit
PB: predicated region body
PF: predicated region fallthrough
CT: control target
= control target key end

     0   :  { %s5872_s21 = smov 0   ;;  %s7057_s0 = inlined_call_operand.vmem [shape: f32[2,16,16,4], index: 0, kind: input, shape index: {}]   ;;  %s7058_s1 = inlined_call_operand.vmem [shape: f32[2,16,16,8], index: 1, kind: input, shape index: {}]   ;;  %s7059_s2 = inlined_call_operand.vmem [shape: f32[8,4], index: 2, kind: input, shape index: {}]   ;;  %s7060_s3 = inlined_call_operand.vmem [shape: f32[1,4], index: 3, kind: input, shape index: {}]   ;;  %s7061_s4 = inlined_call_operand.vmem [shape: f32[36,4], index: 4, kind: input, shape index: {}]   ;;  %s7062_s5 = inlined_call_operand.vmem [shape: f32[1,4], index: 5, kind: input, shape index: {}]   ;;  %s7063_s6 = inlined_call_operand.vmem [shape: f32[2,16,16,4], index: 6, kind: output, shape index: {}]  }
   0x1 LB: > { %s4386_s22 = sadd.s32 4294967295, %s5834_s21   ;;  %p4390_p0 = scmp.ge.s32.totalorder %s5834_s21, 1  ;;  %s5834_s21 = sphi %s5872_s21, %s16_s21  }
   0x2   : > { %p222_p1 = scmp.lt.s32.totalorder %s5834_s21, 3 }
   0x4   : > { %p223_p2 = pnand %p4390_p0, %p222_p1 }
   0x6   : > { %226 = sbr.rel (%p223_p2) target bundleno = 782 (0x30e), region = 44 }
   0xd   : > { %v336_v0 = vld [vmem:[%s7059_s2] sm:$0xff]  ;;  %p257_p3 = scmp.lt.s32.totalorder %s4386_s22, 1  ;;  %vm344_vm0 = vcmask 64512   ;;  %vm698_vm1 = vcmask 31744   ;;  %v5836_v33 = vmov 0.0   ;;  %vm701_vm2 = vcmask 25600  }
   0xe   : > { %5063 = vmatprep.subr.mxu0 %v336_v0  ;;  %699 = vst.msk [vmem:[#allocation2] sm:$0xff] %vm698_vm1, %v5836_v33  ;;  %700 = vst.msk [vmem:[#allocation2 + $0x8] sm:$0xff] %vm698_vm1, %v5836_v33  ;;  %vm707_vm3 = vcmask 24576   ;;  %v1067_v34 = vld [vmem:[%s7061_s4 + $0x4] sm:$0xf]  ;;  %vm1164_vm4 = vcmask 1043456  }
   0xf   : > { %5064 = vmatpush3.msra.mxu0 %v336_v0  ;;  %s7146_s22 = smov (!%p257_p3, %s4386_s22), 1  ;;  %704 = vst.msk [vmem:[#allocation2 + $0x198] sm:$0xff] %vm698_vm1, %v5836_v33  ;;  %705 = vst.msk [vmem:[#allocation2 + $0x1a0] sm:$0xff] %vm698_vm1, %v5836_v33  ;;  %v2431_v37 = vld [vmem:[%s7061_s4 + $0x10] sm:$0xf] }
  0x10   : > { %s5883_s25 = sshll.u32 %s7146_s22, 8  ;;  %702 = vst.msk [vmem:[#allocation2 + $0x10] sm:$0x3] %vm701_vm2, %v5836_v33  ;;  %706 = vst.msk [vmem:[#allocation2 + $0x1a8] sm:$0x3] %vm701_vm2, %v5836_v33  ;;  %5113 = vmatprep.subr.msk.mxu0 %vm1164_vm4, %v1067_v34  ;;  %5313 = vmatprep.subr.msk.mxu1 %vm1164_vm4, %v2431_v37 }
  0x11   : > { %s5889_s28 = scalar_lea.vmem %s7058_s1, %s5883_s25  ;;  %708 = vst.msk [vmem:[#allocation2] sm:$0x1] %vm707_vm3, %v5836_v33  ;;  %709 = vst.msk [vmem:[#allocation2 + $0x18] sm:$0x1] %vm707_vm3, %v5836_v33  ;;  %5314 = vmatpush3.msk.msra.mxu1 %vm1164_vm4, %v2431_v37  ;;  %v2788_v38 = vld [vmem:[%s7061_s4 + $0x14] sm:$0xf]  ;;  %s6020_s15 = scalar_lea.vmem %s7057_s0, %s5883_s25 }
  0x12   : > { %v304_v1 = vld [vmem:[%s5889_s28] sm:$0xff]  ;;  %v305_v2 = vld [vmem:[%s5889_s28 + $0x8] sm:$0xff]  ;;  %v306_v3 = vld [vmem:[%s5889_s28 + $0x10] sm:$0xff]  ;;  %710 = vst.msk [vmem:[#allocation2 + $0x30] sm:$0x1] %vm707_vm3, %v5836_v33  ;;  %5363 = vmatprep.subr.msk.mxu1 %vm1164_vm4, %v2788_v38  ;;  %s6933_s10 = scalar_lea.vmem %s7063_s6, %s5883_s25 }
  0x13   : > { %5065 = vmatprep.mubr.msk.f32.mxu0 %vm344_vm0, %v304_v1  ;;  %v307_v4 = vld [vmem:[%s5889_s28 + $0x18] sm:$0xff]  ;;  %v308_v5 = vld [vmem:[%s5889_s28 + $0x20] sm:$0xff]  ;;  %v309_v6 = vld [vmem:[%s5889_s28 + $0x28] sm:$0xff]  ;;  %711 = vst.msk [vmem:[#allocation2 + $0x48] sm:$0x1] %vm707_vm3, %v5836_v33 }
  0x14   : > { %5066 = vmatmul.mubr.msk.f32.vlgmr.msra.gmra.mrb[0].mxu0 %vm344_vm0, %v305_v2  ;;  %v310_v7 = vld [vmem:[%s5889_s28 + $0x30] sm:$0xff]  ;;  %v311_v8 = vld [vmem:[%s5889_s28 + $0x38] sm:$0xff]  ;;  %v312_v9 = vld [vmem:[%s5889_s28 + $0x40] sm:$0xff]  ;;  %712 = vst.msk [vmem:[#allocation2 + $0x60] sm:$0x1] %vm707_vm3, %v5836_v33 }
  0x15   : > { %5068 = vmatprep.mubr.msk.f32.mxu0 %vm344_vm0, %v306_v3  ;;  %v313_v10 = vld [vmem:[%s5889_s28 + $0x48] sm:$0xff]  ;;  %v314_v11 = vld [vmem:[%s5889_s28 + $0x50] sm:$0xff]  ;;  %v315_v12 = vld [vmem:[%s5889_s28 + $0x58] sm:$0xff]  ;;  %713 = vst.msk [vmem:[#allocation2 + $0x78] sm:$0x1] %vm707_vm3, %v5836_v33  ;;  %5114 = vmatpush3.msk.msra.mxu0 %vm1164_vm4, %v1067_v34 }
  0x16   : > { %v316_v13 = vld [vmem:[%s5889_s28 + $0x60] sm:$0xff]  ;;  %v317_v14 = vld [vmem:[%s5889_s28 + $0x68] sm:$0xff]  ;;  %v318_v15 = vld [vmem:[%s5889_s28 + $0x70] sm:$0xff]  ;;  %714 = vst.msk [vmem:[#allocation2 + $0x90] sm:$0x1] %vm707_vm3, %v5836_v33 }
  0x17   : > { %v319_v16 = vld [vmem:[%s5889_s28 + $0x78] sm:$0xff]  ;;  %v320_v17 = vld [vmem:[%s5889_s28 + $0x80] sm:$0xff]  ;;  %v321_v18 = vld [vmem:[%s5889_s28 + $0x88] sm:$0xff]  ;;  %715 = vst.msk [vmem:[#allocation2 + $0xa8] sm:$0x1] %vm707_vm3, %v5836_v33 }
  0x18   : > { %5069 = vmatmul.mubr.msk.f32.gmra.mrb[2].mxu0 %vm344_vm0, %v307_v4  ;;  %v322_v19 = vld [vmem:[%s5889_s28 + $0x90] sm:$0xff]  ;;  %v323_v20 = vld [vmem:[%s5889_s28 + $0x98] sm:$0xff]  ;;  %v324_v21 = vld [vmem:[%s5889_s28 + $0xa0] sm:$0xff]  ;;  %716 = vst.msk [vmem:[#allocation2 + $0xc0] sm:$0x1] %vm707_vm3, %v5836_v33 }
  0x19   : > { %5071 = vmatprep.mubr.msk.f32.mxu0 %vm344_vm0, %v308_v5  ;;  %v325_v22 = vld [vmem:[%s5889_s28 + $0xa8] sm:$0xff]  ;;  %v326_v23 = vld [vmem:[%s5889_s28 + $0xb0] sm:$0xff]  ;;  %v327_v24 = vld [vmem:[%s5889_s28 + $0xb8] sm:$0xff]  ;;  %717 = vst.msk [vmem:[#allocation2 + $0xd8] sm:$0x1] %vm707_vm3, %v5836_v33 }
  0x1a   : > { %v328_v25 = vld [vmem:[%s5889_s28 + $0xc0] sm:$0xff]  ;;  %v329_v26 = vld [vmem:[%s5889_s28 + $0xc8] sm:$0xff]  ;;  %v330_v27 = vld [vmem:[%s5889_s28 + $0xd0] sm:$0xff]  ;;  %718 = vst.msk [vmem:[#allocation2 + $0xf0] sm:$0x1] %vm707_vm3, %v5836_v33 }
  0x1b   : > { %v331_v28 = vld [vmem:[%s5889_s28 + $0xd8] sm:$0xff]  ;;  %v332_v29 = vld [vmem:[%s5889_s28 + $0xe0] sm:$0xff]  ;;  %v333_v30 = vld [vmem:[%s5889_s28 + $0xe8] sm:$0xff]  ;;  %719 = vst.msk [vmem:[#allocation2 + $0x108] sm:$0x1] %vm707_vm3, %v5836_v33 }
  0x1c   : > { %5072 = vmatmul.mubr.msk.f32.gmra.mrb[4].mxu0 %vm344_vm0, %v309_v6  ;;  %v334_v31 = vld [vmem:[%s5889_s28 + $0xf0] sm:$0xff]  ;;  %v335_v32 = vld [vmem:[%s5889_s28 + $0xf8] sm:$0xff]  ;;  %720 = vst.msk [vmem:[#allocation2 + $0x120] sm:$0x1] %vm707_vm3, %v5836_v33  ;;  %721 = vst.msk [vmem:[#allocation2 + $0x138] sm:$0x1] %vm707_vm3, %v5836_v33 }
  0x1d   : > { %5074 = vmatprep.mubr.msk.f32.mxu0 %vm344_vm0, %v310_v7  ;;  %722 = vst.msk [vmem:[#allocation2 + $0x150] sm:$0x1] %vm707_vm3, %v5836_v33  ;;  %723 = vst.msk [vmem:[#allocation2 + $0x168] sm:$0x1] %vm707_vm3, %v5836_v33  ;;  %v809_v35 = vld [vmem:[#allocation2 + $0x1] sm:$0xff]  ;;  %v810_v36 = vld [vmem:[#allocation2 + $0x9] sm:$0xff] }
  0x1e   : > { %724 = vst.msk [vmem:[#allocation2 + $0x180] sm:$0x1] %vm707_vm3, %v5836_v33  ;;  %725 = vst.msk [vmem:[#allocation2 + $0x198] sm:$0x1] %vm707_vm3, %v5836_v33  ;;  %v1066_v39 = vld [vmem:[%s7061_s4] sm:$0xf] }
  0x1f   : > { %726 = vst.msk [vmem:[#allocation2 + $0x11] sm:$0x1] %vm707_vm3, %v5836_v33  ;;  %727 = vst.msk [vmem:[#allocation2 + $0x29] sm:$0x1] %vm707_vm3, %v5836_v33  ;;  %5163 = vmatprep.subr.msk.mxu0 %vm1164_vm4, %v1066_v39  ;;  %v6025_v40 = vld [vmem:[%s7060_s3] ss:$0 sm:$0xff] }
  0x20   : > { %5075 = vmatmul.mubr.msk.f32.gmra.mrb[6].mxu0 %vm344_vm0, %v311_v8  ;;  %728 = vst.msk [vmem:[#allocation2 + $0x41] sm:$0x1] %vm707_vm3, %v5836_v33  ;;  %729 = vst.msk [vmem:[#allocation2 + $0x59] sm:$0x1] %vm707_vm3, %v5836_v33  ;;  %v273_v41 = vld [vmem:[%s6020_s15 + $0x8] sm:$0xff]  ;;  %v272_v44 = vld [vmem:[%s6020_s15] sm:$0xff] }
  0x21   : > { %5077 = vmatprep.mubr.msk.f32.mxu0 %vm344_vm0, %v312_v9  ;;  %730 = vst.msk [vmem:[#allocation2 + $0x71] sm:$0x1] %vm707_vm3, %v5836_v33  ;;  %731 = vst.msk [vmem:[#allocation2 + $0x89] sm:$0x1] %vm707_vm3, %v5836_v33  ;;  %v275_v49 = vld [vmem:[%s6020_s15 + $0x18] sm:$0xff]  ;;  %v274_v52 = vld [vmem:[%s6020_s15 + $0x10] sm:$0xff] }
  0x22   : > { %732 = vst.msk [vmem:[#allocation2 + $0xa1] sm:$0x1] %vm707_vm3, %v5836_v33  ;;  %733 = vst.msk [vmem:[#allocation2 + $0xb9] sm:$0x1] %vm707_vm3, %v5836_v33  ;;  %v277_v57 = vld [vmem:[%s6020_s15 + $0x28] sm:$0xff]  ;;  %v276_v61 = vld [vmem:[%s6020_s15 + $0x20] sm:$0xff] }
  0x23   : > { %734 = vst.msk [vmem:[#allocation2 + $0xd1] sm:$0x1] %vm707_vm3, %v5836_v33  ;;  %735 = vst.msk [vmem:[#allocation2 + $0xe9] sm:$0x1] %vm707_vm3, %v5836_v33  ;;  %v6041_v59 = vld [vmem:[%s7061_s4 + $0x8] sm:$0xf] }
  0x24   : > { %5078 = vmatmul.mubr.msk.f32.gmra.mrb[8].mxu0 %vm344_vm0, %v313_v10  ;;  %736 = vst.msk [vmem:[#allocation2 + $0x101] sm:$0x1] %vm707_vm3, %v5836_v33  ;;  %737 = vst.msk [vmem:[#allocation2 + $0x119] sm:$0x1] %vm707_vm3, %v5836_v33  ;;  %v279_v2 = vld [vmem:[%s6020_s15 + $0x38] sm:$0xff]  ;;  %v278_v5 = vld [vmem:[%s6020_s15 + $0x30] sm:$0xff] }
  0x25   : > { %5080 = vmatprep.mubr.msk.f32.mxu0 %vm344_vm0, %v314_v11  ;;  %738 = vst.msk [vmem:[#allocation2 + $0x131] sm:$0x1] %vm707_vm3, %v5836_v33  ;;  %739 = vst.msk [vmem:[#allocation2 + $0x149] sm:$0x1] %vm707_vm3, %v5836_v33  ;;  %v6061_v10 = vld [vmem:[%s7061_s4 + $0x18] sm:$0xf] }
  0x26   : > { %740 = vst.msk [vmem:[#allocation2 + $0x161] sm:$0x1] %vm707_vm3, %v5836_v33  ;;  %741 = vst.msk [vmem:[#allocation2 + $0x179] sm:$0x1] %vm707_vm3, %v5836_v33 }
  0x27   : > { %742 = vst.msk [vmem:[#allocation2 + $0x191] sm:$0x1] %vm707_vm3, %v5836_v33  ;;  %743 = vst.msk [vmem:[#allocation2 + $0x1a9] sm:$0x1] %vm707_vm3, %v5836_v33  ;;  %v285_v33 = vld [vmem:[%s6020_s15 + $0x68] sm:$0xff] }
  0x28   : > { %5081 = vmatmul.mubr.msk.f32.gmra.mrb[10].mxu0 %vm344_vm0, %v315_v12 }
  0x29   : > { %5083 = vmatprep.mubr.msk.f32.mxu0 %vm344_vm0, %v316_v13  ;;  %v281_v13 = vld [vmem:[%s6020_s15 + $0x48] sm:$0xff] }
  0x2c   : > { %5084 = vmatmul.mubr.msk.f32.gmra.mrb[12].mxu0 %vm344_vm0, %v317_v14 }
  0x2d   : > { %5086 = vmatprep.mubr.msk.f32.mxu0 %vm344_vm0, %v318_v15 }
  0x30   : > { %5087 = vmatmul.mubr.msk.f32.gmra.mrb[14].mxu0 %vm344_vm0, %v319_v16  ;;  %v280_v16 = vld [vmem:[%s6020_s15 + $0x40] sm:$0xff] }
  0x31   : > { %5089 = vmatprep.mubr.msk.f32.mxu0 %vm344_vm0, %v320_v17 }
  0x34   : > { %5090 = vmatmul.mubr.msk.f32.gmra.mrb[16].mxu0 %vm344_vm0, %v321_v18 }
  0x35   : > { %5092 = vmatprep.mubr.msk.f32.mxu0 %vm344_vm0, %v322_v19 }
  0x38   : > { %5093 = vmatmul.mubr.msk.f32.gmra.mrb[18].mxu0 %vm344_vm0, %v323_v20 }
  0x39   : > { %5095 = vmatprep.mubr.msk.f32.mxu0 %vm344_vm0, %v324_v21 }
  0x3c   : > { %5096 = vmatmul.mubr.msk.f32.gmra.mrb[20].mxu0 %vm344_vm0, %v325_v22 }
  0x3d   : > { %5098 = vmatprep.mubr.msk.f32.mxu0 %vm344_vm0, %v326_v23  ;;  %v283_v23 = vld [vmem:[%s6020_s15 + $0x58] sm:$0xff] }
  0x40   : > { %5099 = vmatmul.mubr.msk.f32.gmra.mrb[22].mxu0 %vm344_vm0, %v327_v24 }
  0x41   : > { %5101 = vmatprep.mubr.msk.f32.mxu0 %vm344_vm0, %v328_v25 }
  0x44   : > { %5102 = vmatmul.mubr.msk.f32.gmra.mrb[24].mxu0 %vm344_vm0, %v329_v26  ;;  %v282_v26 = vld [vmem:[%s6020_s15 + $0x50] sm:$0xff] }
  0x45   : > { %5104 = vmatprep.mubr.msk.f32.mxu0 %vm344_vm0, %v330_v27 }
  0x48   : > { %5105 = vmatmul.mubr.msk.f32.gmra.mrb[26].mxu0 %vm344_vm0, %v331_v28 }
  0x49   : > { %5107 = vmatprep.mubr.msk.f32.mxu0 %vm344_vm0, %v332_v29 }
  0x4c   : > { %5108 = vmatmul.mubr.msk.f32.gmra.mrb[28].mxu0 %vm344_vm0, %v333_v30 }
  0x4d   : > { %5110 = vmatprep.mubr.msk.f32.mxu0 %vm344_vm0, %v334_v31 }
  0x50   : > { %5111 = vmatmul.mubr.msk.f32.gmra.mrb[30].mxu0 %vm344_vm0, %v335_v32 }
  0x51   : > { %5115 = vmatprep.mubr.msk.f32.mxu0 %vm698_vm1, %v809_v35 }
  0x54   : > { %5116 = vmatmul.mubr.msk.f32.vlgmr.msra.gmra.mrb[32].mxu0 %vm698_vm1, %v810_v36  ;;  %v284_v36 = vld [vmem:[%s6020_s15 + $0x60] sm:$0xff] }
  0x55   : > { %5164 = vmatpush3.msk.msra.mxu0 %vm1164_vm4, %v1066_v39 }
  0x56   : > { %5213 = vmatprep.subr.msk.mxu0 %vm1164_vm4, %v6041_v59 }
  0xe7   : > { %v5067_v42 = vpop.f32.mrb[0].mxu0 }
  0xe8   : > { %v513_v43 = vadd.f32 %v5067_v42, %v6025_v40  ;;  %v507_v45 = vpop.f32.mrb[1].mxu0 }
  0xe9   : > { %v508_v46 = vadd.f32 %v6025_v40, %v507_v45 }
  0xea   : > { %v667_v47 = vadd.f32 %v513_v43, %v273_v41 }
  0xeb   : > { %v666_v48 = vadd.f32 %v508_v46, %v272_v44  ;;  %v5070_v50 = vpop.f32.mrb[2].mxu0  ;;  %v287_v44 = vld [vmem:[%s6020_s15 + $0x78] sm:$0xff] }
  0xec   : > { %746 = vst.msk [vmem:[#allocation2 + $0x21] sm:$0xff] %vm698_vm1, %v667_v47  ;;  %v523_v51 = vadd.f32 %v5070_v50, %v6025_v40  ;;  %v517_v53 = vpop.f32.mrb[3].mxu0  ;;  %v286_v47 = vld [vmem:[%s6020_s15 + $0x70] sm:$0xff] }
  0xed   : > { %745 = vst.msk [vmem:[#allocation2 + $0x19] sm:$0xff] %vm698_vm1, %v666_v48  ;;  %v518_v54 = vadd.f32 %v6025_v40, %v517_v53 }
  0xee   : > { %v669_v55 = vadd.f32 %v523_v51, %v275_v49 }
  0xef   : > { %v668_v56 = vadd.f32 %v518_v54, %v274_v52  ;;  %v5073_v58 = vpop.f32.mrb[4].mxu0  ;;  %v289_v54 = vld [vmem:[%s6020_s15 + $0x88] sm:$0xff] }
  0xf0   : > { %748 = vst.msk [vmem:[#allocation2 + $0x39] sm:$0xff] %vm698_vm1, %v669_v55  ;;  %v533_v60 = vadd.f32 %v5073_v58, %v6025_v40  ;;  %v527_v62 = vpop.f32.mrb[5].mxu0 }
  0xf1   : > { %747 = vst.msk [vmem:[#allocation2 + $0x31] sm:$0xff] %vm698_vm1, %v668_v56  ;;  %v528_v63 = vadd.f32 %v6025_v40, %v527_v62 }
  0xf2   : > { %v671_v0 = vadd.f32 %v533_v60, %v277_v57  ;;  %v288_v57 = vld [vmem:[%s6020_s15 + $0x80] sm:$0xff] }
  0xf3   : > { %v670_v1 = vadd.f32 %v528_v63, %v276_v61  ;;  %v5076_v3 = vpop.f32.mrb[6].mxu0  ;;  %v812_v9 = vld [vmem:[#allocation2 + $0x21] sm:$0xff] }
  0xf4   : > { %750 = vst.msk [vmem:[#allocation2 + $0x51] sm:$0xff] %vm698_vm1, %v671_v0  ;;  %v543_v4 = vadd.f32 %v5076_v3, %v6025_v40  ;;  %v537_v6 = vpop.f32.mrb[7].mxu0  ;;  %v811_v7 = vld [vmem:[#allocation2 + $0x19] sm:$0xff] }
  0xf5   : > { %749 = vst.msk [vmem:[#allocation2 + $0x49] sm:$0xff] %vm698_vm1, %v670_v1  ;;  %v538_v8 = vadd.f32 %v6025_v40, %v537_v6  ;;  %5118 = vmatprep.mubr.msk.f32.mxu0 %vm698_vm1, %v811_v7  ;;  %5315 = vmatprep.mubr.msk.f32.mxu1 %vm698_vm1, %v811_v7  ;;  %v291_v1 = vld [vmem:[%s6020_s15 + $0x98] sm:$0xff] }
  0xf6   : > { %v673_v11 = vadd.f32 %v543_v4, %v279_v2  ;;  %5119 = vmatmul.mubr.msk.f32.gmra.mrb[34].mxu0 %vm698_vm1, %v812_v9  ;;  %5316 = vmatmul.mubr.msk.f32.vlgmr.msra.gmra.mrb[0].mxu1 %vm698_vm1, %v812_v9  ;;  %v290_v4 = vld [vmem:[%s6020_s15 + $0x90] sm:$0xff] }
  0xf7   : > { %v672_v12 = vadd.f32 %v538_v8, %v278_v5  ;;  %5364 = vmatpush3.msk.msra.mxu1 %vm1164_vm4, %v2788_v38  ;;  %v5079_v14 = vpop.f32.mrb[8].mxu0  ;;  %v814_v20 = vld [vmem:[#allocation2 + $0x39] sm:$0xff] }
  0xf8   : > { %752 = vst.msk [vmem:[#allocation2 + $0x69] sm:$0xff] %vm698_vm1, %v673_v11  ;;  %v553_v15 = vadd.f32 %v5079_v14, %v6025_v40  ;;  %v547_v17 = vpop.f32.mrb[9].mxu0  ;;  %v813_v18 = vld [vmem:[#allocation2 + $0x31] sm:$0xff]  ;;  %5413 = vmatprep.subr.msk.mxu1 %vm1164_vm4, %v6061_v10 }
  0xf9   : > { %751 = vst.msk [vmem:[#allocation2 + $0x61] sm:$0xff] %vm698_vm1, %v672_v12  ;;  %v548_v19 = vadd.f32 %v6025_v40, %v547_v17  ;;  %5121 = vmatprep.mubr.msk.f32.mxu0 %vm698_vm1, %v813_v18  ;;  %5318 = vmatprep.mubr.msk.f32.mxu1 %vm698_vm1, %v813_v18  ;;  %v293_v12 = vld [vmem:[%s6020_s15 + $0xa8] sm:$0xff] }
  0xfa   : > { %v675_v21 = vadd.f32 %v553_v15, %v281_v13  ;;  %5122 = vmatmul.mubr.msk.f32.gmra.mrb[36].mxu0 %vm698_vm1, %v814_v20  ;;  %5319 = vmatmul.mubr.msk.f32.gmra.mrb[2].mxu1 %vm698_vm1, %v814_v20  ;;  %v292_v15 = vld [vmem:[%s6020_s15 + $0xa0] sm:$0xff] }
  0xfb   : > { %v674_v22 = vadd.f32 %v548_v19, %v280_v16  ;;  %v5082_v24 = vpop.f32.mrb[10].mxu0  ;;  %v816_v30 = vld [vmem:[#allocation2 + $0x51] sm:$0xff] }
  0xfc   : > { %754 = vst.msk [vmem:[#allocation2 + $0x81] sm:$0xff] %vm698_vm1, %v675_v21  ;;  %v563_v25 = vadd.f32 %v5082_v24, %v6025_v40  ;;  %v557_v27 = vpop.f32.mrb[11].mxu0  ;;  %v815_v28 = vld [vmem:[#allocation2 + $0x49] sm:$0xff] }
  0xfd   : > { %753 = vst.msk [vmem:[#allocation2 + $0x79] sm:$0xff] %vm698_vm1, %v674_v22  ;;  %v558_v29 = vadd.f32 %v6025_v40, %v557_v27  ;;  %5124 = vmatprep.mubr.msk.f32.mxu0 %vm698_vm1, %v815_v28  ;;  %5321 = vmatprep.mubr.msk.f32.mxu1 %vm698_vm1, %v815_v28  ;;  %v295_v22 = vld [vmem:[%s6020_s15 + $0xb8] sm:$0xff] }
  0xfe   : > { %v677_v31 = vadd.f32 %v563_v25, %v283_v23  ;;  %5125 = vmatmul.mubr.msk.f32.gmra.mrb[38].mxu0 %vm698_vm1, %v816_v30  ;;  %5322 = vmatmul.mubr.msk.f32.gmra.mrb[4].mxu1 %vm698_vm1, %v816_v30  ;;  %v294_v25 = vld [vmem:[%s6020_s15 + $0xb0] sm:$0xff] }
  0xff   : > { %v676_v32 = vadd.f32 %v558_v29, %v282_v26  ;;  %v5085_v34 = vpop.f32.mrb[12].mxu0  ;;  %v818_v41 = vld [vmem:[#allocation2 + $0x69] sm:$0xff] }
 0x100   : > { %756 = vst.msk [vmem:[#allocation2 + $0x99] sm:$0xff] %vm698_vm1, %v677_v31  ;;  %v573_v35 = vadd.f32 %v5085_v34, %v6025_v40  ;;  %v567_v37 = vpop.f32.mrb[13].mxu0  ;;  %v817_v38 = vld [vmem:[#allocation2 + $0x61] sm:$0xff] }
 0x101   : > { %755 = vst.msk [vmem:[#allocation2 + $0x91] sm:$0xff] %vm698_vm1, %v676_v32  ;;  %v568_v39 = vadd.f32 %v6025_v40, %v567_v37  ;;  %5127 = vmatprep.mubr.msk.f32.mxu0 %vm698_vm1, %v817_v38  ;;  %5324 = vmatprep.mubr.msk.f32.mxu1 %vm698_vm1, %v817_v38  ;;  %v297_v32 = vld [vmem:[%s6020_s15 + $0xc8] sm:$0xff] }
 0x102   : > { %v679_v42 = vadd.f32 %v573_v35, %v285_v33  ;;  %5128 = vmatmul.mubr.msk.f32.gmra.mrb[40].mxu0 %vm698_vm1, %v818_v41  ;;  %5325 = vmatmul.mubr.msk.f32.gmra.mrb[6].mxu1 %vm698_vm1, %v818_v41  ;;  %v296_v35 = vld [vmem:[%s6020_s15 + $0xc0] sm:$0xff] }
 0x103   : > { %v678_v43 = vadd.f32 %v568_v39, %v284_v36  ;;  %v5088_v45 = vpop.f32.mrb[14].mxu0  ;;  %v820_v51 = vld [vmem:[#allocation2 + $0x81] sm:$0xff] }
 0x104   : > { %758 = vst.msk [vmem:[#allocation2 + $0xb1] sm:$0xff] %vm698_vm1, %v679_v42  ;;  %v583_v46 = vadd.f32 %v5088_v45, %v6025_v40  ;;  %v577_v48 = vpop.f32.mrb[15].mxu0  ;;  %v819_v49 = vld [vmem:[#allocation2 + $0x79] sm:$0xff] }
 0x105   : > { %757 = vst.msk [vmem:[#allocation2 + $0xa9] sm:$0xff] %vm698_vm1, %v678_v43  ;;  %v578_v50 = vadd.f32 %v6025_v40, %v577_v48  ;;  %5130 = vmatprep.mubr.msk.f32.mxu0 %vm698_vm1, %v819_v49  ;;  %5327 = vmatprep.mubr.msk.f32.mxu1 %vm698_vm1, %v819_v49  ;;  %v299_v43 = vld [vmem:[%s6020_s15 + $0xd8] sm:$0xff] }
 0x106   : > { %v681_v52 = vadd.f32 %v583_v46, %v287_v44  ;;  %5131 = vmatmul.mubr.msk.f32.gmra.mrb[42].mxu0 %vm698_vm1, %v820_v51  ;;  %5328 = vmatmul.mubr.msk.f32.gmra.mrb[8].mxu1 %vm698_vm1, %v820_v51  ;;  %v298_v46 = vld [vmem:[%s6020_s15 + $0xd0] sm:$0xff] }
 0x107   : > { %v680_v53 = vadd.f32 %v578_v50, %v286_v47  ;;  %v5091_v55 = vpop.f32.mrb[16].mxu0  ;;  %v6120_v62 = vld [vmem:[#allocation2 + $0x99] sm:$0xff] }
 0x108   : > { %760 = vst.msk [vmem:[#allocation2 + $0xc9] sm:$0xff] %vm698_vm1, %v681_v52  ;;  %v593_v56 = vadd.f32 %v5091_v55, %v6025_v40  ;;  %v587_v58 = vpop.f32.mrb[17].mxu0  ;;  %v6112_v60 = vld [vmem:[#allocation2 + $0x91] sm:$0xff]  ;;  %7092 = vst [vmem:[#allocation4_spill] sm:$0xff] %v6120_v62 }
 0x109   : > { %7091 = vst [vmem:[#allocation3_spill] sm:$0xff] %v6112_v60  ;;  %759 = vst.msk [vmem:[#allocation2 + $0xc1] sm:$0xff] %vm698_vm1, %v680_v53  ;;  %v588_v61 = vadd.f32 %v6025_v40, %v587_v58  ;;  %5133 = vmatprep.mubr.msk.f32.mxu0 %vm698_vm1, %v6112_v60  ;;  %5330 = vmatprep.mubr.msk.f32.mxu1 %vm698_vm1, %v6112_v60  ;;  %v301_v53 = vld [vmem:[%s6020_s15 + $0xe8] sm:$0xff] }
 0x10a   : > { %v683_v63 = vadd.f32 %v593_v56, %v289_v54  ;;  %5134 = vmatmul.mubr.msk.f32.gmra.mrb[44].mxu0 %vm698_vm1, %v6120_v62  ;;  %5331 = vmatmul.mubr.msk.f32.gmra.mrb[10].mxu1 %vm698_vm1, %v6120_v62  ;;  %v300_v56 = vld [vmem:[%s6020_s15 + $0xe0] sm:$0xff] }
 0x10b   : > { %v682_v0 = vadd.f32 %v588_v61, %v288_v57  ;;  %v5094_v2 = vpop.f32.mrb[18].mxu0  ;;  %v6138_v8 = vld [vmem:[#allocation2 + $0xb1] sm:$0xff] }
 0x10c   : > { %762 = vst.msk [vmem:[#allocation2 + $0xe1] sm:$0xff] %vm698_vm1, %v683_v63  ;;  %v603_v3 = vadd.f32 %v5094_v2, %v6025_v40  ;;  %v597_v5 = vpop.f32.mrb[19].mxu0  ;;  %v6130_v6 = vld [vmem:[#allocation2 + $0xa9] sm:$0xff]  ;;  %7094 = vst [vmem:[#allocation6_spill] sm:$0xff] %v6138_v8  ;;  %v303_v2 = vld [vmem:[%s6020_s15 + $0xf8] sm:$0xff] }
 0x10d   : > { %7093 = vst [vmem:[#allocation5_spill] sm:$0xff] %v6130_v6  ;;  %761 = vst.msk [vmem:[#allocation2 + $0xd9] sm:$0xff] %vm698_vm1, %v682_v0  ;;  %v598_v7 = vadd.f32 %v6025_v40, %v597_v5  ;;  %5136 = vmatprep.mubr.msk.f32.mxu0 %vm698_vm1, %v6130_v6  ;;  %5333 = vmatprep.mubr.msk.f32.mxu1 %vm698_vm1, %v6130_v6  ;;  %v302_v5 = vld [vmem:[%s6020_s15 + $0xf0] sm:$0xff] }
 0x10e   : > { %v685_v9 = vadd.f32 %v603_v3, %v291_v1  ;;  %5137 = vmatmul.mubr.msk.f32.gmra.mrb[46].mxu0 %vm698_vm1, %v6138_v8  ;;  %5334 = vmatmul.mubr.msk.f32.gmra.mrb[12].mxu1 %vm698_vm1, %v6138_v8  ;;  %v841_v8 = vld [vmem:[#allocation2 + $0x2] sm:$0xff] }
 0x10f   : > { %v684_v11 = vadd.f32 %v598_v7, %v290_v4  ;;  %v5097_v13 = vpop.f32.mrb[20].mxu0  ;;  %v6156_v19 = vld [vmem:[#allocation2 + $0xc9] sm:$0xff] }
 0x110   : > { %764 = vst.msk [vmem:[#allocation2 + $0xf9] sm:$0xff] %vm698_vm1, %v685_v9  ;;  %v613_v14 = vadd.f32 %v5097_v13, %v6025_v40  ;;  %v607_v16 = vpop.f32.mrb[21].mxu0  ;;  %v6148_v17 = vld [vmem:[#allocation2 + $0xc1] sm:$0xff]  ;;  %7096 = vst [vmem:[#allocation8_spill] sm:$0xff] %v6156_v19 }
 0x111   : > { %7095 = vst [vmem:[#allocation7_spill] sm:$0xff] %v6148_v17  ;;  %763 = vst.msk [vmem:[#allocation2 + $0xf1] sm:$0xff] %vm698_vm1, %v684_v11  ;;  %v608_v18 = vadd.f32 %v6025_v40, %v607_v16  ;;  %5139 = vmatprep.mubr.msk.f32.mxu0 %vm698_vm1, %v6148_v17  ;;  %5336 = vmatprep.mubr.msk.f32.mxu1 %vm698_vm1, %v6148_v17 }
 0x112   : > { %v687_v20 = vadd.f32 %v613_v14, %v293_v12  ;;  %5140 = vmatmul.mubr.msk.f32.gmra.mrb[48].mxu0 %vm698_vm1, %v6156_v19  ;;  %5337 = vmatmul.mubr.msk.f32.gmra.mrb[14].mxu1 %vm698_vm1, %v6156_v19 }
 0x113   : > { %v686_v21 = vadd.f32 %v608_v18, %v292_v15  ;;  %v5100_v23 = vpop.f32.mrb[22].mxu0  ;;  %v6174_v29 = vld [vmem:[#allocation2 + $0xe1] sm:$0xff] }
 0x114   : > { %766 = vst.msk [vmem:[#allocation2 + $0x111] sm:$0xff] %vm698_vm1, %v687_v20  ;;  %v623_v24 = vadd.f32 %v5100_v23, %v6025_v40  ;;  %v617_v26 = vpop.f32.mrb[23].mxu0  ;;  %v6166_v27 = vld [vmem:[#allocation2 + $0xd9] sm:$0xff]  ;;  %7098 = vst [vmem:[#allocation10_spill] sm:$0xff] %v6174_v29 }
 0x115   : > { %7097 = vst [vmem:[#allocation9_spill] sm:$0xff] %v6166_v27  ;;  %765 = vst.msk [vmem:[#allocation2 + $0x109] sm:$0xff] %vm698_vm1, %v686_v21  ;;  %v618_v28 = vadd.f32 %v6025_v40, %v617_v26  ;;  %5142 = vmatprep.mubr.msk.f32.mxu0 %vm698_vm1, %v6166_v27  ;;  %5339 = vmatprep.mubr.msk.f32.mxu1 %vm698_vm1, %v6166_v27  ;;  %v777_v18 = vld [vmem:[#allocation2] sm:$0xff]  ;;  %v778_v21 = vld [vmem:[#allocation2 + $0x8] sm:$0xff] }
 0x116   : > { %v689_v30 = vadd.f32 %v623_v24, %v295_v22  ;;  %5143 = vmatmul.mubr.msk.f32.gmra.mrb[50].mxu0 %vm698_vm1, %v6174_v29  ;;  %5340 = vmatmul.mubr.msk.f32.gmra.mrb[16].mxu1 %vm698_vm1, %v6174_v29  ;;  %v6288_v24 = vld [vmem:[#allocation2 + $0x18] sm:$0xff]  ;;  %v6295_v26 = vld [vmem:[%s7061_s4 + $0xc] sm:$0xf] }
 0x117   : > { %v688_v31 = vadd.f32 %v618_v28, %v294_v25  ;;  %v5103_v33 = vpop.f32.mrb[24].mxu0  ;;  %v6192_v39 = vld [vmem:[#allocation2 + $0xf9] sm:$0xff]  ;;  %7113 = vst [vmem:[#allocation25_spill] sm:$0xff] %v6288_v24 }
 0x118   : > { %768 = vst.msk [vmem:[#allocation2 + $0x129] sm:$0xff] %vm698_vm1, %v689_v30  ;;  %v633_v34 = vadd.f32 %v5103_v33, %v6025_v40  ;;  %v627_v36 = vpop.f32.mrb[25].mxu0  ;;  %v6184_v37 = vld [vmem:[#allocation2 + $0xf1] sm:$0xff]  ;;  %7100 = vst [vmem:[#allocation12_spill] sm:$0xff] %v6192_v39  ;;  %v6290_v25 = vld [vmem:[#allocation2 + $0x1a] sm:$0xff] }
 0x119   : > { %7099 = vst [vmem:[#allocation11_spill] sm:$0xff] %v6184_v37  ;;  %767 = vst.msk [vmem:[#allocation2 + $0x121] sm:$0xff] %vm698_vm1, %v688_v31  ;;  %v628_v38 = vadd.f32 %v6025_v40, %v627_v36  ;;  %5145 = vmatprep.mubr.msk.f32.mxu0 %vm698_vm1, %v6184_v37  ;;  %5342 = vmatprep.mubr.msk.f32.mxu1 %vm698_vm1, %v6184_v37  ;;  %v6303_v28 = vld [vmem:[#allocation2 + $0x20] sm:$0xff]  ;;  %v6310_v31 = vld [vmem:[%s7061_s4 + $0x1c] sm:$0xf] }
 0x11a   : > { %v691_v41 = vadd.f32 %v633_v34, %v297_v32  ;;  %5146 = vmatmul.mubr.msk.f32.gmra.mrb[52].mxu0 %vm698_vm1, %v6192_v39  ;;  %5343 = vmatmul.mubr.msk.f32.gmra.mrb[18].mxu1 %vm698_vm1, %v6192_v39  ;;  %7114 = vst [vmem:[#allocation26_spill] sm:$0xff] %v6303_v28  ;;  %v6305_v30 = vld [vmem:[#allocation2 + $0x22] sm:$0xff]  ;;  %v6318_v32 = vld [vmem:[#allocation2 + $0x30] sm:$0xff]  ;;  %v6330_v33 = vld [vmem:[#allocation2 + $0x38] sm:$0xff] }
 0x11b   : > { %v690_v42 = vadd.f32 %v628_v38, %v296_v35  ;;  %v5106_v44 = vpop.f32.mrb[26].mxu0  ;;  %v6210_v50 = vld [vmem:[#allocation2 + $0x111] sm:$0xff]  ;;  %v6332_v34 = vld [vmem:[#allocation2 + $0x3a] sm:$0xff] }
 0x11c   : > { %770 = vst.msk [vmem:[#allocation2 + $0x141] sm:$0xff] %vm698_vm1, %v691_v41  ;;  %v643_v45 = vadd.f32 %v5106_v44, %v6025_v40  ;;  %v637_v47 = vpop.f32.mrb[27].mxu0  ;;  %v6202_v48 = vld [vmem:[#allocation2 + $0x109] sm:$0xff]  ;;  %7102 = vst [vmem:[#allocation14_spill] sm:$0xff] %v6210_v50  ;;  %v6348_v38 = vld [vmem:[#allocation2 + $0x52] sm:$0xff] }
 0x11d   : > { %7101 = vst [vmem:[#allocation13_spill] sm:$0xff] %v6202_v48  ;;  %769 = vst.msk [vmem:[#allocation2 + $0x139] sm:$0xff] %vm698_vm1, %v690_v42  ;;  %v638_v49 = vadd.f32 %v6025_v40, %v637_v47  ;;  %5148 = vmatprep.mubr.msk.f32.mxu0 %vm698_vm1, %v6202_v48  ;;  %5345 = vmatprep.mubr.msk.f32.mxu1 %vm698_vm1, %v6202_v48  ;;  %v6340_v35 = vld [vmem:[#allocation2 + $0x4a] sm:$0xff]  ;;  %v6354_v41 = vld [vmem:[#allocation2 + $0x60] sm:$0xff] }
 0x11e   : > { %v693_v51 = vadd.f32 %v643_v45, %v299_v43  ;;  %5149 = vmatmul.mubr.msk.f32.gmra.mrb[54].mxu0 %vm698_vm1, %v6210_v50  ;;  %5346 = vmatmul.mubr.msk.f32.gmra.mrb[20].mxu1 %vm698_vm1, %v6210_v50  ;;  %v6346_v36 = vld [vmem:[#allocation2 + $0x50] sm:$0xff]  ;;  %v6356_v42 = vld [vmem:[#allocation2 + $0x62] sm:$0xff]  ;;  %v6370_v45 = vld [vmem:[#allocation2 + $0x78] sm:$0xff] }
 0x11f   : > { %v692_v52 = vadd.f32 %v638_v49, %v298_v46  ;;  %v5109_v54 = vpop.f32.mrb[28].mxu0  ;;  %v6228_v63 = vld [vmem:[#allocation2 + $0x129] sm:$0xff]  ;;  %v6372_v46 = vld [vmem:[#allocation2 + $0x7a] sm:$0xff] }
 0x120   : > { %772 = vst.msk [vmem:[#allocation2 + $0x159] sm:$0xff] %vm698_vm1, %v693_v51  ;;  %v653_v55 = vadd.f32 %v5109_v54, %v6025_v40  ;;  %v647_v57 = vpop.f32.mrb[29].mxu0  ;;  %v6220_v58 = vld [vmem:[#allocation2 + $0x121] sm:$0xff]  ;;  %7104 = vst [vmem:[#allocation16_spill] sm:$0xff] %v6228_v63  ;;  %v6364_v44 = vld [vmem:[#allocation2 + $0x6a] sm:$0xff] }
 0x121   : > { %7103 = vst [vmem:[#allocation15_spill] sm:$0xff] %v6220_v58  ;;  %771 = vst.msk [vmem:[#allocation2 + $0x151] sm:$0xff] %vm698_vm1, %v692_v52  ;;  %v648_v61 = vadd.f32 %v6025_v40, %v647_v57  ;;  %5151 = vmatprep.mubr.msk.f32.mxu0 %vm698_vm1, %v6220_v58  ;;  %5348 = vmatprep.mubr.msk.f32.mxu1 %vm698_vm1, %v6220_v58  ;;  %v6362_v43 = vld [vmem:[#allocation2 + $0x68] sm:$0xff]  ;;  %v6378_v47 = vld [vmem:[#allocation2 + $0x80] sm:$0xff] }
 0x122   : > { %v695_v0 = vadd.f32 %v653_v55, %v301_v53  ;;  %5152 = vmatmul.mubr.msk.f32.gmra.mrb[56].mxu0 %vm698_vm1, %v6228_v63  ;;  %5349 = vmatmul.mubr.msk.f32.gmra.mrb[22].mxu1 %vm698_vm1, %v6228_v63  ;;  %v6380_v49 = vld [vmem:[#allocation2 + $0x82] sm:$0xff]  ;;  %v6386_v51 = vld [vmem:[#allocation2 + $0x90] sm:$0xff]  ;;  %v6394_v53 = vld [vmem:[#allocation2 + $0x98] sm:$0xff] }
 0x123   : > { %v694_v1 = vadd.f32 %v648_v61, %v300_v56  ;;  %v5112_v3 = vpop.f32.mrb[30].mxu0  ;;  %v6246_v12 = vld [vmem:[#allocation2 + $0x141] sm:$0xff]  ;;  %v6388_v52 = vld [vmem:[#allocation2 + $0x92] sm:$0xff]  ;;  %v6404_v56 = vld [vmem:[#allocation2 + $0xaa] sm:$0xff] }
 0x124   : > { %774 = vst.msk [vmem:[#allocation2 + $0x171] sm:$0xff] %vm698_vm1, %v695_v0  ;;  %v663_v4 = vadd.f32 %v5112_v3, %v6025_v40  ;;  %v657_v7 = vpop.f32.mrb[31].mxu0  ;;  %v6238_v9 = vld [vmem:[#allocation2 + $0x139] sm:$0xff]  ;;  %7106 = vst [vmem:[#allocation18_spill] sm:$0xff] %v6246_v12  ;;  %v6402_v55 = vld [vmem:[#allocation2 + $0xa8] sm:$0xff] }
 0x125   : > { %7105 = vst [vmem:[#allocation17_spill] sm:$0xff] %v6238_v9  ;;  %773 = vst.msk [vmem:[#allocation2 + $0x169] sm:$0xff] %vm698_vm1, %v694_v1  ;;  %v658_v11 = vadd.f32 %v6025_v40, %v657_v7  ;;  %5154 = vmatprep.mubr.msk.f32.mxu0 %vm698_vm1, %v6238_v9  ;;  %5351 = vmatprep.mubr.msk.f32.mxu1 %vm698_vm1, %v6238_v9  ;;  %v6396_v54 = vld [vmem:[#allocation2 + $0x9a] sm:$0xff]  ;;  %v6410_v57 = vld [vmem:[#allocation2 + $0xb0] sm:$0xff] }
 0x126   : > { %v697_v13 = vadd.f32 %v663_v4, %v303_v2  ;;  %5155 = vmatmul.mubr.msk.f32.gmra.mrb[58].mxu0 %vm698_vm1, %v6246_v12  ;;  %5352 = vmatmul.mubr.msk.f32.gmra.mrb[24].mxu1 %vm698_vm1, %v6246_v12  ;;  %v6412_v61 = vld [vmem:[#allocation2 + $0xb2] sm:$0xff]  ;;  %v6418_v0 = vld [vmem:[#allocation2 + $0xc0] sm:$0xff]  ;;  %v6426_v2 = vld [vmem:[#allocation2 + $0xc8] sm:$0xff] }
 0x127   : > { %v696_v14 = vadd.f32 %v658_v11, %v302_v5  ;;  %v6260_v40 = vld [vmem:[#allocation2 + $0x159] sm:$0xff]  ;;  %v6420_v1 = vld [vmem:[#allocation2 + $0xc2] sm:$0xff]  ;;  %v6428_v3 = vld [vmem:[#allocation2 + $0xca] sm:$0xff] }
 0x128   : > { %776 = vst.msk [vmem:[#allocation2 + $0x189] sm:$0xff] %vm698_vm1, %v697_v13  ;;  %v6253_v15 = vld [vmem:[#allocation2 + $0x151] sm:$0xff]  ;;  %7108 = vst [vmem:[#allocation20_spill] sm:$0xff] %v6260_v40  ;;  %v6436_v5 = vld [vmem:[#allocation2 + $0xda] sm:$0xff] }
 0x129   : > { %7107 = vst [vmem:[#allocation19_spill] sm:$0xff] %v6253_v15  ;;  %775 = vst.msk [vmem:[#allocation2 + $0x181] sm:$0xff] %vm698_vm1, %v696_v14  ;;  %5157 = vmatprep.mubr.msk.f32.mxu0 %vm698_vm1, %v6253_v15  ;;  %5354 = vmatprep.mubr.msk.f32.mxu1 %vm698_vm1, %v6253_v15  ;;  %v6434_v4 = vld [vmem:[#allocation2 + $0xd8] sm:$0xff]  ;;  %v6442_v7 = vld [vmem:[#allocation2 + $0xe0] sm:$0xff] }
 0x12a   : > { %5158 = vmatmul.mubr.msk.f32.gmra.mrb[60].mxu0 %vm698_vm1, %v6260_v40  ;;  %5355 = vmatmul.mubr.msk.f32.gmra.mrb[26].mxu1 %vm698_vm1, %v6260_v40  ;;  %v6444_v11 = vld [vmem:[#allocation2 + $0xe2] sm:$0xff]  ;;  %v6450_v13 = vld [vmem:[#allocation2 + $0xf0] sm:$0xff]  ;;  %v6498_v63 = vld [vmem:[#allocation2 + $0x138] sm:$0xff] }
 0x12b   : > { %v6272_v20 = vld [vmem:[#allocation2 + $0x171] sm:$0xff]  ;;  %v6482_v40 = vld [vmem:[#allocation2 + $0x120] sm:$0xff]  ;;  %v6490_v12 = vld [vmem:[#allocation2 + $0x128] sm:$0xff] }
 0x12c   : > { %v6266_v16 = vld [vmem:[#allocation2 + $0x169] sm:$0xff]  ;;  %7110 = vst [vmem:[#allocation22_spill] sm:$0xff] %v6272_v20  ;;  %v6452_v14 = vld [vmem:[#allocation2 + $0xf2] sm:$0xff]  ;;  %v6500_v58 = vld [vmem:[#allocation2 + $0x13a] sm:$0xff] }
 0x12d   : > { %7109 = vst [vmem:[#allocation21_spill] sm:$0xff] %v6266_v16  ;;  %5160 = vmatprep.mubr.msk.f32.mxu0 %vm698_vm1, %v6266_v16  ;;  %5357 = vmatprep.mubr.msk.f32.mxu1 %vm698_vm1, %v6266_v16  ;;  %v6476_v16 = vld [vmem:[#allocation2 + $0x112] sm:$0xff]  ;;  %v6484_v15 = vld [vmem:[#allocation2 + $0x122] sm:$0xff]  ;;  %v6492_v9 = vld [vmem:[#allocation2 + $0x12a] sm:$0xff] }
 0x12e   : > { %5161 = vmatmul.mubr.msk.f32.gmra.mrb[62].mxu0 %vm698_vm1, %v6272_v20  ;;  %5358 = vmatmul.mubr.msk.f32.gmra.mrb[28].mxu1 %vm698_vm1, %v6272_v20  ;;  %v6474_v20 = vld [vmem:[#allocation2 + $0x110] sm:$0xff]  ;;  %v6506_v50 = vld [vmem:[#allocation2 + $0x140] sm:$0xff]  ;;  %v6522_v29 = vld [vmem:[#allocation2 + $0x158] sm:$0xff] }
 0x12f   : > { %5165 = vmatprep.mubr.msk.f32.mxu0 %vm698_vm1, %v777_v18  ;;  %v6283_v23 = vld [vmem:[#allocation2 + $0x189] sm:$0xff]  ;;  %v6458_v18 = vld [vmem:[#allocation2 + $0xf8] sm:$0xff] }
 0x130   : > { %v6279_v22 = vld [vmem:[#allocation2 + $0x181] sm:$0xff]  ;;  %7112 = vst [vmem:[#allocation24_spill] sm:$0xff] %v6283_v23  ;;  %v6514_v39 = vld [vmem:[#allocation2 + $0x150] sm:$0xff] }
 0x131   : > { %7111 = vst [vmem:[#allocation23_spill] sm:$0xff] %v6279_v22  ;;  %5360 = vmatprep.mubr.msk.f32.mxu1 %vm698_vm1, %v6279_v22  ;;  %v6468_v22 = vld [vmem:[#allocation2 + $0x10a] sm:$0xff]  ;;  %v6508_v48 = vld [vmem:[#allocation2 + $0x142] sm:$0xff]  ;;  %v6516_v37 = vld [vmem:[#allocation2 + $0x152] sm:$0xff] }
 0x132   : > { %5166 = vmatmul.mubr.msk.f32.vlgmr.msra.gmra.mrb[32].mxu0 %vm698_vm1, %v778_v21  ;;  %5361 = vmatmul.mubr.msk.f32.gmra.mrb[30].mxu1 %vm698_vm1, %v6283_v23  ;;  %v6460_v21 = vld [vmem:[#allocation2 + $0xfa] sm:$0xff]  ;;  %v6466_v23 = vld [vmem:[#allocation2 + $0x108] sm:$0xff]  ;;  %v6538_v6 = vld [vmem:[#allocation2 + $0x170] sm:$0xff] }
 0x133   : > { %5168 = vmatprep.mubr.msk.f32.mxu0 %vm698_vm1, %v6288_v24  ;;  %5365 = vmatprep.mubr.msk.f32.mxu1 %vm698_vm1, %v6290_v25  ;;  %v6524_v27 = vld [vmem:[#allocation2 + $0x15a] sm:$0xff]  ;;  %v6530_v19 = vld [vmem:[#allocation2 + $0x168] sm:$0xff]  ;;  %v6540_v62 = vld [vmem:[#allocation2 + $0x172] sm:$0xff] }
 0x134   : > { %5214 = vmatpush3.msk.msra.mxu0 %vm1164_vm4, %v6041_v59  ;;  %v6324_v59 = vld [vmem:[#allocation2 + $0x32] sm:$0xff]  ;;  %v6532_v17 = vld [vmem:[#allocation2 + $0x16a] sm:$0xff]  ;;  %7115 = vst [vmem:[#allocation27_spill] sm:$0xff] %v6540_v62  ;;  %v6546_v60 = vld [vmem:[#allocation2 + $0x182] sm:$0xff] }
 0x135   : > { %5263 = vmatprep.subr.msk.mxu0 %vm1164_vm4, %v6295_v26  ;;  %7116 = vst [vmem:[#allocation28_spill] sm:$0xff] %v6546_v60  ;;  %v6551_v24 = vld [vmem:[#allocation2 + $0x18a] sm:$0xff] }
 0x136   : > { %5169 = vmatmul.mubr.msk.f32.gmra.mrb[34].mxu0 %vm698_vm1, %v6303_v28  ;;  %5366 = vmatmul.mubr.msk.f32.vlgmr.msra.gmra.mrb[0].mxu1 %vm698_vm1, %v6305_v30  ;;  %v842_v28 = vld [vmem:[#allocation2 + $0xa] sm:$0xff]  ;;  %7117 = vst [vmem:[#allocation29_spill] sm:$0xff] %v6551_v24 }
 0x137   : > { %5414 = vmatpush3.msk.msra.mxu1 %vm1164_vm4, %v6061_v10  ;;  %5171 = vmatprep.mubr.msk.f32.mxu0 %vm698_vm1, %v6318_v32  ;;  %v6338_v10 = vld [vmem:[#allocation2 + $0x48] sm:$0xff] }
 0x138   : > { %5368 = vmatprep.mubr.msk.f32.mxu1 %vm698_vm1, %v6324_v59  ;;  %5463 = vmatprep.subr.msk.mxu1 %vm1164_vm4, %v6310_v31 }
 0x13a   : > { %5172 = vmatmul.mubr.msk.f32.gmra.mrb[36].mxu0 %vm698_vm1, %v6330_v33  ;;  %5369 = vmatmul.mubr.msk.f32.gmra.mrb[2].mxu1 %vm698_vm1, %v6332_v34 }
 0x13b   : > { %5174 = vmatprep.mubr.msk.f32.mxu0 %vm698_vm1, %v6338_v10  ;;  %5371 = vmatprep.mubr.msk.f32.mxu1 %vm698_vm1, %v6340_v35 }
 0x13e   : > { %5175 = vmatmul.mubr.msk.f32.gmra.mrb[38].mxu0 %vm698_vm1, %v6346_v36  ;;  %5372 = vmatmul.mubr.msk.f32.gmra.mrb[4].mxu1 %vm698_vm1, %v6348_v38 }
 0x13f   : > { %5177 = vmatprep.mubr.msk.f32.mxu0 %vm698_vm1, %v6354_v41  ;;  %5374 = vmatprep.mubr.msk.f32.mxu1 %vm698_vm1, %v6356_v42 }
 0x142   : > { %5178 = vmatmul.mubr.msk.f32.gmra.mrb[40].mxu0 %vm698_vm1, %v6362_v43  ;;  %5375 = vmatmul.mubr.msk.f32.gmra.mrb[6].mxu1 %vm698_vm1, %v6364_v44 }
 0x143   : > { %5180 = vmatprep.mubr.msk.f32.mxu0 %vm698_vm1, %v6370_v45  ;;  %5377 = vmatprep.mubr.msk.f32.mxu1 %vm698_vm1, %v6372_v46 }
 0x146   : > { %5181 = vmatmul.mubr.msk.f32.gmra.mrb[42].mxu0 %vm698_vm1, %v6378_v47  ;;  %5378 = vmatmul.mubr.msk.f32.gmra.mrb[8].mxu1 %vm698_vm1, %v6380_v49 }
 0x147   : > { %5183 = vmatprep.mubr.msk.f32.mxu0 %vm698_vm1, %v6386_v51  ;;  %5380 = vmatprep.mubr.msk.f32.mxu1 %vm698_vm1, %v6388_v52 }
 0x14a   : > { %5184 = vmatmul.mubr.msk.f32.gmra.mrb[44].mxu0 %vm698_vm1, %v6394_v53  ;;  %5381 = vmatmul.mubr.msk.f32.gmra.mrb[10].mxu1 %vm698_vm1, %v6396_v54 }
 0x14b   : > { %5186 = vmatprep.mubr.msk.f32.mxu0 %vm698_vm1, %v6402_v55  ;;  %5383 = vmatprep.mubr.msk.f32.mxu1 %vm698_vm1, %v6404_v56 }
 0x14e   : > { %5187 = vmatmul.mubr.msk.f32.gmra.mrb[46].mxu0 %vm698_vm1, %v6410_v57  ;;  %5384 = vmatmul.mubr.msk.f32.gmra.mrb[12].mxu1 %vm698_vm1, %v6412_v61 }
 0x14f   : > { %5189 = vmatprep.mubr.msk.f32.mxu0 %vm698_vm1, %v6418_v0  ;;  %5386 = vmatprep.mubr.msk.f32.mxu1 %vm698_vm1, %v6420_v1 }
 0x152   : > { %5190 = vmatmul.mubr.msk.f32.gmra.mrb[48].mxu0 %vm698_vm1, %v6426_v2  ;;  %5387 = vmatmul.mubr.msk.f32.gmra.mrb[14].mxu1 %vm698_vm1, %v6428_v3 }
 0x153   : > { %5192 = vmatprep.mubr.msk.f32.mxu0 %vm698_vm1, %v6434_v4  ;;  %5389 = vmatprep.mubr.msk.f32.mxu1 %vm698_vm1, %v6436_v5 }
 0x156   : > { %5193 = vmatmul.mubr.msk.f32.gmra.mrb[50].mxu0 %vm698_vm1, %v6442_v7  ;;  %5390 = vmatmul.mubr.msk.f32.gmra.mrb[16].mxu1 %vm698_vm1, %v6444_v11 }
 0x157   : > { %5195 = vmatprep.mubr.msk.f32.mxu0 %vm698_vm1, %v6450_v13  ;;  %5392 = vmatprep.mubr.msk.f32.mxu1 %vm698_vm1, %v6452_v14 }
 0x15a   : > { %5196 = vmatmul.mubr.msk.f32.gmra.mrb[52].mxu0 %vm698_vm1, %v6458_v18  ;;  %5393 = vmatmul.mubr.msk.f32.gmra.mrb[18].mxu1 %vm698_vm1, %v6460_v21 }
 0x15b   : > { %5198 = vmatprep.mubr.msk.f32.mxu0 %vm698_vm1, %v6466_v23  ;;  %5395 = vmatprep.mubr.msk.f32.mxu1 %vm698_vm1, %v6468_v22 }
 0x15e   : > { %5199 = vmatmul.mubr.msk.f32.gmra.mrb[54].mxu0 %vm698_vm1, %v6474_v20  ;;  %5396 = vmatmul.mubr.msk.f32.gmra.mrb[20].mxu1 %vm698_vm1, %v6476_v16 }
 0x15f   : > { %5201 = vmatprep.mubr.msk.f32.mxu0 %vm698_vm1, %v6482_v40  ;;  %5398 = vmatprep.mubr.msk.f32.mxu1 %vm698_vm1, %v6484_v15 }
 0x162   : > { %5202 = vmatmul.mubr.msk.f32.gmra.mrb[56].mxu0 %vm698_vm1, %v6490_v12  ;;  %5399 = vmatmul.mubr.msk.f32.gmra.mrb[22].mxu1 %vm698_vm1, %v6492_v9 }
 0x163   : > { %5204 = vmatprep.mubr.msk.f32.mxu0 %vm698_vm1, %v6498_v63  ;;  %5401 = vmatprep.mubr.msk.f32.mxu1 %vm698_vm1, %v6500_v58 }
 0x166   : > { %5205 = vmatmul.mubr.msk.f32.gmra.mrb[58].mxu0 %vm698_vm1, %v6506_v50  ;;  %5402 = vmatmul.mubr.msk.f32.gmra.mrb[24].mxu1 %vm698_vm1, %v6508_v48 }
 0x167   : > { %5207 = vmatprep.mubr.msk.f32.mxu0 %vm698_vm1, %v6514_v39  ;;  %5404 = vmatprep.mubr.msk.f32.mxu1 %vm698_vm1, %v6516_v37 }
 0x16a   : > { %5208 = vmatmul.mubr.msk.f32.gmra.mrb[60].mxu0 %vm698_vm1, %v6522_v29  ;;  %5405 = vmatmul.mubr.msk.f32.gmra.mrb[26].mxu1 %vm698_vm1, %v6524_v27 }
 0x16b   : > { %5210 = vmatprep.mubr.msk.f32.mxu0 %vm698_vm1, %v6530_v19  ;;  %5407 = vmatprep.mubr.msk.f32.mxu1 %vm698_vm1, %v6532_v17 }
 0x16e   : > { %5211 = vmatmul.mubr.msk.f32.gmra.mrb[62].mxu0 %vm698_vm1, %v6538_v6  ;;  %5408 = vmatmul.mubr.msk.f32.gmra.mrb[28].mxu1 %vm698_vm1, %v6540_v62 }
 0x16f   : > { %5410 = vmatprep.mubr.msk.f32.mxu1 %vm698_vm1, %v6546_v60  ;;  %5215 = vmatprep.mubr.msk.f32.mxu0 %vm698_vm1, %v841_v8  ;;  %v6565_v8 = vld [vmem:[%s7061_s4 + $0x20] sm:$0xf]  ;;  %v1002_v60 = vld [vmem:[#allocation2 + $0x31] sm:$0xff] }
 0x172   : > { %5216 = vmatmul.mubr.msk.f32.vlgmr.msra.gmra.mrb[32].mxu0 %vm698_vm1, %v842_v28  ;;  %5411 = vmatmul.mubr.msk.f32.gmra.mrb[30].mxu1 %vm698_vm1, %v6551_v24  ;;  %v6685_v28 = vld [vmem:[#allocation2 + $0x188] sm:$0xff] }
 0x173   : > { %5218 = vmatprep.mubr.msk.f32.mxu0 %vm698_vm1, %v6290_v25  ;;  %5415 = vmatprep.mubr.msk.f32.mxu1 %vm698_vm1, %v6318_v32  ;;  %v6679_v25 = vld [vmem:[#allocation2 + $0x180] sm:$0xff]  ;;  %v7119_v24 = vld [vmem:[#allocation26_spill] sm:$0xff] }
 0x174   : > { %5264 = vmatpush3.msk.msra.mxu0 %vm1164_vm4, %v6295_v26  ;;  %v1000_v26 = vld [vmem:[#allocation2 + $0x198] sm:$0xff] }
 0x176   : > { %5219 = vmatmul.mubr.msk.f32.gmra.mrb[34].mxu0 %vm698_vm1, %v6305_v30  ;;  %5416 = vmatmul.mubr.msk.f32.vlgmr.msra.gmra.mrb[0].mxu1 %vm698_vm1, %v6330_v33  ;;  %v7118_v30 = vld [vmem:[#allocation25_spill] sm:$0xff] }
 0x177   : > { %5464 = vmatpush3.msk.msra.mxu1 %vm1164_vm4, %v6310_v31  ;;  %5221 = vmatprep.mubr.msk.f32.mxu0 %vm698_vm1, %v6324_v59  ;;  %v1001_v31 = vld [vmem:[#allocation2 + $0x1a0] sm:$0xff] }
 0x178   : > { %5418 = vmatprep.mubr.msk.f32.mxu1 %vm698_vm1, %v6338_v10  ;;  %5513 = vmatprep.subr.msk.mxu1 %vm1164_vm4, %v6565_v8 }
 0x17a   : > { %5222 = vmatmul.mubr.msk.f32.gmra.mrb[36].mxu0 %vm698_vm1, %v6332_v34  ;;  %5419 = vmatmul.mubr.msk.f32.gmra.mrb[2].mxu1 %vm698_vm1, %v6346_v36 }
 0x17b   : > { %5224 = vmatprep.mubr.msk.f32.mxu0 %vm698_vm1, %v6340_v35  ;;  %5421 = vmatprep.mubr.msk.f32.mxu1 %vm698_vm1, %v6354_v41 }
 0x17e   : > { %5225 = vmatmul.mubr.msk.f32.gmra.mrb[38].mxu0 %vm698_vm1, %v6348_v38  ;;  %5422 = vmatmul.mubr.msk.f32.gmra.mrb[4].mxu1 %vm698_vm1, %v6362_v43 }
 0x17f   : > { %5227 = vmatprep.mubr.msk.f32.mxu0 %vm698_vm1, %v6356_v42  ;;  %5424 = vmatprep.mubr.msk.f32.mxu1 %vm698_vm1, %v6370_v45 }
 0x182   : > { %5228 = vmatmul.mubr.msk.f32.gmra.mrb[40].mxu0 %vm698_vm1, %v6364_v44  ;;  %5425 = vmatmul.mubr.msk.f32.gmra.mrb[6].mxu1 %vm698_vm1, %v6378_v47 }
 0x183   : > { %5230 = vmatprep.mubr.msk.f32.mxu0 %vm698_vm1, %v6372_v46  ;;  %5427 = vmatprep.mubr.msk.f32.mxu1 %vm698_vm1, %v6386_v51 }
 0x186   : > { %5231 = vmatmul.mubr.msk.f32.gmra.mrb[42].mxu0 %vm698_vm1, %v6380_v49  ;;  %5428 = vmatmul.mubr.msk.f32.gmra.mrb[8].mxu1 %vm698_vm1, %v6394_v53 }
 0x187   : > { %5233 = vmatprep.mubr.msk.f32.mxu0 %vm698_vm1, %v6388_v52  ;;  %5430 = vmatprep.mubr.msk.f32.mxu1 %vm698_vm1, %v6402_v55 }
 0x18a   : > { %5234 = vmatmul.mubr.msk.f32.gmra.mrb[44].mxu0 %vm698_vm1, %v6396_v54  ;;  %5431 = vmatmul.mubr.msk.f32.gmra.mrb[10].mxu1 %vm698_vm1, %v6410_v57 }
 0x18b   : > { %5236 = vmatprep.mubr.msk.f32.mxu0 %vm698_vm1, %v6404_v56  ;;  %5433 = vmatprep.mubr.msk.f32.mxu1 %vm698_vm1, %v6418_v0 }
 0x18e   : > { %5237 = vmatmul.mubr.msk.f32.gmra.mrb[46].mxu0 %vm698_vm1, %v6412_v61  ;;  %5434 = vmatmul.mubr.msk.f32.gmra.mrb[12].mxu1 %vm698_vm1, %v6426_v2 }
 0x18f   : > { %5239 = vmatprep.mubr.msk.f32.mxu0 %vm698_vm1, %v6420_v1  ;;  %5436 = vmatprep.mubr.msk.f32.mxu1 %vm698_vm1, %v6434_v4 }
 0x192   : > { %5240 = vmatmul.mubr.msk.f32.gmra.mrb[48].mxu0 %vm698_vm1, %v6428_v3  ;;  %5437 = vmatmul.mubr.msk.f32.gmra.mrb[14].mxu1 %vm698_vm1, %v6442_v7 }
 0x193   : > { %5242 = vmatprep.mubr.msk.f32.mxu0 %vm698_vm1, %v6436_v5  ;;  %5439 = vmatprep.mubr.msk.f32.mxu1 %vm698_vm1, %v6450_v13 }
 0x196   : > { %5243 = vmatmul.mubr.msk.f32.gmra.mrb[50].mxu0 %vm698_vm1, %v6444_v11  ;;  %5440 = vmatmul.mubr.msk.f32.gmra.mrb[16].mxu1 %vm698_vm1, %v6458_v18 }
 0x197   : > { %5245 = vmatprep.mubr.msk.f32.mxu0 %vm698_vm1, %v6452_v14  ;;  %5442 = vmatprep.mubr.msk.f32.mxu1 %vm698_vm1, %v6466_v23 }
 0x19a   : > { %5246 = vmatmul.mubr.msk.f32.gmra.mrb[52].mxu0 %vm698_vm1, %v6460_v21  ;;  %5443 = vmatmul.mubr.msk.f32.gmra.mrb[18].mxu1 %vm698_vm1, %v6474_v20 }
 0x19b   : > { %5248 = vmatprep.mubr.msk.f32.mxu0 %vm698_vm1, %v6468_v22  ;;  %5445 = vmatprep.mubr.msk.f32.mxu1 %vm698_vm1, %v6482_v40 }
 0x19e   : > { %5249 = vmatmul.mubr.msk.f32.gmra.mrb[54].mxu0 %vm698_vm1, %v6476_v16  ;;  %5446 = vmatmul.mubr.msk.f32.gmra.mrb[20].mxu1 %vm698_vm1, %v6490_v12 }
 0x19f   : > { %5251 = vmatprep.mubr.msk.f32.mxu0 %vm698_vm1, %v6484_v15  ;;  %5448 = vmatprep.mubr.msk.f32.mxu1 %vm698_vm1, %v6498_v63 }
 0x1a2   : > { %5252 = vmatmul.mubr.msk.f32.gmra.mrb[56].mxu0 %vm698_vm1, %v6492_v9  ;;  %5449 = vmatmul.mubr.msk.f32.gmra.mrb[22].mxu1 %vm698_vm1, %v6506_v50 }
 0x1a3   : > { %5254 = vmatprep.mubr.msk.f32.mxu0 %vm698_vm1, %v6500_v58  ;;  %5451 = vmatprep.mubr.msk.f32.mxu1 %vm698_vm1, %v6514_v39 }
 0x1a6   : > { %5255 = vmatmul.mubr.msk.f32.gmra.mrb[58].mxu0 %vm698_vm1, %v6508_v48  ;;  %5452 = vmatmul.mubr.msk.f32.gmra.mrb[24].mxu1 %vm698_vm1, %v6522_v29 }
 0x1a7   : > { %5257 = vmatprep.mubr.msk.f32.mxu0 %vm698_vm1, %v6516_v37  ;;  %5454 = vmatprep.mubr.msk.f32.mxu1 %vm698_vm1, %v6530_v19 }
 0x1aa   : > { %5258 = vmatmul.mubr.msk.f32.gmra.mrb[60].mxu0 %vm698_vm1, %v6524_v27  ;;  %5455 = vmatmul.mubr.msk.f32.gmra.mrb[26].mxu1 %vm698_vm1, %v6538_v6 }
 0x1ab   : > { %5260 = vmatprep.mubr.msk.f32.mxu0 %vm698_vm1, %v6532_v17  ;;  %5457 = vmatprep.mubr.msk.f32.mxu1 %vm698_vm1, %v6679_v25 }
 0x1ae   : > { %5261 = vmatmul.mubr.msk.f32.gmra.mrb[62].mxu0 %vm698_vm1, %v6540_v62  ;;  %5458 = vmatmul.mubr.msk.f32.gmra.mrb[28].mxu1 %vm698_vm1, %v6685_v28  ;;  %v1003_v62 = vld [vmem:[#allocation2 + $0x39] sm:$0xff] }
 0x1af   : > { %5265 = vmatprep.mubr.msk.f32.mxu0 %vm698_vm1, %v7118_v30  ;;  %5460 = vmatprep.mubr.msk.f32.mxu1 %vm698_vm1, %v1000_v26  ;;  %v1005_v26 = vld [vmem:[#allocation2 + $0x51] sm:$0xff] }
 0x1b2   : > { %5266 = vmatmul.mubr.msk.f32.vlgmr.msra.gmra.mrb[32].mxu0 %vm698_vm1, %v7119_v24  ;;  %5461 = vmatmul.mubr.msk.f32.gmra.mrb[30].mxu1 %vm698_vm1, %v1001_v31  ;;  %v1004_v24 = vld [vmem:[#allocation2 + $0x49] sm:$0xff] }
 0x1b3   : > { %5268 = vmatprep.mubr.msk.f32.mxu0 %vm698_vm1, %v6318_v32  ;;  %5465 = vmatprep.mubr.msk.f32.mxu1 %vm698_vm1, %v1002_v60  ;;  %v1006_v60 = vld [vmem:[#allocation2 + $0x61] sm:$0xff]  ;;  %v1008_v32 = vld [vmem:[#allocation2 + $0x79] sm:$0xff] }
 0x1b6   : > { %5269 = vmatmul.mubr.msk.f32.gmra.mrb[34].mxu0 %vm698_vm1, %v6330_v33  ;;  %5466 = vmatmul.mubr.msk.f32.vlgmr.msra.gmra.mrb[0].mxu1 %vm698_vm1, %v1003_v62  ;;  %v1007_v62 = vld [vmem:[#allocation2 + $0x69] sm:$0xff]  ;;  %v1009_v33 = vld [vmem:[#allocation2 + $0x81] sm:$0xff] }
 0x1b7   : > { %5514 = vmatpush3.msk.msra.mxu1 %vm1164_vm4, %v6565_v8  ;;  %5271 = vmatprep.mubr.msk.f32.mxu0 %vm698_vm1, %v6338_v10  ;;  %v7120_v10 = vld [vmem:[#allocation3_spill] sm:$0xff] }
 0x1b8   : > { %5468 = vmatprep.mubr.msk.f32.mxu1 %vm698_vm1, %v1004_v24 }
 0x1ba   : > { %5272 = vmatmul.mubr.msk.f32.gmra.mrb[36].mxu0 %vm698_vm1, %v6346_v36  ;;  %5469 = vmatmul.mubr.msk.f32.gmra.mrb[2].mxu1 %vm698_vm1, %v1005_v26  ;;  %v7121_v36 = vld [vmem:[#allocation4_spill] sm:$0xff] }
 0x1bb   : > { %5274 = vmatprep.mubr.msk.f32.mxu0 %vm698_vm1, %v6354_v41  ;;  %5471 = vmatprep.mubr.msk.f32.mxu1 %vm698_vm1, %v1006_v60  ;;  %v7122_v41 = vld [vmem:[#allocation5_spill] sm:$0xff] }
 0x1be   : > { %5275 = vmatmul.mubr.msk.f32.gmra.mrb[38].mxu0 %vm698_vm1, %v6362_v43  ;;  %5472 = vmatmul.mubr.msk.f32.gmra.mrb[4].mxu1 %vm698_vm1, %v1007_v62  ;;  %v7123_v43 = vld [vmem:[#allocation6_spill] sm:$0xff] }
 0x1bf   : > { %5277 = vmatprep.mubr.msk.f32.mxu0 %vm698_vm1, %v6370_v45  ;;  %5474 = vmatprep.mubr.msk.f32.mxu1 %vm698_vm1, %v1008_v32  ;;  %v7124_v45 = vld [vmem:[#allocation7_spill] sm:$0xff]  ;;  %v6926_v32 = vld [vmem:[%s7062_s5] ss:$0 sm:$0xff] }
 0x1c2   : > { %5278 = vmatmul.mubr.msk.f32.gmra.mrb[40].mxu0 %vm698_vm1, %v6378_v47  ;;  %5475 = vmatmul.mubr.msk.f32.gmra.mrb[6].mxu1 %vm698_vm1, %v1009_v33  ;;  %v7125_v47 = vld [vmem:[#allocation8_spill] sm:$0xff] }
 0x1c3   : > { %5280 = vmatprep.mubr.msk.f32.mxu0 %vm698_vm1, %v6386_v51  ;;  %5477 = vmatprep.mubr.msk.f32.mxu1 %vm698_vm1, %v7120_v10  ;;  %v7126_v51 = vld [vmem:[#allocation9_spill] sm:$0xff] }
 0x1c6   : > { %5281 = vmatmul.mubr.msk.f32.gmra.mrb[42].mxu0 %vm698_vm1, %v6394_v53  ;;  %5478 = vmatmul.mubr.msk.f32.gmra.mrb[8].mxu1 %vm698_vm1, %v7121_v36  ;;  %v7127_v53 = vld [vmem:[#allocation10_spill] sm:$0xff] }
 0x1c7   : > { %5283 = vmatprep.mubr.msk.f32.mxu0 %vm698_vm1, %v6402_v55  ;;  %5480 = vmatprep.mubr.msk.f32.mxu1 %vm698_vm1, %v7122_v41  ;;  %v7128_v55 = vld [vmem:[#allocation11_spill] sm:$0xff] }
 0x1ca   : > { %5284 = vmatmul.mubr.msk.f32.gmra.mrb[44].mxu0 %vm698_vm1, %v6410_v57  ;;  %5481 = vmatmul.mubr.msk.f32.gmra.mrb[10].mxu1 %vm698_vm1, %v7123_v43  ;;  %v7129_v57 = vld [vmem:[#allocation12_spill] sm:$0xff] }
 0x1cb   : > { %5286 = vmatprep.mubr.msk.f32.mxu0 %vm698_vm1, %v6418_v0  ;;  %5483 = vmatprep.mubr.msk.f32.mxu1 %vm698_vm1, %v7124_v45  ;;  %v7130_v0 = vld [vmem:[#allocation13_spill] sm:$0xff] }
 0x1ce   : > { %5287 = vmatmul.mubr.msk.f32.gmra.mrb[46].mxu0 %vm698_vm1, %v6426_v2  ;;  %5484 = vmatmul.mubr.msk.f32.gmra.mrb[12].mxu1 %vm698_vm1, %v7125_v47  ;;  %v7131_v2 = vld [vmem:[#allocation14_spill] sm:$0xff] }
 0x1cf   : > { %5289 = vmatprep.mubr.msk.f32.mxu0 %vm698_vm1, %v6434_v4  ;;  %5486 = vmatprep.mubr.msk.f32.mxu1 %vm698_vm1, %v7126_v51  ;;  %v7132_v4 = vld [vmem:[#allocation15_spill] sm:$0xff] }
 0x1d2   : > { %5290 = vmatmul.mubr.msk.f32.gmra.mrb[48].mxu0 %vm698_vm1, %v6442_v7  ;;  %5487 = vmatmul.mubr.msk.f32.gmra.mrb[14].mxu1 %vm698_vm1, %v7127_v53  ;;  %v7133_v7 = vld [vmem:[#allocation16_spill] sm:$0xff] }
 0x1d3   : > { %5292 = vmatprep.mubr.msk.f32.mxu0 %vm698_vm1, %v6450_v13  ;;  %5489 = vmatprep.mubr.msk.f32.mxu1 %vm698_vm1, %v7128_v55  ;;  %v1033_v13 = vld [vmem:[#allocation2 + $0x1a1] sm:$0xff] }
 0x1d6   : > { %5293 = vmatmul.mubr.msk.f32.gmra.mrb[50].mxu0 %vm698_vm1, %v6458_v18  ;;  %5490 = vmatmul.mubr.msk.f32.gmra.mrb[16].mxu1 %vm698_vm1, %v7129_v57 }
 0x1d7   : > { %5295 = vmatprep.mubr.msk.f32.mxu0 %vm698_vm1, %v6466_v23  ;;  %5492 = vmatprep.mubr.msk.f32.mxu1 %vm698_vm1, %v7130_v0  ;;  %v7134_v23 = vld [vmem:[#allocation17_spill] sm:$0xff] }
 0x1da   : > { %5296 = vmatmul.mubr.msk.f32.gmra.mrb[52].mxu0 %vm698_vm1, %v6474_v20  ;;  %5493 = vmatmul.mubr.msk.f32.gmra.mrb[18].mxu1 %vm698_vm1, %v7131_v2  ;;  %v7135_v20 = vld [vmem:[#allocation18_spill] sm:$0xff] }
 0x1db   : > { %5298 = vmatprep.mubr.msk.f32.mxu0 %vm698_vm1, %v6482_v40  ;;  %5495 = vmatprep.mubr.msk.f32.mxu1 %vm698_vm1, %v7132_v4  ;;  %v7136_v40 = vld [vmem:[#allocation19_spill] sm:$0xff] }
 0x1de   : > { %5299 = vmatmul.mubr.msk.f32.gmra.mrb[54].mxu0 %vm698_vm1, %v6490_v12  ;;  %5496 = vmatmul.mubr.msk.f32.gmra.mrb[20].mxu1 %vm698_vm1, %v7133_v7  ;;  %v7137_v12 = vld [vmem:[#allocation20_spill] sm:$0xff] }
 0x1df   : > { %5301 = vmatprep.mubr.msk.f32.mxu0 %vm698_vm1, %v6498_v63  ;;  %5498 = vmatprep.mubr.msk.f32.mxu1 %vm698_vm1, %v7134_v23  ;;  %v7138_v63 = vld [vmem:[#allocation21_spill] sm:$0xff] }
 0x1e2   : > { %5302 = vmatmul.mubr.msk.f32.gmra.mrb[56].mxu0 %vm698_vm1, %v6506_v50  ;;  %5499 = vmatmul.mubr.msk.f32.gmra.mrb[22].mxu1 %vm698_vm1, %v7135_v20  ;;  %v7139_v50 = vld [vmem:[#allocation22_spill] sm:$0xff] }
 0x1e3   : > { %5304 = vmatprep.mubr.msk.f32.mxu0 %vm698_vm1, %v6514_v39  ;;  %5501 = vmatprep.mubr.msk.f32.mxu1 %vm698_vm1, %v7136_v40  ;;  %v7140_v39 = vld [vmem:[#allocation23_spill] sm:$0xff] }
 0x1e6   : > { %5305 = vmatmul.mubr.msk.f32.gmra.mrb[58].mxu0 %vm698_vm1, %v6522_v29  ;;  %5502 = vmatmul.mubr.msk.f32.gmra.mrb[24].mxu1 %vm698_vm1, %v7137_v12  ;;  %v1032_v29 = vld [vmem:[#allocation2 + $0x199] sm:$0xff] }
 0x1e7   : > { %5307 = vmatprep.mubr.msk.f32.mxu0 %vm698_vm1, %v6530_v19  ;;  %5504 = vmatprep.mubr.msk.f32.mxu1 %vm698_vm1, %v7138_v63  ;;  %v7141_v19 = vld [vmem:[#allocation24_spill] sm:$0xff] }
 0x1ea   : > { %5308 = vmatmul.mubr.msk.f32.gmra.mrb[60].mxu0 %vm698_vm1, %v6538_v6  ;;  %5505 = vmatmul.mubr.msk.f32.gmra.mrb[26].mxu1 %vm698_vm1, %v7139_v50  ;;  %v7142_v6 = vld [vmem:[#allocation27_spill] sm:$0xff] }
 0x1eb   : > { %5310 = vmatprep.mubr.msk.f32.mxu0 %vm698_vm1, %v6679_v25  ;;  %5507 = vmatprep.mubr.msk.f32.mxu1 %vm698_vm1, %v7140_v39 }
 0x1ee   : > { %5311 = vmatmul.mubr.msk.f32.gmra.mrb[62].mxu0 %vm698_vm1, %v6685_v28  ;;  %5508 = vmatmul.mubr.msk.f32.gmra.mrb[28].mxu1 %vm698_vm1, %v7141_v19 }
 0x1ef   : > { %5510 = vmatprep.mubr.msk.f32.mxu1 %vm698_vm1, %v1032_v29 }
 0x1f2   : > { %5511 = vmatmul.mubr.msk.f32.gmra.mrb[30].mxu1 %vm698_vm1, %v1033_v13 }
 0x1f3   : > { %5515 = vmatprep.mubr.msk.f32.mxu1 %vm698_vm1, %v6324_v59 }
 0x1f6   : > { %5516 = vmatmul.mubr.msk.f32.vlgmr.msra.gmra.mrb[0].mxu1 %vm698_vm1, %v6332_v34 }
 0x1f7   : > { %5518 = vmatprep.mubr.msk.f32.mxu1 %vm698_vm1, %v6340_v35 }
 0x1fa   : > { %5519 = vmatmul.mubr.msk.f32.gmra.mrb[2].mxu1 %vm698_vm1, %v6348_v38 }
 0x1fb   : > { %5521 = vmatprep.mubr.msk.f32.mxu1 %vm698_vm1, %v6356_v42 }
 0x1fe   : > { %5522 = vmatmul.mubr.msk.f32.gmra.mrb[4].mxu1 %vm698_vm1, %v6364_v44 }
 0x1ff   : > { %5524 = vmatprep.mubr.msk.f32.mxu1 %vm698_vm1, %v6372_v46 }
 0x202   : > { %5525 = vmatmul.mubr.msk.f32.gmra.mrb[6].mxu1 %vm698_vm1, %v6380_v49 }
 0x203   : > { %5527 = vmatprep.mubr.msk.f32.mxu1 %vm698_vm1, %v6388_v52 }
 0x206   : > { %5528 = vmatmul.mubr.msk.f32.gmra.mrb[8].mxu1 %vm698_vm1, %v6396_v54 }
 0x207   : > { %5530 = vmatprep.mubr.msk.f32.mxu1 %vm698_vm1, %v6404_v56 }
 0x20a   : > { %5531 = vmatmul.mubr.msk.f32.gmra.mrb[10].mxu1 %vm698_vm1, %v6412_v61 }
 0x20b   : > { %5533 = vmatprep.mubr.msk.f32.mxu1 %vm698_vm1, %v6420_v1 }
 0x20e   : > { %5534 = vmatmul.mubr.msk.f32.gmra.mrb[12].mxu1 %vm698_vm1, %v6428_v3 }
 0x20f   : > { %5536 = vmatprep.mubr.msk.f32.mxu1 %vm698_vm1, %v6436_v5 }
 0x212   : > { %5537 = vmatmul.mubr.msk.f32.gmra.mrb[14].mxu1 %vm698_vm1, %v6444_v11 }
 0x213   : > { %5539 = vmatprep.mubr.msk.f32.mxu1 %vm698_vm1, %v6452_v14 }
 0x216   : > { %5540 = vmatmul.mubr.msk.f32.gmra.mrb[16].mxu1 %vm698_vm1, %v6460_v21 }
 0x217   : > { %5542 = vmatprep.mubr.msk.f32.mxu1 %vm698_vm1, %v6468_v22 }
 0x21a   : > { %5543 = vmatmul.mubr.msk.f32.gmra.mrb[18].mxu1 %vm698_vm1, %v6476_v16 }
 0x21b   : > { %5545 = vmatprep.mubr.msk.f32.mxu1 %vm698_vm1, %v6484_v15  ;;  %v7143_v15 = vld [vmem:[#allocation28_spill] sm:$0xff] }
 0x21e   : > { %5546 = vmatmul.mubr.msk.f32.gmra.mrb[20].mxu1 %vm698_vm1, %v6492_v9  ;;  %v1064_v9 = vld [vmem:[#allocation2 + $0x19a] sm:$0xff] }
 0x21f   : > { %5548 = vmatprep.mubr.msk.f32.mxu1 %vm698_vm1, %v6500_v58  ;;  %v7144_v58 = vld [vmem:[#allocation29_spill] sm:$0xff] }
 0x222   : > { %5549 = vmatmul.mubr.msk.f32.gmra.mrb[22].mxu1 %vm698_vm1, %v6508_v48  ;;  %v1065_v48 = vld [vmem:[#allocation2 + $0x1a2] sm:$0xff] }
 0x223   : > { %5551 = vmatprep.mubr.msk.f32.mxu1 %vm698_vm1, %v6516_v37 }
 0x226   : > { %5552 = vmatmul.mubr.msk.f32.gmra.mrb[24].mxu1 %vm698_vm1, %v6524_v27 }
 0x227   : > { %5554 = vmatprep.mubr.msk.f32.mxu1 %vm698_vm1, %v6532_v17 }
 0x22a   : > { %5555 = vmatmul.mubr.msk.f32.gmra.mrb[26].mxu1 %vm698_vm1, %v7142_v6 }
 0x22b   : > { %5557 = vmatprep.mubr.msk.f32.mxu1 %vm698_vm1, %v7143_v15 }
 0x22e   : > { %5558 = vmatmul.mubr.msk.f32.gmra.mrb[28].mxu1 %vm698_vm1, %v7144_v58 }
 0x22f   : > { %5560 = vmatprep.mubr.msk.f32.mxu1 %vm698_vm1, %v1064_v9 }
 0x232   : > { %5561 = vmatmul.mubr.msk.f32.gmra.mrb[30].mxu1 %vm698_vm1, %v1065_v48 }
 0x285   : > { %v5267_v37 = vpop.f32.mrb[32].mxu0 }
 0x286   : > { %v2240_v27 = vpop.f32.mrb[33].mxu0 }
 0x289   : > { %v5270_v16 = vpop.f32.mrb[34].mxu0 }
 0x28a   : > { %v2250_v22 = vpop.f32.mrb[35].mxu0 }
 0x28d   : > { %v5273_v17 = vpop.f32.mrb[36].mxu0 }
 0x28e   : > { %v2260_v59 = vpop.f32.mrb[37].mxu0 }
 0x291   : > { %v5276_v34 = vpop.f32.mrb[38].mxu0 }
 0x292   : > { %v2270_v35 = vpop.f32.mrb[39].mxu0 }
 0x295   : > { %v6875_v38 = vpop.f32.mrb[40].mxu0 }
 0x296   : > { %v6877_v42 = vpop.f32.mrb[41].mxu0 }
 0x299   : > { %v6879_v44 = vpop.f32.mrb[42].mxu0 }
 0x29a   : > { %v6881_v46 = vpop.f32.mrb[43].mxu0 }
 0x29d   : > { %v6883_v49 = vpop.f32.mrb[44].mxu0 }
 0x29e   : > { %v6885_v52 = vpop.f32.mrb[45].mxu0 }
 0x2a1   : > { %v6887_v54 = vpop.f32.mrb[46].mxu0 }
 0x2a2   : > { %v6889_v56 = vpop.f32.mrb[47].mxu0 }
 0x2a5   : > { %v6891_v61 = vpop.f32.mrb[48].mxu0 }
 0x2a6   : > { %v6893_v1 = vpop.f32.mrb[49].mxu0 }
 0x2a9   : > { %v6895_v3 = vpop.f32.mrb[50].mxu0 }
 0x2aa   : > { %v6897_v5 = vpop.f32.mrb[51].mxu0 }
 0x2ad   : > { %v6899_v11 = vpop.f32.mrb[52].mxu0 }
 0x2ae   : > { %v6901_v14 = vpop.f32.mrb[53].mxu0 }
 0x2b1   : > { %v6903_v18 = vpop.f32.mrb[54].mxu0 }
 0x2b2   : > { %v6905_v21 = vpop.f32.mrb[55].mxu0 }
 0x2b5   : > { %v6907_v8 = vpop.f32.mrb[56].mxu0 }
 0x2b6   : > { %v6909_v25 = vpop.f32.mrb[57].mxu0 }
 0x2b9   : > { %v6911_v28 = vpop.f32.mrb[58].mxu0 }
 0x2ba   : > { %v6913_v30 = vpop.f32.mrb[59].mxu0 }
 0x2bd   : > { %v6915_v31 = vpop.f32.mrb[60].mxu0 }
 0x2be   : > { %v6917_v24 = vpop.f32.mrb[61].mxu0 }
 0x2c1   : > { %v6919_v26 = vpop.f32.mrb[62].mxu0 }
 0x2c2   : > { %v6921_v60 = vpop.f32.mrb[63].mxu0 }
 0x2c9   : > { %v5517_v62 = vpop.f32.mrb[0].mxu1 }
 0x2ca   : > { %v5563_v33 = vadd.f32 %v5517_v62, %v5267_v37  ;;  %v4025_v10 = vpop.f32.mrb[1].mxu1 }
 0x2cb   : > { %v5564_v36 = vadd.f32 %v4025_v10, %v2240_v27 }
 0x2cc   : > { %v4224_v41 = vadd.f32 %v5563_v33, %v6926_v32 }
 0x2cd   : > { %v4223_v43 = vadd.f32 %v5564_v36, %v6926_v32  ;;  %v5520_v45 = vpop.f32.mrb[2].mxu1 }
 0x2ce   : > { %v4256_v47 = vmax.f32 %v4224_v41, 0.0  ;;  %v5565_v51 = vadd.f32 %v5520_v45, %v5270_v16  ;;  %v4035_v53 = vpop.f32.mrb[3].mxu1 }
 0x2cf   : > { %v4255_v55 = vmax.f32 %v4223_v43, 0.0  ;;  %v5566_v57 = vadd.f32 %v4035_v53, %v2250_v22 }
 0x2d0   : > { %4288 = vst.msk [vmem:[%s6933_s10 + $0x8] sm:$0xff] %vm698_vm1, %v4256_v47  ;;  %v4226_v0 = vadd.f32 %v5565_v51, %v6926_v32 }
 0x2d1   : > { %4287 = vst.msk [vmem:[%s6933_s10] sm:$0xff] %vm698_vm1, %v4255_v55  ;;  %v4225_v2 = vadd.f32 %v5566_v57, %v6926_v32  ;;  %v5523_v4 = vpop.f32.mrb[4].mxu1 }
 0x2d2   : > { %v4258_v7 = vmax.f32 %v4226_v0, 0.0  ;;  %v5567_v23 = vadd.f32 %v5523_v4, %v5273_v17  ;;  %v4045_v20 = vpop.f32.mrb[5].mxu1 }
 0x2d3   : > { %v4257_v40 = vmax.f32 %v4225_v2, 0.0  ;;  %v5568_v12 = vadd.f32 %v4045_v20, %v2260_v59 }
 0x2d4   : > { %4290 = vst.msk [vmem:[%s6933_s10 + $0x18] sm:$0xff] %vm698_vm1, %v4258_v7  ;;  %v4228_v63 = vadd.f32 %v5567_v23, %v6926_v32 }
 0x2d5   : > { %4289 = vst.msk [vmem:[%s6933_s10 + $0x10] sm:$0xff] %vm698_vm1, %v4257_v40  ;;  %v4227_v50 = vadd.f32 %v5568_v12, %v6926_v32  ;;  %v5526_v39 = vpop.f32.mrb[6].mxu1 }
 0x2d6   : > { %v4260_v29 = vmax.f32 %v4228_v63, 0.0  ;;  %v5569_v19 = vadd.f32 %v5526_v39, %v5276_v34  ;;  %v4055_v13 = vpop.f32.mrb[7].mxu1 }
 0x2d7   : > { %v4259_v6 = vmax.f32 %v4227_v50, 0.0  ;;  %v5570_v15 = vadd.f32 %v4055_v13, %v2270_v35 }
 0x2d8   : > { %4292 = vst.msk [vmem:[%s6933_s10 + $0x28] sm:$0xff] %vm698_vm1, %v4260_v29  ;;  %v4230_v9 = vadd.f32 %v5569_v19, %v6926_v32 }
 0x2d9   : > { %4291 = vst.msk [vmem:[%s6933_s10 + $0x20] sm:$0xff] %vm698_vm1, %v4259_v6  ;;  %v4229_v58 = vadd.f32 %v5570_v15, %v6926_v32  ;;  %v5529_v48 = vpop.f32.mrb[8].mxu1 }
 0x2da   : > { %v4262_v37 = vmax.f32 %v4230_v9, 0.0  ;;  %v5571_v27 = vadd.f32 %v5529_v48, %v6875_v38  ;;  %v4065_v16 = vpop.f32.mrb[9].mxu1 }
 0x2db   : > { %v4261_v22 = vmax.f32 %v4229_v58, 0.0  ;;  %v5572_v17 = vadd.f32 %v4065_v16, %v6877_v42 }
 0x2dc   : > { %4294 = vst.msk [vmem:[%s6933_s10 + $0x38] sm:$0xff] %vm698_vm1, %v4262_v37  ;;  %v4232_v59 = vadd.f32 %v5571_v27, %v6926_v32 }
 0x2dd   : > { %4293 = vst.msk [vmem:[%s6933_s10 + $0x30] sm:$0xff] %vm698_vm1, %v4261_v22  ;;  %v4231_v34 = vadd.f32 %v5572_v17, %v6926_v32  ;;  %v5532_v35 = vpop.f32.mrb[10].mxu1 }
 0x2de   : > { %v4264_v62 = vmax.f32 %v4232_v59, 0.0  ;;  %v5573_v33 = vadd.f32 %v5532_v35, %v6879_v44  ;;  %v4075_v38 = vpop.f32.mrb[11].mxu1 }
 0x2df   : > { %v4263_v10 = vmax.f32 %v4231_v34, 0.0  ;;  %v5574_v36 = vadd.f32 %v4075_v38, %v6881_v46 }
 0x2e0   : > { %4296 = vst.msk [vmem:[%s6933_s10 + $0x48] sm:$0xff] %vm698_vm1, %v4264_v62  ;;  %v4234_v42 = vadd.f32 %v5573_v33, %v6926_v32 }
 0x2e1   : > { %4295 = vst.msk [vmem:[%s6933_s10 + $0x40] sm:$0xff] %vm698_vm1, %v4263_v10  ;;  %v4233_v41 = vadd.f32 %v5574_v36, %v6926_v32  ;;  %v5535_v43 = vpop.f32.mrb[12].mxu1 }
 0x2e2   : > { %v4266_v45 = vmax.f32 %v4234_v42, 0.0  ;;  %v5575_v47 = vadd.f32 %v5535_v43, %v6883_v49  ;;  %v4085_v44 = vpop.f32.mrb[13].mxu1 }
 0x2e3   : > { %v4265_v51 = vmax.f32 %v4233_v41, 0.0  ;;  %v5576_v53 = vadd.f32 %v4085_v44, %v6885_v52 }
 0x2e4   : > { %4298 = vst.msk [vmem:[%s6933_s10 + $0x58] sm:$0xff] %vm698_vm1, %v4266_v45  ;;  %v4236_v46 = vadd.f32 %v5575_v47, %v6926_v32 }
 0x2e5   : > { %4297 = vst.msk [vmem:[%s6933_s10 + $0x50] sm:$0xff] %vm698_vm1, %v4265_v51  ;;  %v4235_v55 = vadd.f32 %v5576_v53, %v6926_v32  ;;  %v5538_v57 = vpop.f32.mrb[14].mxu1 }
 0x2e6   : > { %v4268_v0 = vmax.f32 %v4236_v46, 0.0  ;;  %v5577_v2 = vadd.f32 %v5538_v57, %v6887_v54  ;;  %v4095_v49 = vpop.f32.mrb[15].mxu1 }
 0x2e7   : > { %v4267_v4 = vmax.f32 %v4235_v55, 0.0  ;;  %v5578_v7 = vadd.f32 %v4095_v49, %v6889_v56 }
 0x2e8   : > { %4300 = vst.msk [vmem:[%s6933_s10 + $0x68] sm:$0xff] %vm698_vm1, %v4268_v0  ;;  %v4238_v52 = vadd.f32 %v5577_v2, %v6926_v32 }
 0x2e9   : > { %4299 = vst.msk [vmem:[%s6933_s10 + $0x60] sm:$0xff] %vm698_vm1, %v4267_v4  ;;  %v4237_v23 = vadd.f32 %v5578_v7, %v6926_v32  ;;  %v5541_v20 = vpop.f32.mrb[16].mxu1 }
 0x2ea   : > { %v4270_v40 = vmax.f32 %v4238_v52, 0.0  ;;  %v5579_v12 = vadd.f32 %v5541_v20, %v6891_v61  ;;  %v4105_v54 = vpop.f32.mrb[17].mxu1 }
 0x2eb   : > { %v4269_v63 = vmax.f32 %v4237_v23, 0.0  ;;  %v5580_v50 = vadd.f32 %v4105_v54, %v6893_v1 }
 0x2ec   : > { %4302 = vst.msk [vmem:[%s6933_s10 + $0x78] sm:$0xff] %vm698_vm1, %v4270_v40  ;;  %v4240_v56 = vadd.f32 %v5579_v12, %v6926_v32 }
 0x2ed   : > { %4301 = vst.msk [vmem:[%s6933_s10 + $0x70] sm:$0xff] %vm698_vm1, %v4269_v63  ;;  %v4239_v39 = vadd.f32 %v5580_v50, %v6926_v32  ;;  %v5544_v29 = vpop.f32.mrb[18].mxu1 }
 0x2ee   : > { %v4272_v19 = vmax.f32 %v4240_v56, 0.0  ;;  %v5581_v13 = vadd.f32 %v5544_v29, %v6895_v3  ;;  %v4115_v61 = vpop.f32.mrb[19].mxu1 }
 0x2ef   : > { %v4271_v6 = vmax.f32 %v4239_v39, 0.0  ;;  %v5582_v15 = vadd.f32 %v4115_v61, %v6897_v5 }
 0x2f0   : > { %4304 = vst.msk [vmem:[%s6933_s10 + $0x88] sm:$0xff] %vm698_vm1, %v4272_v19  ;;  %v4242_v1 = vadd.f32 %v5581_v13, %v6926_v32 }
 0x2f1   : > { %4303 = vst.msk [vmem:[%s6933_s10 + $0x80] sm:$0xff] %vm698_vm1, %v4271_v6  ;;  %v4241_v9 = vadd.f32 %v5582_v15, %v6926_v32  ;;  %v5547_v58 = vpop.f32.mrb[20].mxu1 }
 0x2f2   : > { %v4274_v48 = vmax.f32 %v4242_v1, 0.0  ;;  %v5583_v37 = vadd.f32 %v5547_v58, %v6899_v11  ;;  %v4125_v3 = vpop.f32.mrb[21].mxu1 }
 0x2f3   : > { %v4273_v27 = vmax.f32 %v4241_v9, 0.0  ;;  %v5584_v16 = vadd.f32 %v4125_v3, %v6901_v14 }
 0x2f4   : > { %4306 = vst.msk [vmem:[%s6933_s10 + $0x98] sm:$0xff] %vm698_vm1, %v4274_v48  ;;  %v4244_v5 = vadd.f32 %v5583_v37, %v6926_v32 }
 0x2f5   : > { %4305 = vst.msk [vmem:[%s6933_s10 + $0x90] sm:$0xff] %vm698_vm1, %v4273_v27  ;;  %v4243_v22 = vadd.f32 %v5584_v16, %v6926_v32  ;;  %v5550_v17 = vpop.f32.mrb[22].mxu1 }
 0x2f6   : > { %v4276_v59 = vmax.f32 %v4244_v5, 0.0  ;;  %v5585_v34 = vadd.f32 %v5550_v17, %v6903_v18  ;;  %v4135_v11 = vpop.f32.mrb[23].mxu1 }
 0x2f7   : > { %v4275_v35 = vmax.f32 %v4243_v22, 0.0  ;;  %v5586_v62 = vadd.f32 %v4135_v11, %v6905_v21 }
 0x2f8   : > { %4308 = vst.msk [vmem:[%s6933_s10 + $0xa8] sm:$0xff] %vm698_vm1, %v4276_v59  ;;  %v4246_v14 = vadd.f32 %v5585_v34, %v6926_v32 }
 0x2f9   : > { %4307 = vst.msk [vmem:[%s6933_s10 + $0xa0] sm:$0xff] %vm698_vm1, %v4275_v35  ;;  %v4245_v33 = vadd.f32 %v5586_v62, %v6926_v32  ;;  %v5553_v38 = vpop.f32.mrb[24].mxu1 }
 0x2fa   : > { %v4278_v10 = vmax.f32 %v4246_v14, 0.0  ;;  %v5587_v36 = vadd.f32 %v5553_v38, %v6907_v8  ;;  %v4145_v18 = vpop.f32.mrb[25].mxu1 }
 0x2fb   : > { %v4277_v42 = vmax.f32 %v4245_v33, 0.0  ;;  %v5588_v41 = vadd.f32 %v4145_v18, %v6909_v25 }
 0x2fc   : > { %4310 = vst.msk [vmem:[%s6933_s10 + $0xb8] sm:$0xff] %vm698_vm1, %v4278_v10  ;;  %v4248_v21 = vadd.f32 %v5587_v36, %v6926_v32 }
 0x2fd   : > { %4309 = vst.msk [vmem:[%s6933_s10 + $0xb0] sm:$0xff] %vm698_vm1, %v4277_v42  ;;  %v4247_v43 = vadd.f32 %v5588_v41, %v6926_v32  ;;  %v5556_v45 = vpop.f32.mrb[26].mxu1 }
 0x2fe   : > { %v4280_v47 = vmax.f32 %v4248_v21, 0.0  ;;  %v5589_v44 = vadd.f32 %v5556_v45, %v6911_v28  ;;  %v4155_v8 = vpop.f32.mrb[27].mxu1 }
 0x2ff   : > { %v4279_v51 = vmax.f32 %v4247_v43, 0.0  ;;  %v5590_v53 = vadd.f32 %v4155_v8, %v6913_v30 }
 0x300   : > { %4312 = vst.msk [vmem:[%s6933_s10 + $0xc8] sm:$0xff] %vm698_vm1, %v4280_v47  ;;  %v4250_v25 = vadd.f32 %v5589_v44, %v6926_v32 }
 0x301   : > { %4311 = vst.msk [vmem:[%s6933_s10 + $0xc0] sm:$0xff] %vm698_vm1, %v4279_v51  ;;  %v4249_v46 = vadd.f32 %v5590_v53, %v6926_v32  ;;  %v5559_v55 = vpop.f32.mrb[28].mxu1 }
 0x302   : > { %v4282_v57 = vmax.f32 %v4250_v25, 0.0  ;;  %v5591_v0 = vadd.f32 %v5559_v55, %v6915_v31  ;;  %v4165_v28 = vpop.f32.mrb[29].mxu1 }
 0x303   : > { %v4281_v2 = vmax.f32 %v4249_v46, 0.0  ;;  %v5592_v49 = vadd.f32 %v4165_v28, %v6917_v24 }
 0x304   : > { %4314 = vst.msk [vmem:[%s6933_s10 + $0xd8] sm:$0xff] %vm698_vm1, %v4282_v57  ;;  %v4252_v30 = vadd.f32 %v5591_v0, %v6926_v32 }
 0x305   : > { %4313 = vst.msk [vmem:[%s6933_s10 + $0xd0] sm:$0xff] %vm698_vm1, %v4281_v2  ;;  %v4251_v4 = vadd.f32 %v5592_v49, %v6926_v32  ;;  %v5562_v7 = vpop.f32.mrb[30].mxu1 }
 0x306   : > { %v4284_v52 = vmax.f32 %v4252_v30, 0.0  ;;  %v5593_v23 = vadd.f32 %v5562_v7, %v6919_v26  ;;  %v4175_v31 = vpop.f32.mrb[31].mxu1 }
 0x307   : > { %v4283_v20 = vmax.f32 %v4251_v4, 0.0  ;;  %v5594_v40 = vadd.f32 %v4175_v31, %v6921_v60 }
 0x308   : > { %4316 = vst.msk [vmem:[%s6933_s10 + $0xe8] sm:$0xff] %vm698_vm1, %v4284_v52  ;;  %v4254_v24 = vadd.f32 %v5593_v23, %v6926_v32 }
 0x309   : > { %4315 = vst.msk [vmem:[%s6933_s10 + $0xe0] sm:$0xff] %vm698_vm1, %v4283_v20  ;;  %v4253_v12 = vadd.f32 %v5594_v40, %v6926_v32 }
 0x30a   : > { %v4286_v54 = vmax.f32 %v4254_v24, 0.0 }
 0x30b   : > { %v4285_v63 = vmax.f32 %v4253_v12, 0.0 }
 0x30c   : > { %4318 = vst.msk [vmem:[%s6933_s10 + $0xf8] sm:$0xff] %vm698_vm1, %v4286_v54 }
 0x30d   : > { %4317 = vst.msk [vmem:[%s6933_s10 + $0xf0] sm:$0xff] %vm698_vm1, %v4285_v63 }
 0x30e PF: > { %s16_s21 = sadd.s32 1, %s5834_s21  }
 0x30f   : > { %p13_p4 = scmp.ge.s32.totalorder %s16_s21, 4  }
 0x311   :  { %15 = sbr.rel (!%p13_p4) target bundleno = 1 (0x1), region = 80 }

</bundles_post_ra>
